<compile_context>
chip_gen: v5e
topology: v5e:2x2
jax: 0.10.0
libtpu: 0.0.40
codegen_flags: <defaults>
</compile_context>

<pallas_src>
import math
from functools import partial

import jax
import jax.numpy as jnp
from jax import lax
from jax.experimental import pallas as pl
from jax.experimental.pallas import tpu as pltpu

GATE_PAD = 128  # padded per-gate lane width (one full lane group)


# --------------------------------- kernel -----------------------------------

def basic_gru_kernel(hidden_size,
                     x_ref,                                   # (T*B, I) f32
                     wih1_ref, whh1_ref, bgi1_ref, bhn1_ref,  # layer-1 GRU
                     ln1g_ref, ln1b_ref,                      # layer_norm1
                     wx2_ref, wh2_ref, b2x_ref, bhn2_ref,     # layer-2 GRU (split)
                     ln2g_ref, ln2b_ref,                      # layer_norm2
                     wfc1_ref, bfc1_ref, wfc2_ref, bfc2_ref,  # MLP head
                     wfc3_ref, bfc3_ref,
                     out_ref):                                # (B, 128) f32
    H = hidden_size
    G = ln1g_ref.shape[-1]            # padded gate width (128)
    B = out_ref.shape[0]
    TB, I = x_ref.shape
    T = TB // B
    inv_h = 1.0 / float(H)
    bf16 = jnp.bfloat16

    def layer_norm(v, gamma, beta):
        # Fused LN: the two cross-lane reductions are independent (issue
        # back-to-back on the XLU); var = E[x^2] - mean^2.  Pad lanes of v are
        # exactly zero and gamma/beta pad lanes are zero, so the output's pad
        # lanes stay zero and no lane mask is needed.
        s = jnp.sum(v, axis=-1, keepdims=True)
        s2 = jnp.sum(v * v, axis=-1, keepdims=True)
        mu = s * inv_h
        var = s2 * inv_h - mu * mu
        return (v - mu) * lax.rsqrt(var + 1e-5) * gamma + beta

    # ---- hoisted layer-1 input projection: one MXU pass for all T steps ----
    # bgi1 already contains b_ih (all gates) + b_hh (r, z gates).
    gi1_all = (jnp.dot(x_ref[...].astype(bf16), wih1_ref[...],
                       preferred_element_type=jnp.float32)
               + bgi1_ref[...])                                # (T*B, 3G) f32

    # ---- hoisted weight loads & bias broadcasts (outside the recurrence) ----
    whh1 = whh1_ref[...]                                       # (G, 3G) bf16
    wx2 = wx2_ref[...]                                         # (G, 3G) bf16
    wh2 = wh2_ref[...]                                         # (G, 3G) bf16
    bhn1 = jnp.broadcast_to(bhn1_ref[...], (B, G))             # b_hh (n gate)
    bhn2 = jnp.broadcast_to(bhn2_ref[...], (B, G))
    b2x = jnp.broadcast_to(b2x_ref[...], (B, 3 * G))
    ln1g = ln1g_ref[...]
    ln1b = ln1b_ref[...]

    h1 = jnp.zeros((B, G), jnp.float32)
    h2 = jnp.zeros((B, G), jnp.float32)

    # Fully unrolled recurrence (T is small and static): gives the scheduler
    # cross-iteration visibility so gh2[t] / gru1[t+1] overlap.
    for t in range(T):
        gi1 = gi1_all[t * B:(t + 1) * B]                       # (B, 3G) static slice

        # ---- GRU layer 2, h-dependent half: depends only on h2[t-1], so it
        #      issues early and overlaps with the layer-1 step below.
        gh2 = jnp.dot(h2.astype(bf16), wh2, preferred_element_type=jnp.float32)

        # ---- GRU layer 1: only the h1 matmul is on the serial path.
        gh1 = jnp.dot(h1.astype(bf16), whh1, preferred_element_type=jnp.float32)
        r1 = jax.nn.sigmoid(gi1[:, :G] + gh1[:, :G])
        z1 = jax.nn.sigmoid(gi1[:, G:2 * G] + gh1[:, G:2 * G])
        n1 = jnp.tanh(gi1[:, 2 * G:] + r1 * (gh1[:, 2 * G:] + bhn1))
        h1 = (1.0 - z1) * n1 + z1 * h1

        g1 = layer_norm(h1, ln1g, ln1b)                        # layer_norm1

        # ---- GRU layer 2, g1-dependent half (no concat).
        gx2 = (jnp.dot(g1.astype(bf16), wx2, preferred_element_type=jnp.float32)
               + b2x)
        r2 = jax.nn.sigmoid(gx2[:, :G] + gh2[:, :G])
        z2 = jax.nn.sigmoid(gx2[:, G:2 * G] + gh2[:, G:2 * G])
        n2 = jnp.tanh(gx2[:, 2 * G:] + r2 * (gh2[:, 2 * G:] + bhn2))
        h2 = (1.0 - z2) * n2 + z2 * h2

    # layer_norm2 on the last timestep of gru2 (== final hidden state).
    g2 = layer_norm(h2, ln2g_ref[...], ln2b_ref[...])
    # dropout: identity (inference / eval mode)

    f1 = jnp.maximum(
        jnp.dot(g2.astype(bf16), wfc1_ref[...],
                preferred_element_type=jnp.float32) + bfc1_ref[...], 0.0)
    f2 = jnp.maximum(
        jnp.dot(f1.astype(bf16), wfc2_ref[...],
                preferred_element_type=jnp.float32) + bfc2_ref[...], 0.0)
    out_ref[...] = (jnp.dot(f2.astype(bf16), wfc3_ref[...],
                            preferred_element_type=jnp.float32)
                    + bfc3_ref[...])


# ----------------------------- parameter setup -------------------------------

def init_params(key, input_size, hidden_size, output_size):
    """Deterministic parameter init (PyTorch-style uniform ranges).

    GRU/FC weights are stored in math orientation (in_dim, out_dim); gate order
    along the 3H axis is [r, z, n] (PyTorch convention).
    """
    ks = list(jax.random.split(key, 16))
    H = hidden_size

    def u(k, shape, bound):
        return jax.random.uniform(k, shape, jnp.float32, -bound, bound)

    bg = 1.0 / math.sqrt(H)
    return {
        "wih1": u(ks[0], (input_size, 3 * H), bg),
        "whh1": u(ks[1], (H, 3 * H), bg),
        "bih1": u(ks[2], (1, 3 * H), bg),
        "bhh1": u(ks[3], (1, 3 * H), bg),
        "ln1_g": jnp.ones((1, H), jnp.float32),
        "ln1_b": jnp.zeros((1, H), jnp.float32),
        "wih2": u(ks[4], (H, 3 * H), bg),
        "whh2": u(ks[5], (H, 3 * H), bg),
        "bih2": u(ks[6], (1, 3 * H), bg),
        "bhh2": u(ks[7], (1, 3 * H), bg),
        "ln2_g": jnp.ones((1, H), jnp.float32),
        "ln2_b": jnp.zeros((1, H), jnp.float32),
        "wfc1": u(ks[8], (H, 128), 1.0 / math.sqrt(H)),
        "bfc1": u(ks[9], (1, 128), 1.0 / math.sqrt(H)),
        "wfc2": u(ks[10], (128, 64), 1.0 / math.sqrt(128)),
        "bfc2": u(ks[11], (1, 64), 1.0 / math.sqrt(128)),
        "wfc3": u(ks[12], (64, output_size), 1.0 / math.sqrt(64)),
        "bfc3": u(ks[13], (1, output_size), 1.0 / math.sqrt(64)),
    }


def pack_params(p, hidden_size, gate_pad=GATE_PAD):
    """Pad each gate to a 128-lane block, fold biases, cast weights to bf16.

    All pad rows/cols are zero so the padded hidden lanes provably stay zero
    through both recurrences.  Biases stay f32 (added post-accumulation)."""
    H, G = hidden_size, gate_pad
    w_dt = jnp.bfloat16

    def pad_gate_cols(w):                       # (K, 3H) -> (K, 3G)
        K = w.shape[0]
        out = jnp.zeros((K, 3, G), jnp.float32)
        out = out.at[:, :, :H].set(w.reshape(K, 3, H))
        return out.reshape(K, 3 * G)

    def pad_rows(w, k_to):                      # zero-pad leading dim to k_to
        out = jnp.zeros((k_to,) + w.shape[1:], jnp.float32)
        return out.at[: w.shape[0]].set(w)

    def pad_cols(w, n_to):                      # zero-pad last dim to n_to
        out = jnp.zeros(w.shape[:-1] + (n_to,), jnp.float32)
        return out.at[..., : w.shape[-1]].set(w)

    def pad_vec(v):                             # (1, H) -> (1, G)
        return jnp.zeros((1, G), jnp.float32).at[:, :H].set(v)

    def gate_bias(bih, bhh):
        # r,z gates: b_ih + b_hh folded into the input-side projection;
        # n gate: only b_ih (b_hh_n must stay inside the r * (...) term).
        bih = bih.reshape(1, 3, H)
        bhh = bhh.reshape(1, 3, H)
        b = jnp.concatenate([bih[:, 0] + bhh[:, 0],
                             bih[:, 1] + bhh[:, 1],
                             bih[:, 2]], axis=-1)               # (1, 3H)
        return pad_gate_cols(b), pad_vec(bhh[:, 2])

    # ---- layer 1 ----
    wih1 = pad_gate_cols(p["wih1"]).astype(w_dt)                 # (I, 3G)
    whh1 = pad_rows(pad_gate_cols(p["whh1"]), G).astype(w_dt)    # (G, 3G)
    bgi1, bhn1 = gate_bias(p["bih1"], p["bhh1"])

    # ---- layer 2: split x-side / h-side weights (no fused concat weight) ----
    wx2 = pad_rows(pad_gate_cols(p["wih2"]), G).astype(w_dt)     # (G, 3G)
    wh2 = pad_rows(pad_gate_cols(p["whh2"]), G).astype(w_dt)     # (G, 3G)
    b2x, bhn2 = gate_bias(p["bih2"], p["bhh2"])

    # ---- layer norms (zero-padded so pad lanes of LN output are zero) ----
    ln1_g, ln1_b = pad_vec(p["ln1_g"]), pad_vec(p["ln1_b"])
    ln2_g, ln2_b = pad_vec(p["ln2_g"]), pad_vec(p["ln2_b"])

    # ---- MLP head, lane-dense to 128 output lanes everywhere ----
    wfc1 = pad_rows(p["wfc1"], G).astype(w_dt)                   # (G, 128)
    bfc1 = p["bfc1"]                                             # (1, 128)
    wfc2 = pad_cols(p["wfc2"], 128).astype(w_dt)                 # (128, 128)
    bfc2 = pad_cols(p["bfc2"], 128)                              # (1, 128)
    wfc3 = pad_cols(pad_rows(p["wfc3"], 128), 128).astype(w_dt)  # (128, 128)
    bfc3 = pad_cols(p["bfc3"], 128)                              # (1, 128)

    return (wih1, whh1, bgi1, bhn1, ln1_g, ln1_b,
            wx2, wh2, b2x, bhn2, ln2_g, ln2_b,
            wfc1, bfc1, wfc2, bfc2, wfc3, bfc3)


# -------------------------------- wrapper ------------------------------------

@partial(jax.jit, static_argnames=("hidden_size", "output_size"))
def basic_gru_forward(x, packed, hidden_size, output_size):
    """x: (B, T, input_size) float32 -> (B, output_size) float32."""
    B, T, I = x.shape
    G = packed[4].shape[-1]            # padded gate width (ln1_g)

    # Layout plumbing only (4 KiB at these sizes): time-major, flattened to
    # (T*B, I) so the hoisted input projection is one large-row MXU pass and
    # every per-step slice is a contiguous sublane range.
    # TODO(synk): absorb this into the kernel / a streamed-x DMA path if T*B*I
    #             grows enough for the extra HBM pass to matter.
    x_tb = jnp.transpose(x, (1, 0, 2)).reshape(T * B, I)

    flops = int(
        2 * T * B * I * 3 * G              # hoisted layer-1 input projection
        + 2 * T * B * G * 3 * G            # per-step layer-1 recurrent matmul
        + 2 * 2 * T * B * G * 3 * G        # per-step layer-2 x-side + h-side
        + 2 * B * (G * 128 + 128 * 128 + 128 * 128))   # MLP head (padded)
    transcendentals = int(6 * T * B * G + 4 * B)
    bytes_accessed = int(x.size * x.dtype.itemsize
                         + sum(int(a.size) * a.dtype.itemsize for a in packed)
                         + B * 128 * 4)

    vmem = pl.BlockSpec(memory_space=pltpu.MemorySpace.VMEM)
    kernel = partial(basic_gru_kernel, hidden_size)

    out_padded = pl.pallas_call(
        kernel,
        out_shape=jax.ShapeDtypeStruct((B, 128), jnp.float32),
        in_specs=[vmem] * (1 + len(packed)),
        out_specs=vmem,
        compiler_params=pltpu.CompilerParams(vmem_limit_bytes=8 * 1024 * 1024),
        cost_estimate=pl.CostEstimate(flops=flops,
                                      transcendentals=transcendentals,
                                      bytes_accessed=bytes_accessed),
    )(x_tb, *packed)
    return out_padded[:, :output_size]


# ---------------------------------- main --------------------------------------

if __name__ == "__main__":
    key = jax.random.PRNGKey(0)
    k_param, k_x = jax.random.split(key)

    batch = 8
    seq_len = 8
    input_size = 16
    hidden_size = 32
    output_size = 4

    params = init_params(k_param, input_size, hidden_size, output_size)
    packed = pack_params(params, hidden_size)
    x = jax.random.normal(k_x, (batch, seq_len, input_size), jnp.float32)

    out = basic_gru_forward(x, packed, hidden_size=hidden_size,
                            output_size=output_size)
    jax.block_until_ready(out)

    assert out.shape == (batch, output_size)
    assert bool(jnp.all(jnp.isfinite(out)))
    print("KERNEL_OK")
</pallas_src>

<mosaic_0001>
module attributes {stable_mosaic.version = 11 : i64} {
  func.func @basic_gru_kernel(%arg0: memref<64x16xf32, #tpu.memory_space<vmem>>, %arg1: memref<16x384xbf16, #tpu.memory_space<vmem>>, %arg2: memref<128x384xbf16, #tpu.memory_space<vmem>>, %arg3: memref<1x384xf32, #tpu.memory_space<vmem>>, %arg4: memref<1x128xf32, #tpu.memory_space<vmem>>, %arg5: memref<1x128xf32, #tpu.memory_space<vmem>>, %arg6: memref<1x128xf32, #tpu.memory_space<vmem>>, %arg7: memref<128x384xbf16, #tpu.memory_space<vmem>>, %arg8: memref<128x384xbf16, #tpu.memory_space<vmem>>, %arg9: memref<1x384xf32, #tpu.memory_space<vmem>>, %arg10: memref<1x128xf32, #tpu.memory_space<vmem>>, %arg11: memref<1x128xf32, #tpu.memory_space<vmem>>, %arg12: memref<1x128xf32, #tpu.memory_space<vmem>>, %arg13: memref<128x128xbf16, #tpu.memory_space<vmem>>, %arg14: memref<1x128xf32, #tpu.memory_space<vmem>>, %arg15: memref<128x128xbf16, #tpu.memory_space<vmem>>, %arg16: memref<1x128xf32, #tpu.memory_space<vmem>>, %arg17: memref<128x128xbf16, #tpu.memory_space<vmem>>, %arg18: memref<1x128xf32, #tpu.memory_space<vmem>>, %arg19: memref<8x128xf32, #tpu.memory_space<vmem>>) attributes {dimension_semantics = [], scalar_prefetch = 0 : i64, scratch_operands = 0 : i64, tpu.core_type = #tpu.core_type<tc>} {
    %c0 = arith.constant 0 : index
    %c0_0 = arith.constant 0 : index
    %0 = vector.load %arg0[%c0, %c0_0] : memref<64x16xf32, #tpu.memory_space<vmem>>, vector<64x16xf32>
    %1 = arith.truncf %0 : vector<64x16xf32> to vector<64x16xbf16>
    %c0_1 = arith.constant 0 : index
    %c0_2 = arith.constant 0 : index
    %2 = vector.load %arg1[%c0_1, %c0_2] : memref<16x384xbf16, #tpu.memory_space<vmem>>, vector<16x384xbf16>
    %cst = arith.constant dense<0.000000e+00> : vector<64x384xf32>
    %3 = tpu.matmul %1, %2, %cst {dimension_numbers = #tpu.dot_dimension_numbers<[1], [0], [0], [1], [0, 0, 1, 1], [], []>} : vector<64x16xbf16>, vector<16x384xbf16>, vector<64x384xf32> -> vector<64x384xf32>
    %c0_3 = arith.constant 0 : index
    %c0_4 = arith.constant 0 : index
    %4 = vector.load %arg3[%c0_3, %c0_4] : memref<1x384xf32, #tpu.memory_space<vmem>>, vector<1x384xf32>
    %5 = vector.broadcast %4 : vector<1x384xf32> to vector<64x384xf32>
    %6 = arith.addf %3, %5 : vector<64x384xf32>
    %c0_5 = arith.constant 0 : index
    %c0_6 = arith.constant 0 : index
    %7 = vector.load %arg2[%c0_5, %c0_6] : memref<128x384xbf16, #tpu.memory_space<vmem>>, vector<128x384xbf16>
    %c0_7 = arith.constant 0 : index
    %c0_8 = arith.constant 0 : index
    %8 = vector.load %arg7[%c0_7, %c0_8] : memref<128x384xbf16, #tpu.memory_space<vmem>>, vector<128x384xbf16>
    %c0_9 = arith.constant 0 : index
    %c0_10 = arith.constant 0 : index
    %9 = vector.load %arg8[%c0_9, %c0_10] : memref<128x384xbf16, #tpu.memory_space<vmem>>, vector<128x384xbf16>
    %c0_11 = arith.constant 0 : index
    %c0_12 = arith.constant 0 : index
    %10 = vector.load %arg4[%c0_11, %c0_12] : memref<1x128xf32, #tpu.memory_space<vmem>>, vector<1x128xf32>
    %11 = vector.shape_cast %10 : vector<1x128xf32> to vector<1x128xf32>
    %12 = vector.broadcast %11 : vector<1x128xf32> to vector<8x128xf32>
    %c0_13 = arith.constant 0 : index
    %c0_14 = arith.constant 0 : index
    %13 = vector.load %arg10[%c0_13, %c0_14] : memref<1x128xf32, #tpu.memory_space<vmem>>, vector<1x128xf32>
    %14 = vector.shape_cast %13 : vector<1x128xf32> to vector<1x128xf32>
    %15 = vector.broadcast %14 : vector<1x128xf32> to vector<8x128xf32>
    %c0_15 = arith.constant 0 : index
    %c0_16 = arith.constant 0 : index
    %16 = vector.load %arg9[%c0_15, %c0_16] : memref<1x384xf32, #tpu.memory_space<vmem>>, vector<1x384xf32>
    %17 = vector.shape_cast %16 : vector<1x384xf32> to vector<1x384xf32>
    %18 = vector.broadcast %17 : vector<1x384xf32> to vector<8x384xf32>
    %c0_17 = arith.constant 0 : index
    %c0_18 = arith.constant 0 : index
    %19 = vector.load %arg5[%c0_17, %c0_18] : memref<1x128xf32, #tpu.memory_space<vmem>>, vector<1x128xf32>
    %c0_19 = arith.constant 0 : index
    %c0_20 = arith.constant 0 : index
    %20 = vector.load %arg6[%c0_19, %c0_20] : memref<1x128xf32, #tpu.memory_space<vmem>>, vector<1x128xf32>
    %cst_21 = arith.constant 0.000000e+00 : f32
    %21 = vector.broadcast %cst_21 : f32 to vector<8x128xf32>
    %cst_22 = arith.constant 0.000000e+00 : f32
    %22 = vector.broadcast %cst_22 : f32 to vector<8x128xf32>
    %23 = vector.extract_strided_slice %6 {offsets = [0, 0], sizes = [8, 384], strides = [1, 1]} : vector<64x384xf32> to vector<8x384xf32>
    %24 = arith.truncf %22 : vector<8x128xf32> to vector<8x128xbf16>
    %cst_23 = arith.constant dense<0.000000e+00> : vector<8x384xf32>
    %25 = tpu.matmul %24, %9, %cst_23 {dimension_numbers = #tpu.dot_dimension_numbers<[1], [0], [0], [1], [0, 0, 1, 1], [], []>} : vector<8x128xbf16>, vector<128x384xbf16>, vector<8x384xf32> -> vector<8x384xf32>
    %26 = arith.truncf %21 : vector<8x128xf32> to vector<8x128xbf16>
    %cst_24 = arith.constant dense<0.000000e+00> : vector<8x384xf32>
    %27 = tpu.matmul %26, %7, %cst_24 {dimension_numbers = #tpu.dot_dimension_numbers<[1], [0], [0], [1], [0, 0, 1, 1], [], []>} : vector<8x128xbf16>, vector<128x384xbf16>, vector<8x384xf32> -> vector<8x384xf32>
    %28 = vector.extract_strided_slice %23 {offsets = [0, 0], sizes = [8, 128], strides = [1, 1]} : vector<8x384xf32> to vector<8x128xf32>
    %29 = vector.extract_strided_slice %27 {offsets = [0, 0], sizes = [8, 128], strides = [1, 1]} : vector<8x384xf32> to vector<8x128xf32>
    %30 = arith.addf %28, %29 : vector<8x128xf32>
    %31 = arith.negf %30 : vector<8x128xf32>
    %32 = math.exp %31 : vector<8x128xf32>
    %cst_25 = arith.constant 1.000000e+00 : f32
    %33 = vector.broadcast %cst_25 : f32 to vector<8x128xf32>
    %34 = arith.addf %33, %32 : vector<8x128xf32>
    %35 = arith.divf %33, %34 : vector<8x128xf32>
    %36 = vector.extract_strided_slice %23 {offsets = [0, 128], sizes = [8, 128], strides = [1, 1]} : vector<8x384xf32> to vector<8x128xf32>
    %37 = vector.extract_strided_slice %27 {offsets = [0, 128], sizes = [8, 128], strides = [1, 1]} : vector<8x384xf32> to vector<8x128xf32>
    %38 = arith.addf %36, %37 : vector<8x128xf32>
    %39 = arith.negf %38 : vector<8x128xf32>
    %40 = math.exp %39 : vector<8x128xf32>
    %cst_26 = arith.constant 1.000000e+00 : f32
    %41 = vector.broadcast %cst_26 : f32 to vector<8x128xf32>
    %42 = arith.addf %41, %40 : vector<8x128xf32>
    %43 = arith.divf %41, %42 : vector<8x128xf32>
    %44 = vector.extract_strided_slice %23 {offsets = [0, 256], sizes = [8, 128], strides = [1, 1]} : vector<8x384xf32> to vector<8x128xf32>
    %45 = vector.extract_strided_slice %27 {offsets = [0, 256], sizes = [8, 128], strides = [1, 1]} : vector<8x384xf32> to vector<8x128xf32>
    %46 = arith.addf %45, %12 : vector<8x128xf32>
    %47 = arith.mulf %35, %46 : vector<8x128xf32>
    %48 = arith.addf %44, %47 : vector<8x128xf32>
    %49 = math.tanh %48 : vector<8x128xf32>
    %cst_27 = arith.constant 1.000000e+00 : f32
    %50 = vector.broadcast %cst_27 : f32 to vector<8x128xf32>
    %51 = arith.subf %50, %43 : vector<8x128xf32>
    %52 = arith.mulf %51, %49 : vector<8x128xf32>
    %53 = arith.mulf %43, %21 : vector<8x128xf32>
    %54 = arith.addf %52, %53 : vector<8x128xf32>
    %cst_28 = arith.constant dense<0.000000e+00> : vector<8xf32>
    %55 = vector.multi_reduction <add>, %54, %cst_28 [1] : vector<8x128xf32> to vector<8xf32>
    %56 = vector.shape_cast %55 : vector<8xf32> to vector<8x1xf32>
    %57 = arith.mulf %54, %54 : vector<8x128xf32>
    %cst_29 = arith.constant dense<0.000000e+00> : vector<8xf32>
    %58 = vector.multi_reduction <add>, %57, %cst_29 [1] : vector<8x128xf32> to vector<8xf32>
    %59 = vector.shape_cast %58 : vector<8xf32> to vector<8x1xf32>
    %cst_30 = arith.constant 3.125000e-02 : f32
    %60 = vector.broadcast %cst_30 : f32 to vector<8x1xf32>
    %61 = arith.mulf %56, %60 : vector<8x1xf32>
    %cst_31 = arith.constant 3.125000e-02 : f32
    %62 = vector.broadcast %cst_31 : f32 to vector<8x1xf32>
    %63 = arith.mulf %59, %62 : vector<8x1xf32>
    %64 = arith.mulf %61, %61 : vector<8x1xf32>
    %65 = arith.subf %63, %64 : vector<8x1xf32>
    %66 = vector.broadcast %61 : vector<8x1xf32> to vector<8x128xf32>
    %67 = arith.subf %54, %66 : vector<8x128xf32>
    %cst_32 = arith.constant 9.99999974E-6 : f32
    %68 = vector.broadcast %cst_32 : f32 to vector<8x1xf32>
    %69 = arith.addf %65, %68 : vector<8x1xf32>
    %70 = math.rsqrt %69 : vector<8x1xf32>
    %71 = vector.broadcast %70 : vector<8x1xf32> to vector<8x128xf32>
    %72 = arith.mulf %67, %71 : vector<8x128xf32>
    %73 = vector.broadcast %19 : vector<1x128xf32> to vector<8x128xf32>
    %74 = arith.mulf %72, %73 : vector<8x128xf32>
    %75 = vector.broadcast %20 : vector<1x128xf32> to vector<8x128xf32>
    %76 = arith.addf %74, %75 : vector<8x128xf32>
    %77 = arith.truncf %76 : vector<8x128xf32> to vector<8x128xbf16>
    %cst_33 = arith.constant dense<0.000000e+00> : vector<8x384xf32>
    %78 = tpu.matmul %77, %8, %cst_33 {dimension_numbers = #tpu.dot_dimension_numbers<[1], [0], [0], [1], [0, 0, 1, 1], [], []>} : vector<8x128xbf16>, vector<128x384xbf16>, vector<8x384xf32> -> vector<8x384xf32>
    %79 = arith.addf %78, %18 : vector<8x384xf32>
    %80 = vector.extract_strided_slice %79 {offsets = [0, 0], sizes = [8, 128], strides = [1, 1]} : vector<8x384xf32> to vector<8x128xf32>
    %81 = vector.extract_strided_slice %25 {offsets = [0, 0], sizes = [8, 128], strides = [1, 1]} : vector<8x384xf32> to vector<8x128xf32>
    %82 = arith.addf %80, %81 : vector<8x128xf32>
    %83 = arith.negf %82 : vector<8x128xf32>
    %84 = math.exp %83 : vector<8x128xf32>
    %cst_34 = arith.constant 1.000000e+00 : f32
    %85 = vector.broadcast %cst_34 : f32 to vector<8x128xf32>
    %86 = arith.addf %85, %84 : vector<8x128xf32>
    %87 = arith.divf %85, %86 : vector<8x128xf32>
    %88 = vector.extract_strided_slice %79 {offsets = [0, 128], sizes = [8, 128], strides = [1, 1]} : vector<8x384xf32> to vector<8x128xf32>
    %89 = vector.extract_strided_slice %25 {offsets = [0, 128], sizes = [8, 128], strides = [1, 1]} : vector<8x384xf32> to vector<8x128xf32>
    %90 = arith.addf %88, %89 : vector<8x128xf32>
    %91 = arith.negf %90 : vector<8x128xf32>
    %92 = math.exp %91 : vector<8x128xf32>
    %cst_35 = arith.constant 1.000000e+00 : f32
    %93 = vector.broadcast %cst_35 : f32 to vector<8x128xf32>
    %94 = arith.addf %93, %92 : vector<8x128xf32>
    %95 = arith.divf %93, %94 : vector<8x128xf32>
    %96 = vector.extract_strided_slice %79 {offsets = [0, 256], sizes = [8, 128], strides = [1, 1]} : vector<8x384xf32> to vector<8x128xf32>
    %97 = vector.extract_strided_slice %25 {offsets = [0, 256], sizes = [8, 128], strides = [1, 1]} : vector<8x384xf32> to vector<8x128xf32>
    %98 = arith.addf %97, %15 : vector<8x128xf32>
    %99 = arith.mulf %87, %98 : vector<8x128xf32>
    %100 = arith.addf %96, %99 : vector<8x128xf32>
    %101 = math.tanh %100 : vector<8x128xf32>
    %cst_36 = arith.constant 1.000000e+00 : f32
    %102 = vector.broadcast %cst_36 : f32 to vector<8x128xf32>
    %103 = arith.subf %102, %95 : vector<8x128xf32>
    %104 = arith.mulf %103, %101 : vector<8x128xf32>
    %105 = arith.mulf %95, %22 : vector<8x128xf32>
    %106 = arith.addf %104, %105 : vector<8x128xf32>
    %107 = vector.extract_strided_slice %6 {offsets = [8, 0], sizes = [8, 384], strides = [1, 1]} : vector<64x384xf32> to vector<8x384xf32>
    %108 = arith.truncf %106 : vector<8x128xf32> to vector<8x128xbf16>
    %cst_37 = arith.constant dense<0.000000e+00> : vector<8x384xf32>
    %109 = tpu.matmul %108, %9, %cst_37 {dimension_numbers = #tpu.dot_dimension_numbers<[1], [0], [0], [1], [0, 0, 1, 1], [], []>} : vector<8x128xbf16>, vector<128x384xbf16>, vector<8x384xf32> -> vector<8x384xf32>
    %110 = arith.truncf %54 : vector<8x128xf32> to vector<8x128xbf16>
    %cst_38 = arith.constant dense<0.000000e+00> : vector<8x384xf32>
    %111 = tpu.matmul %110, %7, %cst_38 {dimension_numbers = #tpu.dot_dimension_numbers<[1], [0], [0], [1], [0, 0, 1, 1], [], []>} : vector<8x128xbf16>, vector<128x384xbf16>, vector<8x384xf32> -> vector<8x384xf32>
    %112 = vector.extract_strided_slice %107 {offsets = [0, 0], sizes = [8, 128], strides = [1, 1]} : vector<8x384xf32> to vector<8x128xf32>
    %113 = vector.extract_strided_slice %111 {offsets = [0, 0], sizes = [8, 128], strides = [1, 1]} : vector<8x384xf32> to vector<8x128xf32>
    %114 = arith.addf %112, %113 : vector<8x128xf32>
    %115 = arith.negf %114 : vector<8x128xf32>
    %116 = math.exp %115 : vector<8x128xf32>
    %cst_39 = arith.constant 1.000000e+00 : f32
    %117 = vector.broadcast %cst_39 : f32 to vector<8x128xf32>
    %118 = arith.addf %117, %116 : vector<8x128xf32>
    %119 = arith.divf %117, %118 : vector<8x128xf32>
    %120 = vector.extract_strided_slice %107 {offsets = [0, 128], sizes = [8, 128], strides = [1, 1]} : vector<8x384xf32> to vector<8x128xf32>
    %121 = vector.extract_strided_slice %111 {offsets = [0, 128], sizes = [8, 128], strides = [1, 1]} : vector<8x384xf32> to vector<8x128xf32>
    %122 = arith.addf %120, %121 : vector<8x128xf32>
    %123 = arith.negf %122 : vector<8x128xf32>
    %124 = math.exp %123 : vector<8x128xf32>
    %cst_40 = arith.constant 1.000000e+00 : f32
    %125 = vector.broadcast %cst_40 : f32 to vector<8x128xf32>
    %126 = arith.addf %125, %124 : vector<8x128xf32>
    %127 = arith.divf %125, %126 : vector<8x128xf32>
    %128 = vector.extract_strided_slice %107 {offsets = [0, 256], sizes = [8, 128], strides = [1, 1]} : vector<8x384xf32> to vector<8x128xf32>
    %129 = vector.extract_strided_slice %111 {offsets = [0, 256], sizes = [8, 128], strides = [1, 1]} : vector<8x384xf32> to vector<8x128xf32>
    %130 = arith.addf %129, %12 : vector<8x128xf32>
    %131 = arith.mulf %119, %130 : vector<8x128xf32>
    %132 = arith.addf %128, %131 : vector<8x128xf32>
    %133 = math.tanh %132 : vector<8x128xf32>
    %cst_41 = arith.constant 1.000000e+00 : f32
    %134 = vector.broadcast %cst_41 : f32 to vector<8x128xf32>
    %135 = arith.subf %134, %127 : vector<8x128xf32>
    %136 = arith.mulf %135, %133 : vector<8x128xf32>
    %137 = arith.mulf %127, %54 : vector<8x128xf32>
    %138 = arith.addf %136, %137 : vector<8x128xf32>
    %cst_42 = arith.constant dense<0.000000e+00> : vector<8xf32>
    %139 = vector.multi_reduction <add>, %138, %cst_42 [1] : vector<8x128xf32> to vector<8xf32>
    %140 = vector.shape_cast %139 : vector<8xf32> to vector<8x1xf32>
    %141 = arith.mulf %138, %138 : vector<8x128xf32>
    %cst_43 = arith.constant dense<0.000000e+00> : vector<8xf32>
    %142 = vector.multi_reduction <add>, %141, %cst_43 [1] : vector<8x128xf32> to vector<8xf32>
    %143 = vector.shape_cast %142 : vector<8xf32> to vector<8x1xf32>
    %cst_44 = arith.constant 3.125000e-02 : f32
    %144 = vector.broadcast %cst_44 : f32 to vector<8x1xf32>
    %145 = arith.mulf %140, %144 : vector<8x1xf32>
    %cst_45 = arith.constant 3.125000e-02 : f32
    %146 = vector.broadcast %cst_45 : f32 to vector<8x1xf32>
    %147 = arith.mulf %143, %146 : vector<8x1xf32>
    %148 = arith.mulf %145, %145 : vector<8x1xf32>
    %149 = arith.subf %147, %148 : vector<8x1xf32>
    %150 = vector.broadcast %145 : vector<8x1xf32> to vector<8x128xf32>
    %151 = arith.subf %138, %150 : vector<8x128xf32>
    %cst_46 = arith.constant 9.99999974E-6 : f32
    %152 = vector.broadcast %cst_46 : f32 to vector<8x1xf32>
    %153 = arith.addf %149, %152 : vector<8x1xf32>
    %154 = math.rsqrt %153 : vector<8x1xf32>
    %155 = vector.broadcast %154 : vector<8x1xf32> to vector<8x128xf32>
    %156 = arith.mulf %151, %155 : vector<8x128xf32>
    %157 = vector.broadcast %19 : vector<1x128xf32> to vector<8x128xf32>
    %158 = arith.mulf %156, %157 : vector<8x128xf32>
    %159 = vector.broadcast %20 : vector<1x128xf32> to vector<8x128xf32>
    %160 = arith.addf %158, %159 : vector<8x128xf32>
    %161 = arith.truncf %160 : vector<8x128xf32> to vector<8x128xbf16>
    %cst_47 = arith.constant dense<0.000000e+00> : vector<8x384xf32>
    %162 = tpu.matmul %161, %8, %cst_47 {dimension_numbers = #tpu.dot_dimension_numbers<[1], [0], [0], [1], [0, 0, 1, 1], [], []>} : vector<8x128xbf16>, vector<128x384xbf16>, vector<8x384xf32> -> vector<8x384xf32>
    %163 = arith.addf %162, %18 : vector<8x384xf32>
    %164 = vector.extract_strided_slice %163 {offsets = [0, 0], sizes = [8, 128], strides = [1, 1]} : vector<8x384xf32> to vector<8x128xf32>
    %165 = vector.extract_strided_slice %109 {offsets = [0, 0], sizes = [8, 128], strides = [1, 1]} : vector<8x384xf32> to vector<8x128xf32>
    %166 = arith.addf %164, %165 : vector<8x128xf32>
    %167 = arith.negf %166 : vector<8x128xf32>
    %168 = math.exp %167 : vector<8x128xf32>
    %cst_48 = arith.constant 1.000000e+00 : f32
    %169 = vector.broadcast %cst_48 : f32 to vector<8x128xf32>
    %170 = arith.addf %169, %168 : vector<8x128xf32>
    %171 = arith.divf %169, %170 : vector<8x128xf32>
    %172 = vector.extract_strided_slice %163 {offsets = [0, 128], sizes = [8, 128], strides = [1, 1]} : vector<8x384xf32> to vector<8x128xf32>
    %173 = vector.extract_strided_slice %109 {offsets = [0, 128], sizes = [8, 128], strides = [1, 1]} : vector<8x384xf32> to vector<8x128xf32>
    %174 = arith.addf %172, %173 : vector<8x128xf32>
    %175 = arith.negf %174 : vector<8x128xf32>
    %176 = math.exp %175 : vector<8x128xf32>
    %cst_49 = arith.constant 1.000000e+00 : f32
    %177 = vector.broadcast %cst_49 : f32 to vector<8x128xf32>
    %178 = arith.addf %177, %176 : vector<8x128xf32>
    %179 = arith.divf %177, %178 : vector<8x128xf32>
    %180 = vector.extract_strided_slice %163 {offsets = [0, 256], sizes = [8, 128], strides = [1, 1]} : vector<8x384xf32> to vector<8x128xf32>
    %181 = vector.extract_strided_slice %109 {offsets = [0, 256], sizes = [8, 128], strides = [1, 1]} : vector<8x384xf32> to vector<8x128xf32>
    %182 = arith.addf %181, %15 : vector<8x128xf32>
    %183 = arith.mulf %171, %182 : vector<8x128xf32>
    %184 = arith.addf %180, %183 : vector<8x128xf32>
    %185 = math.tanh %184 : vector<8x128xf32>
    %cst_50 = arith.constant 1.000000e+00 : f32
    %186 = vector.broadcast %cst_50 : f32 to vector<8x128xf32>
    %187 = arith.subf %186, %179 : vector<8x128xf32>
    %188 = arith.mulf %187, %185 : vector<8x128xf32>
    %189 = arith.mulf %179, %106 : vector<8x128xf32>
    %190 = arith.addf %188, %189 : vector<8x128xf32>
    %191 = vector.extract_strided_slice %6 {offsets = [16, 0], sizes = [8, 384], strides = [1, 1]} : vector<64x384xf32> to vector<8x384xf32>
    %192 = arith.truncf %190 : vector<8x128xf32> to vector<8x128xbf16>
    %cst_51 = arith.constant dense<0.000000e+00> : vector<8x384xf32>
    %193 = tpu.matmul %192, %9, %cst_51 {dimension_numbers = #tpu.dot_dimension_numbers<[1], [0], [0], [1], [0, 0, 1, 1], [], []>} : vector<8x128xbf16>, vector<128x384xbf16>, vector<8x384xf32> -> vector<8x384xf32>
    %194 = arith.truncf %138 : vector<8x128xf32> to vector<8x128xbf16>
    %cst_52 = arith.constant dense<0.000000e+00> : vector<8x384xf32>
    %195 = tpu.matmul %194, %7, %cst_52 {dimension_numbers = #tpu.dot_dimension_numbers<[1], [0], [0], [1], [0, 0, 1, 1], [], []>} : vector<8x128xbf16>, vector<128x384xbf16>, vector<8x384xf32> -> vector<8x384xf32>
    %196 = vector.extract_strided_slice %191 {offsets = [0, 0], sizes = [8, 128], strides = [1, 1]} : vector<8x384xf32> to vector<8x128xf32>
    %197 = vector.extract_strided_slice %195 {offsets = [0, 0], sizes = [8, 128], strides = [1, 1]} : vector<8x384xf32> to vector<8x128xf32>
    %198 = arith.addf %196, %197 : vector<8x128xf32>
    %199 = arith.negf %198 : vector<8x128xf32>
    %200 = math.exp %199 : vector<8x128xf32>
    %cst_53 = arith.constant 1.000000e+00 : f32
    %201 = vector.broadcast %cst_53 : f32 to vector<8x128xf32>
    %202 = arith.addf %201, %200 : vector<8x128xf32>
    %203 = arith.divf %201, %202 : vector<8x128xf32>
    %204 = vector.extract_strided_slice %191 {offsets = [0, 128], sizes = [8, 128], strides = [1, 1]} : vector<8x384xf32> to vector<8x128xf32>
    %205 = vector.extract_strided_slice %195 {offsets = [0, 128], sizes = [8, 128], strides = [1, 1]} : vector<8x384xf32> to vector<8x128xf32>
    %206 = arith.addf %204, %205 : vector<8x128xf32>
    %207 = arith.negf %206 : vector<8x128xf32>
    %208 = math.exp %207 : vector<8x128xf32>
    %cst_54 = arith.constant 1.000000e+00 : f32
    %209 = vector.broadcast %cst_54 : f32 to vector<8x128xf32>
    %210 = arith.addf %209, %208 : vector<8x128xf32>
    %211 = arith.divf %209, %210 : vector<8x128xf32>
    %212 = vector.extract_strided_slice %191 {offsets = [0, 256], sizes = [8, 128], strides = [1, 1]} : vector<8x384xf32> to vector<8x128xf32>
    %213 = vector.extract_strided_slice %195 {offsets = [0, 256], sizes = [8, 128], strides = [1, 1]} : vector<8x384xf32> to vector<8x128xf32>
    %214 = arith.addf %213, %12 : vector<8x128xf32>
    %215 = arith.mulf %203, %214 : vector<8x128xf32>
    %216 = arith.addf %212, %215 : vector<8x128xf32>
    %217 = math.tanh %216 : vector<8x128xf32>
    %cst_55 = arith.constant 1.000000e+00 : f32
    %218 = vector.broadcast %cst_55 : f32 to vector<8x128xf32>
    %219 = arith.subf %218, %211 : vector<8x128xf32>
    %220 = arith.mulf %219, %217 : vector<8x128xf32>
    %221 = arith.mulf %211, %138 : vector<8x128xf32>
    %222 = arith.addf %220, %221 : vector<8x128xf32>
    %cst_56 = arith.constant dense<0.000000e+00> : vector<8xf32>
    %223 = vector.multi_reduction <add>, %222, %cst_56 [1] : vector<8x128xf32> to vector<8xf32>
    %224 = vector.shape_cast %223 : vector<8xf32> to vector<8x1xf32>
    %225 = arith.mulf %222, %222 : vector<8x128xf32>
    %cst_57 = arith.constant dense<0.000000e+00> : vector<8xf32>
    %226 = vector.multi_reduction <add>, %225, %cst_57 [1] : vector<8x128xf32> to vector<8xf32>
    %227 = vector.shape_cast %226 : vector<8xf32> to vector<8x1xf32>
    %cst_58 = arith.constant 3.125000e-02 : f32
    %228 = vector.broadcast %cst_58 : f32 to vector<8x1xf32>
    %229 = arith.mulf %224, %228 : vector<8x1xf32>
    %cst_59 = arith.constant 3.125000e-02 : f32
    %230 = vector.broadcast %cst_59 : f32 to vector<8x1xf32>
    %231 = arith.mulf %227, %230 : vector<8x1xf32>
    %232 = arith.mulf %229, %229 : vector<8x1xf32>
    %233 = arith.subf %231, %232 : vector<8x1xf32>
    %234 = vector.broadcast %229 : vector<8x1xf32> to vector<8x128xf32>
    %235 = arith.subf %222, %234 : vector<8x128xf32>
    %cst_60 = arith.constant 9.99999974E-6 : f32
    %236 = vector.broadcast %cst_60 : f32 to vector<8x1xf32>
    %237 = arith.addf %233, %236 : vector<8x1xf32>
    %238 = math.rsqrt %237 : vector<8x1xf32>
    %239 = vector.broadcast %238 : vector<8x1xf32> to vector<8x128xf32>
    %240 = arith.mulf %235, %239 : vector<8x128xf32>
    %241 = vector.broadcast %19 : vector<1x128xf32> to vector<8x128xf32>
    %242 = arith.mulf %240, %241 : vector<8x128xf32>
    %243 = vector.broadcast %20 : vector<1x128xf32> to vector<8x128xf32>
    %244 = arith.addf %242, %243 : vector<8x128xf32>
    %245 = arith.truncf %244 : vector<8x128xf32> to vector<8x128xbf16>
    %cst_61 = arith.constant dense<0.000000e+00> : vector<8x384xf32>
    %246 = tpu.matmul %245, %8, %cst_61 {dimension_numbers = #tpu.dot_dimension_numbers<[1], [0], [0], [1], [0, 0, 1, 1], [], []>} : vector<8x128xbf16>, vector<128x384xbf16>, vector<8x384xf32> -> vector<8x384xf32>
    %247 = arith.addf %246, %18 : vector<8x384xf32>
    %248 = vector.extract_strided_slice %247 {offsets = [0, 0], sizes = [8, 128], strides = [1, 1]} : vector<8x384xf32> to vector<8x128xf32>
    %249 = vector.extract_strided_slice %193 {offsets = [0, 0], sizes = [8, 128], strides = [1, 1]} : vector<8x384xf32> to vector<8x128xf32>
    %250 = arith.addf %248, %249 : vector<8x128xf32>
    %251 = arith.negf %250 : vector<8x128xf32>
    %252 = math.exp %251 : vector<8x128xf32>
    %cst_62 = arith.constant 1.000000e+00 : f32
    %253 = vector.broadcast %cst_62 : f32 to vector<8x128xf32>
    %254 = arith.addf %253, %252 : vector<8x128xf32>
    %255 = arith.divf %253, %254 : vector<8x128xf32>
    %256 = vector.extract_strided_slice %247 {offsets = [0, 128], sizes = [8, 128], strides = [1, 1]} : vector<8x384xf32> to vector<8x128xf32>
    %257 = vector.extract_strided_slice %193 {offsets = [0, 128], sizes = [8, 128], strides = [1, 1]} : vector<8x384xf32> to vector<8x128xf32>
    %258 = arith.addf %256, %257 : vector<8x128xf32>
    %259 = arith.negf %258 : vector<8x128xf32>
    %260 = math.exp %259 : vector<8x128xf32>
    %cst_63 = arith.constant 1.000000e+00 : f32
    %261 = vector.broadcast %cst_63 : f32 to vector<8x128xf32>
    %262 = arith.addf %261, %260 : vector<8x128xf32>
    %263 = arith.divf %261, %262 : vector<8x128xf32>
    %264 = vector.extract_strided_slice %247 {offsets = [0, 256], sizes = [8, 128], strides = [1, 1]} : vector<8x384xf32> to vector<8x128xf32>
    %265 = vector.extract_strided_slice %193 {offsets = [0, 256], sizes = [8, 128], strides = [1, 1]} : vector<8x384xf32> to vector<8x128xf32>
    %266 = arith.addf %265, %15 : vector<8x128xf32>
    %267 = arith.mulf %255, %266 : vector<8x128xf32>
    %268 = arith.addf %264, %267 : vector<8x128xf32>
    %269 = math.tanh %268 : vector<8x128xf32>
    %cst_64 = arith.constant 1.000000e+00 : f32
    %270 = vector.broadcast %cst_64 : f32 to vector<8x128xf32>
    %271 = arith.subf %270, %263 : vector<8x128xf32>
    %272 = arith.mulf %271, %269 : vector<8x128xf32>
    %273 = arith.mulf %263, %190 : vector<8x128xf32>
    %274 = arith.addf %272, %273 : vector<8x128xf32>
    %275 = vector.extract_strided_slice %6 {offsets = [24, 0], sizes = [8, 384], strides = [1, 1]} : vector<64x384xf32> to vector<8x384xf32>
    %276 = arith.truncf %274 : vector<8x128xf32> to vector<8x128xbf16>
    %cst_65 = arith.constant dense<0.000000e+00> : vector<8x384xf32>
    %277 = tpu.matmul %276, %9, %cst_65 {dimension_numbers = #tpu.dot_dimension_numbers<[1], [0], [0], [1], [0, 0, 1, 1], [], []>} : vector<8x128xbf16>, vector<128x384xbf16>, vector<8x384xf32> -> vector<8x384xf32>
    %278 = arith.truncf %222 : vector<8x128xf32> to vector<8x128xbf16>
    %cst_66 = arith.constant dense<0.000000e+00> : vector<8x384xf32>
    %279 = tpu.matmul %278, %7, %cst_66 {dimension_numbers = #tpu.dot_dimension_numbers<[1], [0], [0], [1], [0, 0, 1, 1], [], []>} : vector<8x128xbf16>, vector<128x384xbf16>, vector<8x384xf32> -> vector<8x384xf32>
    %280 = vector.extract_strided_slice %275 {offsets = [0, 0], sizes = [8, 128], strides = [1, 1]} : vector<8x384xf32> to vector<8x128xf32>
    %281 = vector.extract_strided_slice %279 {offsets = [0, 0], sizes = [8, 128], strides = [1, 1]} : vector<8x384xf32> to vector<8x128xf32>
    %282 = arith.addf %280, %281 : vector<8x128xf32>
    %283 = arith.negf %282 : vector<8x128xf32>
    %284 = math.exp %283 : vector<8x128xf32>
    %cst_67 = arith.constant 1.000000e+00 : f32
    %285 = vector.broadcast %cst_67 : f32 to vector<8x128xf32>
    %286 = arith.addf %285, %284 : vector<8x128xf32>
    %287 = arith.divf %285, %286 : vector<8x128xf32>
    %288 = vector.extract_strided_slice %275 {offsets = [0, 128], sizes = [8, 128], strides = [1, 1]} : vector<8x384xf32> to vector<8x128xf32>
    %289 = vector.extract_strided_slice %279 {offsets = [0, 128], sizes = [8, 128], strides = [1, 1]} : vector<8x384xf32> to vector<8x128xf32>
    %290 = arith.addf %288, %289 : vector<8x128xf32>
    %291 = arith.negf %290 : vector<8x128xf32>
    %292 = math.exp %291 : vector<8x128xf32>
    %cst_68 = arith.constant 1.000000e+00 : f32
    %293 = vector.broadcast %cst_68 : f32 to vector<8x128xf32>
    %294 = arith.addf %293, %292 : vector<8x128xf32>
    %295 = arith.divf %293, %294 : vector<8x128xf32>
    %296 = vector.extract_strided_slice %275 {offsets = [0, 256], sizes = [8, 128], strides = [1, 1]} : vector<8x384xf32> to vector<8x128xf32>
    %297 = vector.extract_strided_slice %279 {offsets = [0, 256], sizes = [8, 128], strides = [1, 1]} : vector<8x384xf32> to vector<8x128xf32>
    %298 = arith.addf %297, %12 : vector<8x128xf32>
    %299 = arith.mulf %287, %298 : vector<8x128xf32>
    %300 = arith.addf %296, %299 : vector<8x128xf32>
    %301 = math.tanh %300 : vector<8x128xf32>
    %cst_69 = arith.constant 1.000000e+00 : f32
    %302 = vector.broadcast %cst_69 : f32 to vector<8x128xf32>
    %303 = arith.subf %302, %295 : vector<8x128xf32>
    %304 = arith.mulf %303, %301 : vector<8x128xf32>
    %305 = arith.mulf %295, %222 : vector<8x128xf32>
    %306 = arith.addf %304, %305 : vector<8x128xf32>
    %cst_70 = arith.constant dense<0.000000e+00> : vector<8xf32>
    %307 = vector.multi_reduction <add>, %306, %cst_70 [1] : vector<8x128xf32> to vector<8xf32>
    %308 = vector.shape_cast %307 : vector<8xf32> to vector<8x1xf32>
    %309 = arith.mulf %306, %306 : vector<8x128xf32>
    %cst_71 = arith.constant dense<0.000000e+00> : vector<8xf32>
    %310 = vector.multi_reduction <add>, %309, %cst_71 [1] : vector<8x128xf32> to vector<8xf32>
    %311 = vector.shape_cast %310 : vector<8xf32> to vector<8x1xf32>
    %cst_72 = arith.constant 3.125000e-02 : f32
    %312 = vector.broadcast %cst_72 : f32 to vector<8x1xf32>
    %313 = arith.mulf %308, %312 : vector<8x1xf32>
    %cst_73 = arith.constant 3.125000e-02 : f32
    %314 = vector.broadcast %cst_73 : f32 to vector<8x1xf32>
    %315 = arith.mulf %311, %314 : vector<8x1xf32>
    %316 = arith.mulf %313, %313 : vector<8x1xf32>
    %317 = arith.subf %315, %316 : vector<8x1xf32>
    %318 = vector.broadcast %313 : vector<8x1xf32> to vector<8x128xf32>
    %319 = arith.subf %306, %318 : vector<8x128xf32>
    %cst_74 = arith.constant 9.99999974E-6 : f32
    %320 = vector.broadcast %cst_74 : f32 to vector<8x1xf32>
    %321 = arith.addf %317, %320 : vector<8x1xf32>
    %322 = math.rsqrt %321 : vector<8x1xf32>
    %323 = vector.broadcast %322 : vector<8x1xf32> to vector<8x128xf32>
    %324 = arith.mulf %319, %323 : vector<8x128xf32>
    %325 = vector.broadcast %19 : vector<1x128xf32> to vector<8x128xf32>
    %326 = arith.mulf %324, %325 : vector<8x128xf32>
    %327 = vector.broadcast %20 : vector<1x128xf32> to vector<8x128xf32>
    %328 = arith.addf %326, %327 : vector<8x128xf32>
    %329 = arith.truncf %328 : vector<8x128xf32> to vector<8x128xbf16>
    %cst_75 = arith.constant dense<0.000000e+00> : vector<8x384xf32>
    %330 = tpu.matmul %329, %8, %cst_75 {dimension_numbers = #tpu.dot_dimension_numbers<[1], [0], [0], [1], [0, 0, 1, 1], [], []>} : vector<8x128xbf16>, vector<128x384xbf16>, vector<8x384xf32> -> vector<8x384xf32>
    %331 = arith.addf %330, %18 : vector<8x384xf32>
    %332 = vector.extract_strided_slice %331 {offsets = [0, 0], sizes = [8, 128], strides = [1, 1]} : vector<8x384xf32> to vector<8x128xf32>
    %333 = vector.extract_strided_slice %277 {offsets = [0, 0], sizes = [8, 128], strides = [1, 1]} : vector<8x384xf32> to vector<8x128xf32>
    %334 = arith.addf %332, %333 : vector<8x128xf32>
    %335 = arith.negf %334 : vector<8x128xf32>
    %336 = math.exp %335 : vector<8x128xf32>
    %cst_76 = arith.constant 1.000000e+00 : f32
    %337 = vector.broadcast %cst_76 : f32 to vector<8x128xf32>
    %338 = arith.addf %337, %336 : vector<8x128xf32>
    %339 = arith.divf %337, %338 : vector<8x128xf32>
    %340 = vector.extract_strided_slice %331 {offsets = [0, 128], sizes = [8, 128], strides = [1, 1]} : vector<8x384xf32> to vector<8x128xf32>
    %341 = vector.extract_strided_slice %277 {offsets = [0, 128], sizes = [8, 128], strides = [1, 1]} : vector<8x384xf32> to vector<8x128xf32>
    %342 = arith.addf %340, %341 : vector<8x128xf32>
    %343 = arith.negf %342 : vector<8x128xf32>
    %344 = math.exp %343 : vector<8x128xf32>
    %cst_77 = arith.constant 1.000000e+00 : f32
    %345 = vector.broadcast %cst_77 : f32 to vector<8x128xf32>
    %346 = arith.addf %345, %344 : vector<8x128xf32>
    %347 = arith.divf %345, %346 : vector<8x128xf32>
    %348 = vector.extract_strided_slice %331 {offsets = [0, 256], sizes = [8, 128], strides = [1, 1]} : vector<8x384xf32> to vector<8x128xf32>
    %349 = vector.extract_strided_slice %277 {offsets = [0, 256], sizes = [8, 128], strides = [1, 1]} : vector<8x384xf32> to vector<8x128xf32>
    %350 = arith.addf %349, %15 : vector<8x128xf32>
    %351 = arith.mulf %339, %350 : vector<8x128xf32>
    %352 = arith.addf %348, %351 : vector<8x128xf32>
    %353 = math.tanh %352 : vector<8x128xf32>
    %cst_78 = arith.constant 1.000000e+00 : f32
    %354 = vector.broadcast %cst_78 : f32 to vector<8x128xf32>
    %355 = arith.subf %354, %347 : vector<8x128xf32>
    %356 = arith.mulf %355, %353 : vector<8x128xf32>
    %357 = arith.mulf %347, %274 : vector<8x128xf32>
    %358 = arith.addf %356, %357 : vector<8x128xf32>
    %359 = vector.extract_strided_slice %6 {offsets = [32, 0], sizes = [8, 384], strides = [1, 1]} : vector<64x384xf32> to vector<8x384xf32>
    %360 = arith.truncf %358 : vector<8x128xf32> to vector<8x128xbf16>
    %cst_79 = arith.constant dense<0.000000e+00> : vector<8x384xf32>
    %361 = tpu.matmul %360, %9, %cst_79 {dimension_numbers = #tpu.dot_dimension_numbers<[1], [0], [0], [1], [0, 0, 1, 1], [], []>} : vector<8x128xbf16>, vector<128x384xbf16>, vector<8x384xf32> -> vector<8x384xf32>
    %362 = arith.truncf %306 : vector<8x128xf32> to vector<8x128xbf16>
    %cst_80 = arith.constant dense<0.000000e+00> : vector<8x384xf32>
    %363 = tpu.matmul %362, %7, %cst_80 {dimension_numbers = #tpu.dot_dimension_numbers<[1], [0], [0], [1], [0, 0, 1, 1], [], []>} : vector<8x128xbf16>, vector<128x384xbf16>, vector<8x384xf32> -> vector<8x384xf32>
    %364 = vector.extract_strided_slice %359 {offsets = [0, 0], sizes = [8, 128], strides = [1, 1]} : vector<8x384xf32> to vector<8x128xf32>
    %365 = vector.extract_strided_slice %363 {offsets = [0, 0], sizes = [8, 128], strides = [1, 1]} : vector<8x384xf32> to vector<8x128xf32>
    %366 = arith.addf %364, %365 : vector<8x128xf32>
    %367 = arith.negf %366 : vector<8x128xf32>
    %368 = math.exp %367 : vector<8x128xf32>
    %cst_81 = arith.constant 1.000000e+00 : f32
    %369 = vector.broadcast %cst_81 : f32 to vector<8x128xf32>
    %370 = arith.addf %369, %368 : vector<8x128xf32>
    %371 = arith.divf %369, %370 : vector<8x128xf32>
    %372 = vector.extract_strided_slice %359 {offsets = [0, 128], sizes = [8, 128], strides = [1, 1]} : vector<8x384xf32> to vector<8x128xf32>
    %373 = vector.extract_strided_slice %363 {offsets = [0, 128], sizes = [8, 128], strides = [1, 1]} : vector<8x384xf32> to vector<8x128xf32>
    %374 = arith.addf %372, %373 : vector<8x128xf32>
    %375 = arith.negf %374 : vector<8x128xf32>
    %376 = math.exp %375 : vector<8x128xf32>
    %cst_82 = arith.constant 1.000000e+00 : f32
    %377 = vector.broadcast %cst_82 : f32 to vector<8x128xf32>
    %378 = arith.addf %377, %376 : vector<8x128xf32>
    %379 = arith.divf %377, %378 : vector<8x128xf32>
    %380 = vector.extract_strided_slice %359 {offsets = [0, 256], sizes = [8, 128], strides = [1, 1]} : vector<8x384xf32> to vector<8x128xf32>
    %381 = vector.extract_strided_slice %363 {offsets = [0, 256], sizes = [8, 128], strides = [1, 1]} : vector<8x384xf32> to vector<8x128xf32>
    %382 = arith.addf %381, %12 : vector<8x128xf32>
    %383 = arith.mulf %371, %382 : vector<8x128xf32>
    %384 = arith.addf %380, %383 : vector<8x128xf32>
    %385 = math.tanh %384 : vector<8x128xf32>
    %cst_83 = arith.constant 1.000000e+00 : f32
    %386 = vector.broadcast %cst_83 : f32 to vector<8x128xf32>
    %387 = arith.subf %386, %379 : vector<8x128xf32>
    %388 = arith.mulf %387, %385 : vector<8x128xf32>
    %389 = arith.mulf %379, %306 : vector<8x128xf32>
    %390 = arith.addf %388, %389 : vector<8x128xf32>
    %cst_84 = arith.constant dense<0.000000e+00> : vector<8xf32>
    %391 = vector.multi_reduction <add>, %390, %cst_84 [1] : vector<8x128xf32> to vector<8xf32>
    %392 = vector.shape_cast %391 : vector<8xf32> to vector<8x1xf32>
    %393 = arith.mulf %390, %390 : vector<8x128xf32>
    %cst_85 = arith.constant dense<0.000000e+00> : vector<8xf32>
    %394 = vector.multi_reduction <add>, %393, %cst_85 [1] : vector<8x128xf32> to vector<8xf32>
    %395 = vector.shape_cast %394 : vector<8xf32> to vector<8x1xf32>
    %cst_86 = arith.constant 3.125000e-02 : f32
    %396 = vector.broadcast %cst_86 : f32 to vector<8x1xf32>
    %397 = arith.mulf %392, %396 : vector<8x1xf32>
    %cst_87 = arith.constant 3.125000e-02 : f32
    %398 = vector.broadcast %cst_87 : f32 to vector<8x1xf32>
    %399 = arith.mulf %395, %398 : vector<8x1xf32>
    %400 = arith.mulf %397, %397 : vector<8x1xf32>
    %401 = arith.subf %399, %400 : vector<8x1xf32>
    %402 = vector.broadcast %397 : vector<8x1xf32> to vector<8x128xf32>
    %403 = arith.subf %390, %402 : vector<8x128xf32>
    %cst_88 = arith.constant 9.99999974E-6 : f32
    %404 = vector.broadcast %cst_88 : f32 to vector<8x1xf32>
    %405 = arith.addf %401, %404 : vector<8x1xf32>
    %406 = math.rsqrt %405 : vector<8x1xf32>
    %407 = vector.broadcast %406 : vector<8x1xf32> to vector<8x128xf32>
    %408 = arith.mulf %403, %407 : vector<8x128xf32>
    %409 = vector.broadcast %19 : vector<1x128xf32> to vector<8x128xf32>
    %410 = arith.mulf %408, %409 : vector<8x128xf32>
    %411 = vector.broadcast %20 : vector<1x128xf32> to vector<8x128xf32>
    %412 = arith.addf %410, %411 : vector<8x128xf32>
    %413 = arith.truncf %412 : vector<8x128xf32> to vector<8x128xbf16>
    %cst_89 = arith.constant dense<0.000000e+00> : vector<8x384xf32>
    %414 = tpu.matmul %413, %8, %cst_89 {dimension_numbers = #tpu.dot_dimension_numbers<[1], [0], [0], [1], [0, 0, 1, 1], [], []>} : vector<8x128xbf16>, vector<128x384xbf16>, vector<8x384xf32> -> vector<8x384xf32>
    %415 = arith.addf %414, %18 : vector<8x384xf32>
    %416 = vector.extract_strided_slice %415 {offsets = [0, 0], sizes = [8, 128], strides = [1, 1]} : vector<8x384xf32> to vector<8x128xf32>
    %417 = vector.extract_strided_slice %361 {offsets = [0, 0], sizes = [8, 128], strides = [1, 1]} : vector<8x384xf32> to vector<8x128xf32>
    %418 = arith.addf %416, %417 : vector<8x128xf32>
    %419 = arith.negf %418 : vector<8x128xf32>
    %420 = math.exp %419 : vector<8x128xf32>
    %cst_90 = arith.constant 1.000000e+00 : f32
    %421 = vector.broadcast %cst_90 : f32 to vector<8x128xf32>
    %422 = arith.addf %421, %420 : vector<8x128xf32>
    %423 = arith.divf %421, %422 : vector<8x128xf32>
    %424 = vector.extract_strided_slice %415 {offsets = [0, 128], sizes = [8, 128], strides = [1, 1]} : vector<8x384xf32> to vector<8x128xf32>
    %425 = vector.extract_strided_slice %361 {offsets = [0, 128], sizes = [8, 128], strides = [1, 1]} : vector<8x384xf32> to vector<8x128xf32>
    %426 = arith.addf %424, %425 : vector<8x128xf32>
    %427 = arith.negf %426 : vector<8x128xf32>
    %428 = math.exp %427 : vector<8x128xf32>
    %cst_91 = arith.constant 1.000000e+00 : f32
    %429 = vector.broadcast %cst_91 : f32 to vector<8x128xf32>
    %430 = arith.addf %429, %428 : vector<8x128xf32>
    %431 = arith.divf %429, %430 : vector<8x128xf32>
    %432 = vector.extract_strided_slice %415 {offsets = [0, 256], sizes = [8, 128], strides = [1, 1]} : vector<8x384xf32> to vector<8x128xf32>
    %433 = vector.extract_strided_slice %361 {offsets = [0, 256], sizes = [8, 128], strides = [1, 1]} : vector<8x384xf32> to vector<8x128xf32>
    %434 = arith.addf %433, %15 : vector<8x128xf32>
    %435 = arith.mulf %423, %434 : vector<8x128xf32>
    %436 = arith.addf %432, %435 : vector<8x128xf32>
    %437 = math.tanh %436 : vector<8x128xf32>
    %cst_92 = arith.constant 1.000000e+00 : f32
    %438 = vector.broadcast %cst_92 : f32 to vector<8x128xf32>
    %439 = arith.subf %438, %431 : vector<8x128xf32>
    %440 = arith.mulf %439, %437 : vector<8x128xf32>
    %441 = arith.mulf %431, %358 : vector<8x128xf32>
    %442 = arith.addf %440, %441 : vector<8x128xf32>
    %443 = vector.extract_strided_slice %6 {offsets = [40, 0], sizes = [8, 384], strides = [1, 1]} : vector<64x384xf32> to vector<8x384xf32>
    %444 = arith.truncf %442 : vector<8x128xf32> to vector<8x128xbf16>
    %cst_93 = arith.constant dense<0.000000e+00> : vector<8x384xf32>
    %445 = tpu.matmul %444, %9, %cst_93 {dimension_numbers = #tpu.dot_dimension_numbers<[1], [0], [0], [1], [0, 0, 1, 1], [], []>} : vector<8x128xbf16>, vector<128x384xbf16>, vector<8x384xf32> -> vector<8x384xf32>
    %446 = arith.truncf %390 : vector<8x128xf32> to vector<8x128xbf16>
    %cst_94 = arith.constant dense<0.000000e+00> : vector<8x384xf32>
    %447 = tpu.matmul %446, %7, %cst_94 {dimension_numbers = #tpu.dot_dimension_numbers<[1], [0], [0], [1], [0, 0, 1, 1], [], []>} : vector<8x128xbf16>, vector<128x384xbf16>, vector<8x384xf32> -> vector<8x384xf32>
    %448 = vector.extract_strided_slice %443 {offsets = [0, 0], sizes = [8, 128], strides = [1, 1]} : vector<8x384xf32> to vector<8x128xf32>
    %449 = vector.extract_strided_slice %447 {offsets = [0, 0], sizes = [8, 128], strides = [1, 1]} : vector<8x384xf32> to vector<8x128xf32>
    %450 = arith.addf %448, %449 : vector<8x128xf32>
    %451 = arith.negf %450 : vector<8x128xf32>
    %452 = math.exp %451 : vector<8x128xf32>
    %cst_95 = arith.constant 1.000000e+00 : f32
    %453 = vector.broadcast %cst_95 : f32 to vector<8x128xf32>
    %454 = arith.addf %453, %452 : vector<8x128xf32>
    %455 = arith.divf %453, %454 : vector<8x128xf32>
    %456 = vector.extract_strided_slice %443 {offsets = [0, 128], sizes = [8, 128], strides = [1, 1]} : vector<8x384xf32> to vector<8x128xf32>
    %457 = vector.extract_strided_slice %447 {offsets = [0, 128], sizes = [8, 128], strides = [1, 1]} : vector<8x384xf32> to vector<8x128xf32>
    %458 = arith.addf %456, %457 : vector<8x128xf32>
    %459 = arith.negf %458 : vector<8x128xf32>
    %460 = math.exp %459 : vector<8x128xf32>
    %cst_96 = arith.constant 1.000000e+00 : f32
    %461 = vector.broadcast %cst_96 : f32 to vector<8x128xf32>
    %462 = arith.addf %461, %460 : vector<8x128xf32>
    %463 = arith.divf %461, %462 : vector<8x128xf32>
    %464 = vector.extract_strided_slice %443 {offsets = [0, 256], sizes = [8, 128], strides = [1, 1]} : vector<8x384xf32> to vector<8x128xf32>
    %465 = vector.extract_strided_slice %447 {offsets = [0, 256], sizes = [8, 128], strides = [1, 1]} : vector<8x384xf32> to vector<8x128xf32>
    %466 = arith.addf %465, %12 : vector<8x128xf32>
    %467 = arith.mulf %455, %466 : vector<8x128xf32>
    %468 = arith.addf %464, %467 : vector<8x128xf32>
    %469 = math.tanh %468 : vector<8x128xf32>
    %cst_97 = arith.constant 1.000000e+00 : f32
    %470 = vector.broadcast %cst_97 : f32 to vector<8x128xf32>
    %471 = arith.subf %470, %463 : vector<8x128xf32>
    %472 = arith.mulf %471, %469 : vector<8x128xf32>
    %473 = arith.mulf %463, %390 : vector<8x128xf32>
    %474 = arith.addf %472, %473 : vector<8x128xf32>
    %cst_98 = arith.constant dense<0.000000e+00> : vector<8xf32>
    %475 = vector.multi_reduction <add>, %474, %cst_98 [1] : vector<8x128xf32> to vector<8xf32>
    %476 = vector.shape_cast %475 : vector<8xf32> to vector<8x1xf32>
    %477 = arith.mulf %474, %474 : vector<8x128xf32>
    %cst_99 = arith.constant dense<0.000000e+00> : vector<8xf32>
    %478 = vector.multi_reduction <add>, %477, %cst_99 [1] : vector<8x128xf32> to vector<8xf32>
    %479 = vector.shape_cast %478 : vector<8xf32> to vector<8x1xf32>
    %cst_100 = arith.constant 3.125000e-02 : f32
    %480 = vector.broadcast %cst_100 : f32 to vector<8x1xf32>
    %481 = arith.mulf %476, %480 : vector<8x1xf32>
    %cst_101 = arith.constant 3.125000e-02 : f32
    %482 = vector.broadcast %cst_101 : f32 to vector<8x1xf32>
    %483 = arith.mulf %479, %482 : vector<8x1xf32>
    %484 = arith.mulf %481, %481 : vector<8x1xf32>
    %485 = arith.subf %483, %484 : vector<8x1xf32>
    %486 = vector.broadcast %481 : vector<8x1xf32> to vector<8x128xf32>
    %487 = arith.subf %474, %486 : vector<8x128xf32>
    %cst_102 = arith.constant 9.99999974E-6 : f32
    %488 = vector.broadcast %cst_102 : f32 to vector<8x1xf32>
    %489 = arith.addf %485, %488 : vector<8x1xf32>
    %490 = math.rsqrt %489 : vector<8x1xf32>
    %491 = vector.broadcast %490 : vector<8x1xf32> to vector<8x128xf32>
    %492 = arith.mulf %487, %491 : vector<8x128xf32>
    %493 = vector.broadcast %19 : vector<1x128xf32> to vector<8x128xf32>
    %494 = arith.mulf %492, %493 : vector<8x128xf32>
    %495 = vector.broadcast %20 : vector<1x128xf32> to vector<8x128xf32>
    %496 = arith.addf %494, %495 : vector<8x128xf32>
    %497 = arith.truncf %496 : vector<8x128xf32> to vector<8x128xbf16>
    %cst_103 = arith.constant dense<0.000000e+00> : vector<8x384xf32>
    %498 = tpu.matmul %497, %8, %cst_103 {dimension_numbers = #tpu.dot_dimension_numbers<[1], [0], [0], [1], [0, 0, 1, 1], [], []>} : vector<8x128xbf16>, vector<128x384xbf16>, vector<8x384xf32> -> vector<8x384xf32>
    %499 = arith.addf %498, %18 : vector<8x384xf32>
    %500 = vector.extract_strided_slice %499 {offsets = [0, 0], sizes = [8, 128], strides = [1, 1]} : vector<8x384xf32> to vector<8x128xf32>
    %501 = vector.extract_strided_slice %445 {offsets = [0, 0], sizes = [8, 128], strides = [1, 1]} : vector<8x384xf32> to vector<8x128xf32>
    %502 = arith.addf %500, %501 : vector<8x128xf32>
    %503 = arith.negf %502 : vector<8x128xf32>
    %504 = math.exp %503 : vector<8x128xf32>
    %cst_104 = arith.constant 1.000000e+00 : f32
    %505 = vector.broadcast %cst_104 : f32 to vector<8x128xf32>
    %506 = arith.addf %505, %504 : vector<8x128xf32>
    %507 = arith.divf %505, %506 : vector<8x128xf32>
    %508 = vector.extract_strided_slice %499 {offsets = [0, 128], sizes = [8, 128], strides = [1, 1]} : vector<8x384xf32> to vector<8x128xf32>
    %509 = vector.extract_strided_slice %445 {offsets = [0, 128], sizes = [8, 128], strides = [1, 1]} : vector<8x384xf32> to vector<8x128xf32>
    %510 = arith.addf %508, %509 : vector<8x128xf32>
    %511 = arith.negf %510 : vector<8x128xf32>
    %512 = math.exp %511 : vector<8x128xf32>
    %cst_105 = arith.constant 1.000000e+00 : f32
    %513 = vector.broadcast %cst_105 : f32 to vector<8x128xf32>
    %514 = arith.addf %513, %512 : vector<8x128xf32>
    %515 = arith.divf %513, %514 : vector<8x128xf32>
    %516 = vector.extract_strided_slice %499 {offsets = [0, 256], sizes = [8, 128], strides = [1, 1]} : vector<8x384xf32> to vector<8x128xf32>
    %517 = vector.extract_strided_slice %445 {offsets = [0, 256], sizes = [8, 128], strides = [1, 1]} : vector<8x384xf32> to vector<8x128xf32>
    %518 = arith.addf %517, %15 : vector<8x128xf32>
    %519 = arith.mulf %507, %518 : vector<8x128xf32>
    %520 = arith.addf %516, %519 : vector<8x128xf32>
    %521 = math.tanh %520 : vector<8x128xf32>
    %cst_106 = arith.constant 1.000000e+00 : f32
    %522 = vector.broadcast %cst_106 : f32 to vector<8x128xf32>
    %523 = arith.subf %522, %515 : vector<8x128xf32>
    %524 = arith.mulf %523, %521 : vector<8x128xf32>
    %525 = arith.mulf %515, %442 : vector<8x128xf32>
    %526 = arith.addf %524, %525 : vector<8x128xf32>
    %527 = vector.extract_strided_slice %6 {offsets = [48, 0], sizes = [8, 384], strides = [1, 1]} : vector<64x384xf32> to vector<8x384xf32>
    %528 = arith.truncf %526 : vector<8x128xf32> to vector<8x128xbf16>
    %cst_107 = arith.constant dense<0.000000e+00> : vector<8x384xf32>
    %529 = tpu.matmul %528, %9, %cst_107 {dimension_numbers = #tpu.dot_dimension_numbers<[1], [0], [0], [1], [0, 0, 1, 1], [], []>} : vector<8x128xbf16>, vector<128x384xbf16>, vector<8x384xf32> -> vector<8x384xf32>
    %530 = arith.truncf %474 : vector<8x128xf32> to vector<8x128xbf16>
    %cst_108 = arith.constant dense<0.000000e+00> : vector<8x384xf32>
    %531 = tpu.matmul %530, %7, %cst_108 {dimension_numbers = #tpu.dot_dimension_numbers<[1], [0], [0], [1], [0, 0, 1, 1], [], []>} : vector<8x128xbf16>, vector<128x384xbf16>, vector<8x384xf32> -> vector<8x384xf32>
    %532 = vector.extract_strided_slice %527 {offsets = [0, 0], sizes = [8, 128], strides = [1, 1]} : vector<8x384xf32> to vector<8x128xf32>
    %533 = vector.extract_strided_slice %531 {offsets = [0, 0], sizes = [8, 128], strides = [1, 1]} : vector<8x384xf32> to vector<8x128xf32>
    %534 = arith.addf %532, %533 : vector<8x128xf32>
    %535 = arith.negf %534 : vector<8x128xf32>
    %536 = math.exp %535 : vector<8x128xf32>
    %cst_109 = arith.constant 1.000000e+00 : f32
    %537 = vector.broadcast %cst_109 : f32 to vector<8x128xf32>
    %538 = arith.addf %537, %536 : vector<8x128xf32>
    %539 = arith.divf %537, %538 : vector<8x128xf32>
    %540 = vector.extract_strided_slice %527 {offsets = [0, 128], sizes = [8, 128], strides = [1, 1]} : vector<8x384xf32> to vector<8x128xf32>
    %541 = vector.extract_strided_slice %531 {offsets = [0, 128], sizes = [8, 128], strides = [1, 1]} : vector<8x384xf32> to vector<8x128xf32>
    %542 = arith.addf %540, %541 : vector<8x128xf32>
    %543 = arith.negf %542 : vector<8x128xf32>
    %544 = math.exp %543 : vector<8x128xf32>
    %cst_110 = arith.constant 1.000000e+00 : f32
    %545 = vector.broadcast %cst_110 : f32 to vector<8x128xf32>
    %546 = arith.addf %545, %544 : vector<8x128xf32>
    %547 = arith.divf %545, %546 : vector<8x128xf32>
    %548 = vector.extract_strided_slice %527 {offsets = [0, 256], sizes = [8, 128], strides = [1, 1]} : vector<8x384xf32> to vector<8x128xf32>
    %549 = vector.extract_strided_slice %531 {offsets = [0, 256], sizes = [8, 128], strides = [1, 1]} : vector<8x384xf32> to vector<8x128xf32>
    %550 = arith.addf %549, %12 : vector<8x128xf32>
    %551 = arith.mulf %539, %550 : vector<8x128xf32>
    %552 = arith.addf %548, %551 : vector<8x128xf32>
    %553 = math.tanh %552 : vector<8x128xf32>
    %cst_111 = arith.constant 1.000000e+00 : f32
    %554 = vector.broadcast %cst_111 : f32 to vector<8x128xf32>
    %555 = arith.subf %554, %547 : vector<8x128xf32>
    %556 = arith.mulf %555, %553 : vector<8x128xf32>
    %557 = arith.mulf %547, %474 : vector<8x128xf32>
    %558 = arith.addf %556, %557 : vector<8x128xf32>
    %cst_112 = arith.constant dense<0.000000e+00> : vector<8xf32>
    %559 = vector.multi_reduction <add>, %558, %cst_112 [1] : vector<8x128xf32> to vector<8xf32>
    %560 = vector.shape_cast %559 : vector<8xf32> to vector<8x1xf32>
    %561 = arith.mulf %558, %558 : vector<8x128xf32>
    %cst_113 = arith.constant dense<0.000000e+00> : vector<8xf32>
    %562 = vector.multi_reduction <add>, %561, %cst_113 [1] : vector<8x128xf32> to vector<8xf32>
    %563 = vector.shape_cast %562 : vector<8xf32> to vector<8x1xf32>
    %cst_114 = arith.constant 3.125000e-02 : f32
    %564 = vector.broadcast %cst_114 : f32 to vector<8x1xf32>
    %565 = arith.mulf %560, %564 : vector<8x1xf32>
    %cst_115 = arith.constant 3.125000e-02 : f32
    %566 = vector.broadcast %cst_115 : f32 to vector<8x1xf32>
    %567 = arith.mulf %563, %566 : vector<8x1xf32>
    %568 = arith.mulf %565, %565 : vector<8x1xf32>
    %569 = arith.subf %567, %568 : vector<8x1xf32>
    %570 = vector.broadcast %565 : vector<8x1xf32> to vector<8x128xf32>
    %571 = arith.subf %558, %570 : vector<8x128xf32>
    %cst_116 = arith.constant 9.99999974E-6 : f32
    %572 = vector.broadcast %cst_116 : f32 to vector<8x1xf32>
    %573 = arith.addf %569, %572 : vector<8x1xf32>
    %574 = math.rsqrt %573 : vector<8x1xf32>
    %575 = vector.broadcast %574 : vector<8x1xf32> to vector<8x128xf32>
    %576 = arith.mulf %571, %575 : vector<8x128xf32>
    %577 = vector.broadcast %19 : vector<1x128xf32> to vector<8x128xf32>
    %578 = arith.mulf %576, %577 : vector<8x128xf32>
    %579 = vector.broadcast %20 : vector<1x128xf32> to vector<8x128xf32>
    %580 = arith.addf %578, %579 : vector<8x128xf32>
    %581 = arith.truncf %580 : vector<8x128xf32> to vector<8x128xbf16>
    %cst_117 = arith.constant dense<0.000000e+00> : vector<8x384xf32>
    %582 = tpu.matmul %581, %8, %cst_117 {dimension_numbers = #tpu.dot_dimension_numbers<[1], [0], [0], [1], [0, 0, 1, 1], [], []>} : vector<8x128xbf16>, vector<128x384xbf16>, vector<8x384xf32> -> vector<8x384xf32>
    %583 = arith.addf %582, %18 : vector<8x384xf32>
    %584 = vector.extract_strided_slice %583 {offsets = [0, 0], sizes = [8, 128], strides = [1, 1]} : vector<8x384xf32> to vector<8x128xf32>
    %585 = vector.extract_strided_slice %529 {offsets = [0, 0], sizes = [8, 128], strides = [1, 1]} : vector<8x384xf32> to vector<8x128xf32>
    %586 = arith.addf %584, %585 : vector<8x128xf32>
    %587 = arith.negf %586 : vector<8x128xf32>
    %588 = math.exp %587 : vector<8x128xf32>
    %cst_118 = arith.constant 1.000000e+00 : f32
    %589 = vector.broadcast %cst_118 : f32 to vector<8x128xf32>
    %590 = arith.addf %589, %588 : vector<8x128xf32>
    %591 = arith.divf %589, %590 : vector<8x128xf32>
    %592 = vector.extract_strided_slice %583 {offsets = [0, 128], sizes = [8, 128], strides = [1, 1]} : vector<8x384xf32> to vector<8x128xf32>
    %593 = vector.extract_strided_slice %529 {offsets = [0, 128], sizes = [8, 128], strides = [1, 1]} : vector<8x384xf32> to vector<8x128xf32>
    %594 = arith.addf %592, %593 : vector<8x128xf32>
    %595 = arith.negf %594 : vector<8x128xf32>
    %596 = math.exp %595 : vector<8x128xf32>
    %cst_119 = arith.constant 1.000000e+00 : f32
    %597 = vector.broadcast %cst_119 : f32 to vector<8x128xf32>
    %598 = arith.addf %597, %596 : vector<8x128xf32>
    %599 = arith.divf %597, %598 : vector<8x128xf32>
    %600 = vector.extract_strided_slice %583 {offsets = [0, 256], sizes = [8, 128], strides = [1, 1]} : vector<8x384xf32> to vector<8x128xf32>
    %601 = vector.extract_strided_slice %529 {offsets = [0, 256], sizes = [8, 128], strides = [1, 1]} : vector<8x384xf32> to vector<8x128xf32>
    %602 = arith.addf %601, %15 : vector<8x128xf32>
    %603 = arith.mulf %591, %602 : vector<8x128xf32>
    %604 = arith.addf %600, %603 : vector<8x128xf32>
    %605 = math.tanh %604 : vector<8x128xf32>
    %cst_120 = arith.constant 1.000000e+00 : f32
    %606 = vector.broadcast %cst_120 : f32 to vector<8x128xf32>
    %607 = arith.subf %606, %599 : vector<8x128xf32>
    %608 = arith.mulf %607, %605 : vector<8x128xf32>
    %609 = arith.mulf %599, %526 : vector<8x128xf32>
    %610 = arith.addf %608, %609 : vector<8x128xf32>
    %611 = vector.extract_strided_slice %6 {offsets = [56, 0], sizes = [8, 384], strides = [1, 1]} : vector<64x384xf32> to vector<8x384xf32>
    %612 = arith.truncf %610 : vector<8x128xf32> to vector<8x128xbf16>
    %cst_121 = arith.constant dense<0.000000e+00> : vector<8x384xf32>
    %613 = tpu.matmul %612, %9, %cst_121 {dimension_numbers = #tpu.dot_dimension_numbers<[1], [0], [0], [1], [0, 0, 1, 1], [], []>} : vector<8x128xbf16>, vector<128x384xbf16>, vector<8x384xf32> -> vector<8x384xf32>
    %614 = arith.truncf %558 : vector<8x128xf32> to vector<8x128xbf16>
    %cst_122 = arith.constant dense<0.000000e+00> : vector<8x384xf32>
    %615 = tpu.matmul %614, %7, %cst_122 {dimension_numbers = #tpu.dot_dimension_numbers<[1], [0], [0], [1], [0, 0, 1, 1], [], []>} : vector<8x128xbf16>, vector<128x384xbf16>, vector<8x384xf32> -> vector<8x384xf32>
    %616 = vector.extract_strided_slice %611 {offsets = [0, 0], sizes = [8, 128], strides = [1, 1]} : vector<8x384xf32> to vector<8x128xf32>
    %617 = vector.extract_strided_slice %615 {offsets = [0, 0], sizes = [8, 128], strides = [1, 1]} : vector<8x384xf32> to vector<8x128xf32>
    %618 = arith.addf %616, %617 : vector<8x128xf32>
    %619 = arith.negf %618 : vector<8x128xf32>
    %620 = math.exp %619 : vector<8x128xf32>
    %cst_123 = arith.constant 1.000000e+00 : f32
    %621 = vector.broadcast %cst_123 : f32 to vector<8x128xf32>
    %622 = arith.addf %621, %620 : vector<8x128xf32>
    %623 = arith.divf %621, %622 : vector<8x128xf32>
    %624 = vector.extract_strided_slice %611 {offsets = [0, 128], sizes = [8, 128], strides = [1, 1]} : vector<8x384xf32> to vector<8x128xf32>
    %625 = vector.extract_strided_slice %615 {offsets = [0, 128], sizes = [8, 128], strides = [1, 1]} : vector<8x384xf32> to vector<8x128xf32>
    %626 = arith.addf %624, %625 : vector<8x128xf32>
    %627 = arith.negf %626 : vector<8x128xf32>
    %628 = math.exp %627 : vector<8x128xf32>
    %cst_124 = arith.constant 1.000000e+00 : f32
    %629 = vector.broadcast %cst_124 : f32 to vector<8x128xf32>
    %630 = arith.addf %629, %628 : vector<8x128xf32>
    %631 = arith.divf %629, %630 : vector<8x128xf32>
    %632 = vector.extract_strided_slice %611 {offsets = [0, 256], sizes = [8, 128], strides = [1, 1]} : vector<8x384xf32> to vector<8x128xf32>
    %633 = vector.extract_strided_slice %615 {offsets = [0, 256], sizes = [8, 128], strides = [1, 1]} : vector<8x384xf32> to vector<8x128xf32>
    %634 = arith.addf %633, %12 : vector<8x128xf32>
    %635 = arith.mulf %623, %634 : vector<8x128xf32>
    %636 = arith.addf %632, %635 : vector<8x128xf32>
    %637 = math.tanh %636 : vector<8x128xf32>
    %cst_125 = arith.constant 1.000000e+00 : f32
    %638 = vector.broadcast %cst_125 : f32 to vector<8x128xf32>
    %639 = arith.subf %638, %631 : vector<8x128xf32>
    %640 = arith.mulf %639, %637 : vector<8x128xf32>
    %641 = arith.mulf %631, %558 : vector<8x128xf32>
    %642 = arith.addf %640, %641 : vector<8x128xf32>
    %cst_126 = arith.constant dense<0.000000e+00> : vector<8xf32>
    %643 = vector.multi_reduction <add>, %642, %cst_126 [1] : vector<8x128xf32> to vector<8xf32>
    %644 = vector.shape_cast %643 : vector<8xf32> to vector<8x1xf32>
    %645 = arith.mulf %642, %642 : vector<8x128xf32>
    %cst_127 = arith.constant dense<0.000000e+00> : vector<8xf32>
    %646 = vector.multi_reduction <add>, %645, %cst_127 [1] : vector<8x128xf32> to vector<8xf32>
    %647 = vector.shape_cast %646 : vector<8xf32> to vector<8x1xf32>
    %cst_128 = arith.constant 3.125000e-02 : f32
    %648 = vector.broadcast %cst_128 : f32 to vector<8x1xf32>
    %649 = arith.mulf %644, %648 : vector<8x1xf32>
    %cst_129 = arith.constant 3.125000e-02 : f32
    %650 = vector.broadcast %cst_129 : f32 to vector<8x1xf32>
    %651 = arith.mulf %647, %650 : vector<8x1xf32>
    %652 = arith.mulf %649, %649 : vector<8x1xf32>
    %653 = arith.subf %651, %652 : vector<8x1xf32>
    %654 = vector.broadcast %649 : vector<8x1xf32> to vector<8x128xf32>
    %655 = arith.subf %642, %654 : vector<8x128xf32>
    %cst_130 = arith.constant 9.99999974E-6 : f32
    %656 = vector.broadcast %cst_130 : f32 to vector<8x1xf32>
    %657 = arith.addf %653, %656 : vector<8x1xf32>
    %658 = math.rsqrt %657 : vector<8x1xf32>
    %659 = vector.broadcast %658 : vector<8x1xf32> to vector<8x128xf32>
    %660 = arith.mulf %655, %659 : vector<8x128xf32>
    %661 = vector.broadcast %19 : vector<1x128xf32> to vector<8x128xf32>
    %662 = arith.mulf %660, %661 : vector<8x128xf32>
    %663 = vector.broadcast %20 : vector<1x128xf32> to vector<8x128xf32>
    %664 = arith.addf %662, %663 : vector<8x128xf32>
    %665 = arith.truncf %664 : vector<8x128xf32> to vector<8x128xbf16>
    %cst_131 = arith.constant dense<0.000000e+00> : vector<8x384xf32>
    %666 = tpu.matmul %665, %8, %cst_131 {dimension_numbers = #tpu.dot_dimension_numbers<[1], [0], [0], [1], [0, 0, 1, 1], [], []>} : vector<8x128xbf16>, vector<128x384xbf16>, vector<8x384xf32> -> vector<8x384xf32>
    %667 = arith.addf %666, %18 : vector<8x384xf32>
    %668 = vector.extract_strided_slice %667 {offsets = [0, 0], sizes = [8, 128], strides = [1, 1]} : vector<8x384xf32> to vector<8x128xf32>
    %669 = vector.extract_strided_slice %613 {offsets = [0, 0], sizes = [8, 128], strides = [1, 1]} : vector<8x384xf32> to vector<8x128xf32>
    %670 = arith.addf %668, %669 : vector<8x128xf32>
    %671 = arith.negf %670 : vector<8x128xf32>
    %672 = math.exp %671 : vector<8x128xf32>
    %cst_132 = arith.constant 1.000000e+00 : f32
    %673 = vector.broadcast %cst_132 : f32 to vector<8x128xf32>
    %674 = arith.addf %673, %672 : vector<8x128xf32>
    %675 = arith.divf %673, %674 : vector<8x128xf32>
    %676 = vector.extract_strided_slice %667 {offsets = [0, 128], sizes = [8, 128], strides = [1, 1]} : vector<8x384xf32> to vector<8x128xf32>
    %677 = vector.extract_strided_slice %613 {offsets = [0, 128], sizes = [8, 128], strides = [1, 1]} : vector<8x384xf32> to vector<8x128xf32>
    %678 = arith.addf %676, %677 : vector<8x128xf32>
    %679 = arith.negf %678 : vector<8x128xf32>
    %680 = math.exp %679 : vector<8x128xf32>
    %cst_133 = arith.constant 1.000000e+00 : f32
    %681 = vector.broadcast %cst_133 : f32 to vector<8x128xf32>
    %682 = arith.addf %681, %680 : vector<8x128xf32>
    %683 = arith.divf %681, %682 : vector<8x128xf32>
    %684 = vector.extract_strided_slice %667 {offsets = [0, 256], sizes = [8, 128], strides = [1, 1]} : vector<8x384xf32> to vector<8x128xf32>
    %685 = vector.extract_strided_slice %613 {offsets = [0, 256], sizes = [8, 128], strides = [1, 1]} : vector<8x384xf32> to vector<8x128xf32>
    %686 = arith.addf %685, %15 : vector<8x128xf32>
    %687 = arith.mulf %675, %686 : vector<8x128xf32>
    %688 = arith.addf %684, %687 : vector<8x128xf32>
    %689 = math.tanh %688 : vector<8x128xf32>
    %cst_134 = arith.constant 1.000000e+00 : f32
    %690 = vector.broadcast %cst_134 : f32 to vector<8x128xf32>
    %691 = arith.subf %690, %683 : vector<8x128xf32>
    %692 = arith.mulf %691, %689 : vector<8x128xf32>
    %693 = arith.mulf %683, %610 : vector<8x128xf32>
    %694 = arith.addf %692, %693 : vector<8x128xf32>
    %c0_135 = arith.constant 0 : index
    %c0_136 = arith.constant 0 : index
    %695 = vector.load %arg11[%c0_135, %c0_136] : memref<1x128xf32, #tpu.memory_space<vmem>>, vector<1x128xf32>
    %c0_137 = arith.constant 0 : index
    %c0_138 = arith.constant 0 : index
    %696 = vector.load %arg12[%c0_137, %c0_138] : memref<1x128xf32, #tpu.memory_space<vmem>>, vector<1x128xf32>
    %cst_139 = arith.constant dense<0.000000e+00> : vector<8xf32>
    %697 = vector.multi_reduction <add>, %694, %cst_139 [1] : vector<8x128xf32> to vector<8xf32>
    %698 = vector.shape_cast %697 : vector<8xf32> to vector<8x1xf32>
    %699 = arith.mulf %694, %694 : vector<8x128xf32>
    %cst_140 = arith.constant dense<0.000000e+00> : vector<8xf32>
    %700 = vector.multi_reduction <add>, %699, %cst_140 [1] : vector<8x128xf32> to vector<8xf32>
    %701 = vector.shape_cast %700 : vector<8xf32> to vector<8x1xf32>
    %cst_141 = arith.constant 3.125000e-02 : f32
    %702 = vector.broadcast %cst_141 : f32 to vector<8x1xf32>
    %703 = arith.mulf %698, %702 : vector<8x1xf32>
    %cst_142 = arith.constant 3.125000e-02 : f32
    %704 = vector.broadcast %cst_142 : f32 to vector<8x1xf32>
    %705 = arith.mulf %701, %704 : vector<8x1xf32>
    %706 = arith.mulf %703, %703 : vector<8x1xf32>
    %707 = arith.subf %705, %706 : vector<8x1xf32>
    %708 = vector.broadcast %703 : vector<8x1xf32> to vector<8x128xf32>
    %709 = arith.subf %694, %708 : vector<8x128xf32>
    %cst_143 = arith.constant 9.99999974E-6 : f32
    %710 = vector.broadcast %cst_143 : f32 to vector<8x1xf32>
    %711 = arith.addf %707, %710 : vector<8x1xf32>
    %712 = math.rsqrt %711 : vector<8x1xf32>
    %713 = vector.broadcast %712 : vector<8x1xf32> to vector<8x128xf32>
    %714 = arith.mulf %709, %713 : vector<8x128xf32>
    %715 = vector.broadcast %695 : vector<1x128xf32> to vector<8x128xf32>
    %716 = arith.mulf %714, %715 : vector<8x128xf32>
    %717 = vector.broadcast %696 : vector<1x128xf32> to vector<8x128xf32>
    %718 = arith.addf %716, %717 : vector<8x128xf32>
    %719 = arith.truncf %718 : vector<8x128xf32> to vector<8x128xbf16>
    %c0_144 = arith.constant 0 : index
    %c0_145 = arith.constant 0 : index
    %720 = vector.load %arg13[%c0_144, %c0_145] : memref<128x128xbf16, #tpu.memory_space<vmem>>, vector<128x128xbf16>
    %cst_146 = arith.constant dense<0.000000e+00> : vector<8x128xf32>
    %721 = tpu.matmul %719, %720, %cst_146 {dimension_numbers = #tpu.dot_dimension_numbers<[1], [0], [0], [1], [0, 0, 1, 1], [], []>} : vector<8x128xbf16>, vector<128x128xbf16>, vector<8x128xf32> -> vector<8x128xf32>
    %c0_147 = arith.constant 0 : index
    %c0_148 = arith.constant 0 : index
    %722 = vector.load %arg14[%c0_147, %c0_148] : memref<1x128xf32, #tpu.memory_space<vmem>>, vector<1x128xf32>
    %723 = vector.broadcast %722 : vector<1x128xf32> to vector<8x128xf32>
    %724 = arith.addf %721, %723 : vector<8x128xf32>
    %cst_149 = arith.constant 0.000000e+00 : f32
    %725 = vector.broadcast %cst_149 : f32 to vector<8x128xf32>
    %726 = arith.maximumf %724, %725 : vector<8x128xf32>
    %727 = arith.truncf %726 : vector<8x128xf32> to vector<8x128xbf16>
    %c0_150 = arith.constant 0 : index
    %c0_151 = arith.constant 0 : index
    %728 = vector.load %arg15[%c0_150, %c0_151] : memref<128x128xbf16, #tpu.memory_space<vmem>>, vector<128x128xbf16>
    %cst_152 = arith.constant dense<0.000000e+00> : vector<8x128xf32>
    %729 = tpu.matmul %727, %728, %cst_152 {dimension_numbers = #tpu.dot_dimension_numbers<[1], [0], [0], [1], [0, 0, 1, 1], [], []>} : vector<8x128xbf16>, vector<128x128xbf16>, vector<8x128xf32> -> vector<8x128xf32>
    %c0_153 = arith.constant 0 : index
    %c0_154 = arith.constant 0 : index
    %730 = vector.load %arg16[%c0_153, %c0_154] : memref<1x128xf32, #tpu.memory_space<vmem>>, vector<1x128xf32>
    %731 = vector.broadcast %730 : vector<1x128xf32> to vector<8x128xf32>
    %732 = arith.addf %729, %731 : vector<8x128xf32>
    %cst_155 = arith.constant 0.000000e+00 : f32
    %733 = vector.broadcast %cst_155 : f32 to vector<8x128xf32>
    %734 = arith.maximumf %732, %733 : vector<8x128xf32>
    %735 = arith.truncf %734 : vector<8x128xf32> to vector<8x128xbf16>
    %c0_156 = arith.constant 0 : index
    %c0_157 = arith.constant 0 : index
    %736 = vector.load %arg17[%c0_156, %c0_157] : memref<128x128xbf16, #tpu.memory_space<vmem>>, vector<128x128xbf16>
    %cst_158 = arith.constant dense<0.000000e+00> : vector<8x128xf32>
    %737 = tpu.matmul %735, %736, %cst_158 {dimension_numbers = #tpu.dot_dimension_numbers<[1], [0], [0], [1], [0, 0, 1, 1], [], []>} : vector<8x128xbf16>, vector<128x128xbf16>, vector<8x128xf32> -> vector<8x128xf32>
    %c0_159 = arith.constant 0 : index
    %c0_160 = arith.constant 0 : index
    %738 = vector.load %arg18[%c0_159, %c0_160] : memref<1x128xf32, #tpu.memory_space<vmem>>, vector<1x128xf32>
    %739 = vector.broadcast %738 : vector<1x128xf32> to vector<8x128xf32>
    %740 = arith.addf %737, %739 : vector<8x128xf32>
    %c0_161 = arith.constant 0 : index
    %c0_162 = arith.constant 0 : index
    %741 = vector.load %arg19[%c0_161, %c0_162] : memref<8x128xf32, #tpu.memory_space<vmem>>, vector<8x128xf32>
    tpu.vector_store %arg19[%c0_161, %c0_162], %740 {strides = array<i32>} : memref<8x128xf32, #tpu.memory_space<vmem>>, vector<8x128xf32>,
    return
  }
}

</mosaic_0001>

<bundles_post_ra>
// kernel: basic_gru_forward.1
= control target key start
LH: loop header
LB: loop body
LE: loop exit
PB: predicated region body
PF: predicated region fallthrough
CT: control target
= control target key end

     0   :  { %s5346_s0 = inlined_call_operand.vmem [shape: f32[64,16], index: 0, kind: input, shape index: {}]   ;;  %s5347_s1 = inlined_call_operand.hbm [shape: bf16[16,384], index: 1, kind: input, shape index: {}]   ;;  %s5348_s2 = inlined_call_operand.hbm [shape: bf16[128,384], index: 2, kind: input, shape index: {}]   ;;  %s5349_s3 = inlined_call_operand.vmem [shape: f32[1,384], index: 3, kind: input, shape index: {}]   ;;  %s5350_s4 = inlined_call_operand.hbm [shape: f32[1,128], index: 4, kind: input, shape index: {}]   ;;  %s5351_s5 = inlined_call_operand.vmem [shape: f32[1,128], index: 5, kind: input, shape index: {}]   ;;  %s5352_s6 = inlined_call_operand.hbm [shape: f32[1,128], index: 6, kind: input, shape index: {}]   ;;  %s5353_s7 = inlined_call_operand.hbm [shape: bf16[128,384], index: 7, kind: input, shape index: {}]   ;;  %s5354_s8 = inlined_call_operand.hbm [shape: bf16[128,384], index: 8, kind: input, shape index: {}]   ;;  %s5355_s9 = inlined_call_operand.vmem [shape: f32[1,384], index: 9, kind: input, shape index: {}]   ;;  %s5356_s10 = inlined_call_operand.vmem [shape: f32[1,128], index: 10, kind: input, shape index: {}]   ;;  %s5357_s11 = inlined_call_operand.vmem [shape: f32[1,128], index: 11, kind: input, shape index: {}]   ;;  %s5358_s12 = inlined_call_operand.vmem [shape: f32[1,128], index: 12, kind: input, shape index: {}]   ;;  %s5359_s13 = inlined_call_operand.vmem [shape: bf16[128,128], index: 13, kind: input, shape index: {}]   ;;  %s5360_s14 = inlined_call_operand.vmem [shape: f32[1,128], index: 14, kind: input, shape index: {}]   ;;  %s5361_s15 = inlined_call_operand.vmem [shape: bf16[128,128], index: 15, kind: input, shape index: {}]   ;;  %s5362_s16 = inlined_call_operand.vmem [shape: f32[1,128], index: 16, kind: input, shape index: {}]   ;;  %s5363_s17 = inlined_call_operand.hbm [shape: bf16[128,128], index: 17, kind: input, shape index: {}]   ;;  %s5364_s18 = inlined_call_operand.vmem [shape: f32[1,128], index: 18, kind: input, shape index: {}]   ;;  %s5365_s19 = inlined_call_operand.vmem [shape: f32[8,128], index: 19, kind: output, shape index: {}]  }
   0x1   :  { %5481 = sst [smem:[#allocation90_spill]] %s5346_s0 }
   0x2   :  { %5482 = sst [smem:[#allocation91_spill]] %s5347_s1 }
   0x3   :  { %5483 = sst [smem:[#allocation92_spill]] %s5348_s2 }
   0x4   :  { %5484 = sst [smem:[#allocation93_spill]] %s5349_s3 }
   0x5   :  { %24 = vsyncpa [#allocation3], 0 }
   0x6   :  { %25 = vsyncpa [#allocation5], 0 }
   0x7   :  { %26 = vsyncpa [#allocation8], 0 }
   0x8   :  { %27 = vsyncpa [#allocation11], 0  ;;  %s5485_s20 = sld [smem:[#allocation92_spill]]  ;;  %s3942_s1 = smov [#allocation4]  }
   0x9   :  { %s49_s22 = sshll.u32 %s3942_s1, 4  ;;  %s76_s24 = sshll.u32 %s5352_s6, 4  ;;  %s50_s22 = int_to_ptr.vmem [resolvable:$true] %s49_s22  ;;  %s77_s24 = int_to_ptr.hbm [resolvable:$true] %s76_s24 }
   0xa   :  { %s3943_s25 = smov 192   ;;  %s3944_s3 = smov 12  }
   0xb   :  { %s3945_s26 = smov [#allocation7]   ;;  %s99_s0 = sshll.u32 %s5354_s8, 4  ;;  %s100_s0 = int_to_ptr.hbm [resolvable:$true] %s99_s0 }
   0xc   :  { %s78_s27 = sshll.u32 %s3945_s26, 4  ;;  %s5486_s1 = sld [smem:[#allocation91_spill]]  ;;  %s79_s27 = int_to_ptr.vmem [resolvable:$true] %s78_s27 }
   0xd   :  { %81 = dma.hbm_to_vmem [thread:$0]  %s77_s24, 16, %s79_s27, [#allocation8]  }
   0xe   :  { %s47_s21 = sshll.u32 %s5485_s20, 4  ;;  %s3946_s2 = smov [#allocation10]   ;;  %s48_s21 = int_to_ptr.hbm [resolvable:$true] %s47_s21 }
   0xf   :  { %55 = dma.hbm_to_vmem [thread:$0]  %s48_s21, 3072, %s50_s22, [#allocation5], %s3943_s25, %s3943_s25, %s3944_s3  }
  0x10   :  { %s101_s23 = sshll.u32 %s3946_s2, 4  ;;  %s3947_s21 = smov [#allocation2]   ;;  %s102_s23 = int_to_ptr.vmem [resolvable:$true] %s101_s23 }
  0x11   :  { %107 = dma.hbm_to_vmem [thread:$0]  %s100_s0, 3072, %s102_s23, [#allocation11], %s3943_s25, %s3943_s25, %s3944_s3  }
  0x12   :  { %s34_s6 = sshll.u32 %s5486_s1, 4  ;;  %s36_s22 = sshll.u32 %s3947_s21, 4  ;;  %s35_s6 = int_to_ptr.hbm [resolvable:$true] %s34_s6  ;;  %s37_s22 = int_to_ptr.vmem [resolvable:$true] %s36_s22 }
  0x13   :  { %s63_s8 = sshll.u32 %s5350_s4, 4  ;;  %s86_s29 = sshll.u32 %s5353_s7, 4  ;;  %s64_s8 = int_to_ptr.hbm [resolvable:$true] %s63_s8  ;;  %s87_s29 = int_to_ptr.hbm [resolvable:$true] %s86_s29 }
  0x14   :  { %42 = dma.hbm_to_vmem [thread:$0]  %s35_s6, 384, %s37_s22, [#allocation3], %s3943_s25, %s3943_s25, %s3944_s3  }
  0x15   :  { %s3948_s30 = smov [#allocation6]   ;;  %s3949_s0 = smov [#allocation9]  }
  0x16   :  { %s65_s20 = sshll.u32 %s3948_s30, 4  ;;  %s88_s1 = sshll.u32 %s3949_s0, 4  ;;  %s66_s20 = int_to_ptr.vmem [resolvable:$true] %s65_s20  ;;  %s89_s1 = int_to_ptr.vmem [resolvable:$true] %s88_s1 }
  0x17   :  { %68 = dma.hbm_to_vmem [thread:$0]  %s64_s8, 16, %s66_s20, [#allocation5]  }
  0x18   :  { %s128_s4 = sshll.u32 %s5363_s17, 4  ;;  %s3950_s6 = smov [#allocation12]   ;;  %s129_s4 = int_to_ptr.hbm [resolvable:$true] %s128_s4 }
  0x19   :  { %94 = dma.hbm_to_vmem [thread:$0]  %s87_s29, 3072, %s89_s1, [#allocation8], %s3943_s25, %s3943_s25, %s3944_s3  }
  0x1a   :  { %s130_s21 = sshll.u32 %s3950_s6, 4  ;;  %s3951_s7 = smov 64   ;;  %s131_s21 = int_to_ptr.vmem [resolvable:$true] %s130_s21 }
  0x1b   :  { %s3952_s22 = smov 4  }
  0x1c   :  { %136 = dma.hbm_to_vmem [thread:$0]  %s129_s4, 1024, %s131_s21, [#allocation11], %s3951_s7, %s3951_s7, %s3952_s22  }
  0x1d   :  { %3934 = dma.done.wait [#allocation3], 384  }
  0x1e   :  { %3935 = vsyncadd [#allocation3], 4294966912 }
  0x1f   :  { %3936 = dma.done.wait [#allocation5], 3088  }
  0x20   :  { %3937 = vsyncadd [#allocation5], 4294964208 }
  0x21   :  { %3938 = dma.done.wait [#allocation8], 3088  }
  0x22   :  { %3939 = vsyncadd [#allocation8], 4294964208 }
  0x23   :  { %3940 = dma.done.wait [#allocation11], 4096  }
  0x24   :  { %3941 = vsyncadd [#allocation11], 4294963200  ;;  %v3021_v0 = vld [vmem:[#allocation2] sm:$0xf]  ;;  %v3460_v1 = vld [vmem:[#allocation2 + $0x8] sm:$0xf0] }
  0x25   :  { %v3029_v2 = vld [vmem:[#allocation2 + $0x8] sm:$0xf]  ;;  %v3022_v3 = vor.u32 %v3460_v1, %v3021_v0  ;;  %v3461_v4 = vld [vmem:[#allocation2 + $0x10] sm:$0xf0]  ;;  %s5487_s3 = sld [smem:[#allocation90_spill]]  ;;  %vm208_vm0 = vcmask 130048  }
  0x26   :  { %v3030_v7 = vor.u32 %v3461_v4, %v3029_v2  ;;  %v3459_v9 = vld [vmem:[#allocation2 + $0x4] sm:$0xf]  ;;  %v3023_v10 = vld [vmem:[#allocation2 + $0xc] sm:$0xf0]  ;;  %v3117_v18 = vld [vmem:[#allocation10 + $0x90] sm:$0xf] }
  0x27   :  { %3558 = vmatpush.bf16.msra.mxu1 %v3022_v3  ;;  %v3026_v12 = vor.u32 %v3459_v9, %v3023_v10  ;;  %v3129_v14 = vld [vmem:[#allocation10 + $0xa8] sm:$0xf]  ;;  %v3532_v15 = vld [vmem:[#allocation10 + $0xb0] sm:$0xf0]  ;;  %228 = vmatpush.bf16.msra.mxu0 %v3022_v3  ;;  %v3529_v19 = vld [vmem:[#allocation10 + $0x98] sm:$0xf0] }
  0x28   :  { %286 = vmatpush.bf16.msra.mxu2 %v3030_v7  ;;  %v4101_v17 = vor.u32 %v3532_v15, %v3129_v14  ;;  %v4106_v20 = vor.u32 %v3529_v19, %v3117_v18  ;;  %v3105_v21 = vld [vmem:[#allocation10 + $0x78] sm:$0xf]  ;;  %v3225_v22 = vld [vmem:[#allocation4 + $0xa8] sm:$0xf]  ;;  %v3484_v23 = vld [vmem:[#allocation4 + $0xb0] sm:$0xf0] }
  0x29   :  { %v3526_v24 = vld [vmem:[#allocation10 + $0x80] sm:$0xf0]  ;;  %v4109_v25 = vor.u32 %v3484_v23, %v3225_v22  ;;  %v3483_v26 = vld [vmem:[#allocation4 + $0xac] sm:$0xf]  ;;  %v3227_v27 = vld [vmem:[#allocation4 + $0xb4] sm:$0xf0] }
  0x2a   :  { %550 = vmatpush.bf16.msra.mxu3 %v4101_v17  ;;  %v4112_v28 = vor.u32 %v3483_v26, %v3227_v27  ;;  %v3213_v29 = vld [vmem:[#allocation4 + $0x90] sm:$0xf]  ;;  %v3481_v30 = vld [vmem:[#allocation4 + $0x98] sm:$0xf0]  ;;  %v4116_v31 = vor.u32 %v3526_v24, %v3105_v21  ;;  %v3480_v33 = vld [vmem:[#allocation4 + $0x94] sm:$0xf] }
  0x2b   :  { %v174_v5 = vld [vmem:[%s5487_s3 + $0x30] sm:$0xff]  ;;  %v175_v6 = vld [vmem:[%s5487_s3 + $0x38] sm:$0xff]  ;;  %v168_v11 = vld [vmem:[%s5487_s3] sm:$0xff]  ;;  %257 = vmatpush.bf16.msrb.mxu1 %v3026_v12  ;;  %5488 = vst [vmem:[#allocation17_spill] sm:$0xff] %v4109_v25  ;;  %v4119_v32 = vor.u32 %v3481_v30, %v3213_v29  ;;  %s5519_s22 = sld [smem:[#allocation93_spill]] }
  0x2c   :  { %v4093_v8 = vpack.c.bf16 %v175_v6, %v174_v5  ;;  %v169_v13 = vld [vmem:[%s5487_s3 + $0x8] sm:$0xff]  ;;  %5489 = vst [vmem:[#allocation18_spill] sm:$0xff] %v4112_v28  ;;  %730 = vmatpush.bf16.msrb.mxu2 %v4112_v28  ;;  %v3215_v34 = vld [vmem:[#allocation4 + $0x9c] sm:$0xf0]  ;;  %v3093_v35 = vld [vmem:[#allocation10 + $0x60] sm:$0xf] }
  0x2d   :  { %v176_v16 = vpack.c.bf16 %v169_v13, %v168_v11  ;;  %5490 = vst [vmem:[#allocation19_spill] sm:$0xff] %v4116_v31  ;;  %v3523_v36 = vld [vmem:[#allocation10 + $0x68] sm:$0xf0]  ;;  %v4121_v37 = vor.u32 %v3480_v33, %v3215_v34  ;;  %v3201_v38 = vld [vmem:[#allocation4 + $0x78] sm:$0xf]  ;;  %v171_v50 = vld [vmem:[%s5487_s3 + $0x18] sm:$0xff] }
  0x2e   :  { %3034 = vmatmul.msk.bf16.vlgmr.msra.gmra.mxu1 %vm208_vm0, %v4093_v8  ;;  %551 = vmatpush.bf16.msra.mxu3 %v4106_v20  ;;  %5491 = vst [vmem:[#allocation20_spill] sm:$0xff] %v4119_v32  ;;  %v3478_v39 = vld [vmem:[#allocation4 + $0x80] sm:$0xf0]  ;;  %v4127_v41 = vor.u32 %v3523_v36, %v3093_v35  ;;  %v3081_v42 = vld [vmem:[#allocation10 + $0x48] sm:$0xf]  ;;  %v170_v49 = vld [vmem:[%s5487_s3 + $0x10] sm:$0xff] }
  0x2f   :  { %3039 = vmatmul.msk.bf16.vlgmr.msra.gmra.mxu2 %vm208_vm0, %v176_v16  ;;  %3031 = vmatmul.msk.bf16.vlgmr.msra.gmra.mxu0 %vm208_vm0, %v176_v16  ;;  %5492 = vst [vmem:[#allocation21_spill] sm:$0xff] %v4121_v37  ;;  %v4124_v40 = vor.u32 %v3478_v39, %v3201_v38  ;;  %v3477_v43 = vld [vmem:[#allocation4 + $0x7c] sm:$0xf]  ;;  %v3203_v44 = vld [vmem:[#allocation4 + $0x84] sm:$0xf0]  ;;  %v177_v57 = vpack.c.bf16 %v171_v50, %v170_v49  ;;  %v173_v23 = vld [vmem:[%s5487_s3 + $0x28] sm:$0xff] }
  0x30   :  { %717 = vmatpush.bf16.msra.mxu1 %v4109_v25  ;;  %5494 = vst [vmem:[#allocation23_spill] sm:$0xff] %v4127_v41  ;;  %731 = vmatpush.bf16.msrb.mxu2 %v4121_v37  ;;  %v3520_v45 = vld [vmem:[#allocation10 + $0x50] sm:$0xf0]  ;;  %v4130_v46 = vor.u32 %v3477_v43, %v3203_v44  ;;  %v3189_v47 = vld [vmem:[#allocation4 + $0x60] sm:$0xf]  ;;  %v172_v21 = vld [vmem:[%s5487_s3 + $0x20] sm:$0xff] }
  0x31   :  { %5493 = vst [vmem:[#allocation22_spill] sm:$0xff] %v4124_v40  ;;  %v3475_v48 = vld [vmem:[#allocation4 + $0x68] sm:$0xf0]  ;;  %v3069_v51 = vld [vmem:[#allocation10 + $0x30] sm:$0xf]  ;;  %v4142_v56 = vor.u32 %v3520_v45, %v3081_v42  ;;  %v178_v33 = vpack.c.bf16 %v173_v23, %v172_v21  ;;  %v5367_v39 = vmov 0  }
  0x32   :  { %552 = vmatpush.bf16.msra.mxu3 %v4116_v31  ;;  %5495 = vst [vmem:[#allocation24_spill] sm:$0xff] %v4130_v46  ;;  %v3517_v52 = vld [vmem:[#allocation10 + $0x38] sm:$0xf0]  ;;  %v4139_v53 = vor.u32 %v3475_v48, %v3189_v47  ;;  %v3474_v54 = vld [vmem:[#allocation4 + $0x64] sm:$0xf] }
  0x33   :  { %v3191_v55 = vld [vmem:[#allocation4 + $0x6c] sm:$0xf0]  ;;  %5497 = vst [vmem:[#allocation26_spill] sm:$0xff] %v4142_v56  ;;  %v3471_v59 = vld [vmem:[#allocation4 + $0x4c] sm:$0xf]  ;;  %v4150_v61 = vor.u32 %v3517_v52, %v3069_v51 }
  0x34   :  { %718 = vmatpush.bf16.msra.mxu1 %v4119_v32  ;;  %5496 = vst [vmem:[#allocation25_spill] sm:$0xff] %v4139_v53  ;;  %732 = vmatpush.bf16.msrb.mxu2 %v4130_v46  ;;  %v4145_v58 = vor.u32 %v3474_v54, %v3191_v55  ;;  %v3179_v60 = vld [vmem:[#allocation4 + $0x54] sm:$0xf0]  ;;  %v3057_v62 = vld [vmem:[#allocation10 + $0x18] sm:$0xf] }
  0x35   :  { %5499 = vst [vmem:[#allocation28_spill] sm:$0xff] %v4150_v61  ;;  %v3514_v63 = vld [vmem:[#allocation10 + $0x20] sm:$0xf0]  ;;  %v3472_v1 = vld [vmem:[#allocation4 + $0x50] sm:$0xf0]  ;;  %v4157_v3 = vor.u32 %v3471_v59, %v3179_v60 }
  0x36   :  { %553 = vmatpush.bf16.msra.mxu3 %v4127_v41  ;;  %5498 = vst [vmem:[#allocation27_spill] sm:$0xff] %v4145_v58  ;;  %v3177_v0 = vld [vmem:[#allocation4 + $0x48] sm:$0xf]  ;;  %v3468_v4 = vld [vmem:[#allocation4 + $0x34] sm:$0xf]  ;;  %v4160_v9 = vor.u32 %v3514_v63, %v3057_v62 }
  0x37   :  { %v4155_v2 = vor.u32 %v3472_v1, %v3177_v0  ;;  %5501 = vst [vmem:[#allocation30_spill] sm:$0xff] %v4157_v3  ;;  %v3167_v5 = vld [vmem:[#allocation4 + $0x3c] sm:$0xf0]  ;;  %v3165_v6 = vld [vmem:[#allocation4 + $0x30] sm:$0xf] }
  0x38   :  { %719 = vmatpush.bf16.msra.mxu1 %v4124_v40  ;;  %733 = vmatpush.bf16.msrb.mxu2 %v4145_v58  ;;  %v3469_v7 = vld [vmem:[#allocation4 + $0x38] sm:$0xf0]  ;;  %5502 = vst [vmem:[#allocation31_spill] sm:$0xff] %v4160_v9  ;;  %v3045_v11 = vld [vmem:[#allocation10] sm:$0xf]  ;;  %v4166_v15 = vor.u32 %v3468_v4, %v3167_v5 }
  0x39   :  { %5500 = vst [vmem:[#allocation29_spill] sm:$0xff] %v4155_v2  ;;  %v4163_v10 = vor.u32 %v3469_v7, %v3165_v6  ;;  %v3511_v12 = vld [vmem:[#allocation10 + $0x8] sm:$0xf0]  ;;  %v3131_v14 = vld [vmem:[#allocation10 + $0xb4] sm:$0xf0] }
  0x3a   :  { %554 = vmatpush.bf16.msra.mxu3 %v4142_v56  ;;  %v3531_v13 = vld [vmem:[#allocation10 + $0xac] sm:$0xf]  ;;  %5504 = vst [vmem:[#allocation33_spill] sm:$0xff] %v4166_v15  ;;  %v3155_v18 = vld [vmem:[#allocation4 + $0x24] sm:$0xf0]  ;;  %v4169_v19 = vor.u32 %v3511_v12, %v3045_v11 }
  0x3b   :  { %5503 = vst [vmem:[#allocation32_spill] sm:$0xff] %v4163_v10  ;;  %v4175_v22 = vor.u32 %v3531_v13, %v3131_v14  ;;  %v3528_v24 = vld [vmem:[#allocation10 + $0x94] sm:$0xf]  ;;  %v3119_v26 = vld [vmem:[#allocation10 + $0x9c] sm:$0xf0] }
  0x3c   :  { %720 = vmatpush.bf16.msra.mxu1 %v4139_v53  ;;  %734 = vmatpush.bf16.msrb.mxu2 %v4157_v3  ;;  %5505 = vst [vmem:[#allocation34_spill] sm:$0xff] %v4169_v19  ;;  %v3462_v29 = vld [vmem:[#allocation4 + $0x4] sm:$0xf]  ;;  %v3143_v30 = vld [vmem:[#allocation4 + $0xc] sm:$0xf0]  ;;  %v4185_v34 = vor.u32 %v3528_v24, %v3119_v26 }
  0x3d   :  { %v3525_v35 = vld [vmem:[#allocation10 + $0x7c] sm:$0xf]  ;;  %v3107_v36 = vld [vmem:[#allocation10 + $0x84] sm:$0xf0]  ;;  %v4188_v38 = vor.u32 %v3462_v29, %v3143_v30  ;;  %v3153_v42 = vld [vmem:[#allocation4 + $0x18] sm:$0xf] }
  0x3e   :  { %3035 = vmatmul.msk.bf16.vlgmr.msrb.gmra.mxu1 %vm208_vm0, %v176_v16  ;;  %555 = vmatpush.bf16.msra.mxu3 %v4150_v61  ;;  %v3465_v16 = vld [vmem:[#allocation4 + $0x1c] sm:$0xf]  ;;  %v3466_v43 = vld [vmem:[#allocation4 + $0x20] sm:$0xf0]  ;;  %v4194_v44 = vor.u32 %v3525_v35, %v3107_v36  ;;  %v3522_v45 = vld [vmem:[#allocation10 + $0x64] sm:$0xf] }
  0x3f   :  { %3040 = vmatmul.msk.bf16.gmra.mxu2 %vm208_vm0, %v177_v57  ;;  %3032 = vmatmul.msk.bf16.gmra.mxu0 %vm208_vm0, %v177_v57  ;;  %v4181_v27 = vor.u32 %v3465_v16, %v3155_v18  ;;  %5507 = vst [vmem:[#allocation36_spill] sm:$0xff] %v4188_v38  ;;  %v4196_v47 = vor.u32 %v3466_v43, %v3153_v42  ;;  %v3095_v48 = vld [vmem:[#allocation10 + $0x6c] sm:$0xf0]  ;;  %v3141_v49 = vld [vmem:[#allocation4] sm:$0xf] }
  0x40   :  { %721 = vmatpush.bf16.msra.mxu1 %v4155_v2  ;;  %735 = vmatpush.bf16.msrb.mxu2 %v4166_v15  ;;  %v3463_v50 = vld [vmem:[#allocation4 + $0x8] sm:$0xf0]  ;;  %v4204_v52 = vor.u32 %v3522_v45, %v3095_v48  ;;  %v3519_v54 = vld [vmem:[#allocation10 + $0x4c] sm:$0xf]  ;;  %v3083_v55 = vld [vmem:[#allocation10 + $0x54] sm:$0xf0] }
  0x41   :  { %5506 = vst [vmem:[#allocation35_spill] sm:$0xff] %v4181_v27  ;;  %v4201_v51 = vor.u32 %v3463_v50, %v3141_v49  ;;  %v3516_v59 = vld [vmem:[#allocation10 + $0x34] sm:$0xf]  ;;  %v3071_v60 = vld [vmem:[#allocation10 + $0x3c] sm:$0xf0] }
  0x42   :  { %556 = vmatpush.bf16.msra.mxu3 %v4160_v9  ;;  %5508 = vst [vmem:[#allocation37_spill] sm:$0xff] %v4196_v47  ;;  %v4211_v62 = vor.u32 %v3516_v59, %v3071_v60  ;;  %v3513_v63 = vld [vmem:[#allocation10 + $0x1c] sm:$0xf]  ;;  %v3059_v0 = vld [vmem:[#allocation10 + $0x24] sm:$0xf0] }
  0x43   :  { %5509 = vst [vmem:[#allocation38_spill] sm:$0xff] %v4201_v51  ;;  %v4217_v1 = vor.u32 %v3513_v63, %v3059_v0  ;;  %v3510_v4 = vld [vmem:[#allocation10 + $0x4] sm:$0xf]  ;;  %v3047_v5 = vld [vmem:[#allocation10 + $0xc] sm:$0xf0] }
  0x44   :  { %722 = vmatpush.bf16.msra.mxu1 %v4163_v10  ;;  %736 = vmatpush.bf16.msrb.mxu2 %v4181_v27  ;;  %5511 = vst [vmem:[#allocation40_spill] sm:$0xff] %v4211_v62  ;;  %v3233_v6 = vld [vmem:[#allocation4 + $0xb0] sm:$0xf]  ;;  %v3485_v7 = vld [vmem:[#allocation4 + $0xb8] sm:$0xf0]  ;;  %v4220_v11 = vor.u32 %v3510_v4, %v3047_v5 }
  0x45   :  { %5512 = vst [vmem:[#allocation41_spill] sm:$0xff] %v4217_v1  ;;  %v4222_v12 = vor.u32 %v3485_v7, %v3233_v6  ;;  %v3221_v13 = vld [vmem:[#allocation4 + $0x98] sm:$0xf]  ;;  %v3482_v14 = vld [vmem:[#allocation4 + $0xa0] sm:$0xf0] }
  0x46   :  { %557 = vmatpush.bf16.msra.mxu3 %v4169_v19  ;;  %5513 = vst [vmem:[#allocation42_spill] sm:$0xff] %v4220_v11  ;;  %v4226_v16 = vor.u32 %v3482_v14, %v3221_v13  ;;  %v3209_v18 = vld [vmem:[#allocation4 + $0x80] sm:$0xf]  ;;  %v3479_v21 = vld [vmem:[#allocation4 + $0x88] sm:$0xf0] }
  0x47   :  { %v4230_v23 = vor.u32 %v3479_v21, %v3209_v18  ;;  %v3197_v24 = vld [vmem:[#allocation4 + $0x68] sm:$0xf]  ;;  %v3476_v26 = vld [vmem:[#allocation4 + $0x70] sm:$0xf0]  ;;  %v3185_v30 = vld [vmem:[#allocation4 + $0x50] sm:$0xf] }
  0x48   :  { %737 = vmatpush.bf16.msrb.mxu2 %v4188_v38  ;;  %723 = vmatpush.bf16.msra.mxu1 %v4196_v47  ;;  %v4236_v29 = vor.u32 %v3476_v26, %v3197_v24  ;;  %v3173_v36 = vld [vmem:[#allocation4 + $0x38] sm:$0xf]  ;;  %v3470_v42 = vld [vmem:[#allocation4 + $0x40] sm:$0xf0]  ;;  %v3161_v45 = vld [vmem:[#allocation4 + $0x20] sm:$0xf] }
  0x49   :  { %558 = vmatmul.bf16.vlgmr.msra.gmra.mxu3 %v5367_v39  ;;  %v4242_v43 = vor.u32 %v3470_v42, %v3173_v36  ;;  %v3149_v49 = vld [vmem:[#allocation4 + $0x8] sm:$0xf]  ;;  %v3464_v50 = vld [vmem:[#allocation4 + $0x10] sm:$0xf0] }
  0x4a   :  { %563 = vmatpush.bf16.msrb.mxu3 %v4175_v22  ;;  %v184_v4 = vld [vmem:[%s5519_s22] sm:$0x7] }
  0x4b   :  { %v4280_v5 = vperm.slane %v184_v4, 2  ;;  %v4287_v14 = vperm.slane %v184_v4, 1 }
  0x4c   :  { %724 = vmatpush.bf16.msra.mxu1 %v4201_v51 }
  0x4d   :  { %5520 = vst [vmem:[#allocation48_spill] sm:$0xff] %v4280_v5 }
  0x4e   :  { %3036 = vmatmul.msk.bf16.gmra.mxu1 %vm208_vm0, %v177_v57  ;;  %564 = vmatpush.bf16.msrb.mxu3 %v4185_v34  ;;  %v4208_v57 = vor.u32 %v3519_v54, %v3083_v55  ;;  %v4249_v54 = vor.u32 %v3464_v50, %v3149_v49  ;;  %5523 = vst [vmem:[#allocation51_spill] sm:$0xff] %v4287_v14 }
  0x4f   :  { %3041 = vmatmul.msk.bf16.gmra.mxu2 %vm208_vm0, %v178_v33  ;;  %3033 = vmatmul.msk.bf16.gmra.mxu0 %vm208_vm0, %v178_v33 }
  0x50   :  { %5510 = vst [vmem:[#allocation39_spill] sm:$0xff] %v4208_v57 }
  0x51   :  { %5515 = vst [vmem:[#allocation44_spill] sm:$0xff] %v4249_v54 }
  0x52   :  { %565 = vmatpush.bf16.msrb.mxu3 %v4194_v44 }
  0x56   :  { %566 = vmatpush.bf16.msrb.mxu3 %v4204_v52 }
  0x5a   :  { %567 = vmatpush.bf16.msrb.mxu3 %v4208_v57 }
  0x5e   :  { %3037 = vmatmul.msk.bf16.gmra.mxu1 %vm208_vm0, %v178_v33  ;;  %568 = vmatpush.bf16.msrb.mxu3 %v4211_v62  ;;  %v3473_v33 = vld [vmem:[#allocation4 + $0x58] sm:$0xf0] }
  0x5f   :  { %3042 = vmatmul.msk.bf16.gmra.mxu2 %vm208_vm0, %v4093_v8  ;;  %v4239_v35 = vor.u32 %v3473_v33, %v3185_v30 }
  0x62   :  { %569 = vmatpush.bf16.msrb.mxu3 %v4217_v1 }
  0x66   :  { %570 = vmatpush.bf16.msrb.mxu3 %v4220_v11 }
  0x69   :  { %571 = vmatmul.bf16.vlgmr.msrb.gmra.mxu3 %v5367_v39 }
  0x6a   :  { %743 = vmatpush.bf16.msra.mxu3 %v4222_v12 }
  0x6e   :  { %744 = vmatpush.bf16.msra.mxu3 %v4226_v16  ;;  %3038 = vmatmul.msk.bf16.gmra.mxu1 %vm208_vm0, %v4093_v8  ;;  %v3467_v8 = vld [vmem:[#allocation4 + $0x28] sm:$0xf0] }
  0x6f   :  { %738 = vmatmul.bf16.vlgmr.msrb.gmra.mxu2 %v5367_v39  ;;  %v4245_v48 = vor.u32 %v3467_v8, %v3161_v45 }
  0x71   :  { %5514 = vst [vmem:[#allocation43_spill] sm:$0xff] %v4245_v48 }
  0x72   :  { %745 = vmatpush.bf16.msra.mxu3 %v4230_v23 }
  0x76   :  { %746 = vmatpush.bf16.msra.mxu3 %v4236_v29 }
  0x7a   :  { %747 = vmatpush.bf16.msra.mxu3 %v4239_v35 }
  0x7e   :  { %748 = vmatpush.bf16.msra.mxu3 %v4242_v43  ;;  %725 = vmatmul.bf16.vlgmr.msra.gmra.mxu1 %v5367_v39 }
  0x82   :  { %749 = vmatpush.bf16.msra.mxu3 %v4245_v48 }
  0x86   :  { %750 = vmatpush.bf16.msra.mxu3 %v4249_v54 }
  0x89   :  { %751 = vmatmul.bf16.vlgmr.msra.gmra.mxu3 %v5367_v39 }
  0x8a   :  { %1051 = vmatpush.bf16.msrb.mxu3 %v4101_v17 }
  0x8e   :  { %1052 = vmatpush.bf16.msrb.mxu3 %v4106_v20 }
  0x92   :  { %1053 = vmatpush.bf16.msrb.mxu3 %v4116_v31 }
  0x96   :  { %1054 = vmatpush.bf16.msrb.mxu3 %v4127_v41 }
  0x9a   :  { %1055 = vmatpush.bf16.msrb.mxu3 %v4142_v56 }
  0x9e   :  { %1056 = vmatpush.bf16.msrb.mxu3 %v4150_v61 }
  0xa2   :  { %1057 = vmatpush.bf16.msrb.mxu3 %v4160_v9 }
  0xa6   :  { %1058 = vmatpush.bf16.msrb.mxu3 %v4169_v19  ;;  %v3498_v19 = vld [vmem:[#allocation9 + $0x64] sm:$0xf] }
  0xaa   :  { %1104 = vmatpush.bf16.msra.mxu3 %v4112_v28 }
  0xab   :  { %v4264_v55 = vpop.f32.mrf.mxu1 }
  0xac   :  { %5516 = vst [vmem:[#allocation45_spill] sm:$0xff] %v4264_v55 }
  0xae   :  { %1105 = vmatpush.bf16.msra.mxu3 %v4121_v37  ;;  %v3501_v37 = vld [vmem:[#allocation9 + $0x7c] sm:$0xf] }
  0xb2   :  { %1106 = vmatpush.bf16.msra.mxu3 %v4130_v46  ;;  %v4267_v59 = vpop.f32.mrf.mxu2  ;;  %v3502_v46 = vld [vmem:[#allocation9 + $0x80] sm:$0xf0] }
  0xb3   :  { %v4270_v60 = vpop.f32.mrf.mxu1 }
  0xb4   :  { %5517 = vst [vmem:[#allocation46_spill] sm:$0xff] %v4270_v60 }
  0xb6   :  { %1107 = vmatpush.bf16.msra.mxu3 %v4145_v58 }
  0xba   :  { %1108 = vmatpush.bf16.msra.mxu3 %v4157_v3  ;;  %v4273_v63 = vpop.f32.mrf.mxu2 }
  0xbb   :  { %5518 = vst [vmem:[#allocation47_spill] sm:$0xff] %v4273_v63  ;;  %v259_v0 = vpop.f32.mrf.mxu1 }
  0xbe   :  { %1109 = vmatpush.bf16.msra.mxu3 %v4166_v15  ;;  %v3527_v15 = vld [vmem:[#allocation10 + $0x88] sm:$0xf0] }
  0xc2   :  { %1110 = vmatpush.bf16.msra.mxu3 %v4181_v27  ;;  %v293_v6 = vpop.f32.mrf.mxu2 }
  0xc3   :  { %v4283_v7 = vadd.f32 %v293_v6, %v4280_v5  ;;  %v4285_v13 = vpop.f32.mrf.mxu1 }
  0xc4   :  { %5522 = vst [vmem:[#allocation50_spill] sm:$0xff] %v4285_v13  ;;  %v4324_v13 = vld [vmem:[#allocation6] ss:$0 sm:$0xff] }
  0xc5   :  { %5521 = vst [vmem:[#allocation49_spill] sm:$0xff] %v4283_v7 }
  0xc6   :  { %1111 = vmatpush.bf16.msra.mxu3 %v4188_v38  ;;  %5536 = vst [vmem:[#allocation64_spill] sm:$0xff] %v4324_v13  ;;  %v3113_v38 = vld [vmem:[#allocation10 + $0x80] sm:$0xf] }
  0xc7   :  { %v4335_v58 = vor.u32 %v3527_v15, %v3113_v38 }
  0xc9   :  { %5539 = vst [vmem:[#allocation67_spill] sm:$0xff] %v4335_v58 }
  0xca   :  { %v4289_v18 = vpop.f32.mrf.mxu2 }
  0xcb   :  { %5524 = vst [vmem:[#allocation52_spill] sm:$0xff] %v4289_v18  ;;  %v264_v21 = vpop.f32.mrf.mxu1 }
  0xcc   :  { %v4292_v24 = vadd.f32 %v264_v21, %v4287_v14  ;;  %v4294_v26 = vpop.f32.mrf.mxu3 }
  0xce   :  { %5525 = vst [vmem:[#allocation53_spill] sm:$0xff] %v4292_v24 }
  0xd2   :  { %v298_v30 = vpop.f32.mrf.mxu2 }
  0xd3   :  { %v4297_v33 = vadd.f32 %v298_v30, %v4280_v5  ;;  %v4299_v36 = vpop.f32.mrf.mxu1 }
  0xd4   :  { %5527 = vst [vmem:[#allocation55_spill] sm:$0xff] %v4299_v36  ;;  %v561_v42 = vpop.f32.mrf.mxu3 }
  0xd5   :  { %5526 = vst [vmem:[#allocation54_spill] sm:$0xff] %v4297_v33  ;;  %v260_v42 = vadd.f32 %v259_v0, %v4287_v14 }
  0xda   :  { %v4301_v45 = vpop.f32.mrf.mxu2 }
  0xdb   :  { %5528 = vst [vmem:[#allocation56_spill] sm:$0xff] %v4301_v45  ;;  %v269_v8 = vpop.f32.mrf.mxu1 }
  0xdc   :  { %v4304_v49 = vadd.f32 %v269_v8, %v4287_v14 }
  0xde   :  { %5529 = vst [vmem:[#allocation57_spill] sm:$0xff] %v4304_v49 }
  0xe2   :  { %v303_v50 = vpop.f32.mrf.mxu2 }
  0xe3   :  { %v4307_v6 = vadd.f32 %v303_v50, %v4280_v5  ;;  %v4309_v21 = vpop.f32.mrf.mxu1  ;;  %v4321_v50 = vperm.slane %v184_v4, 0 }
  0xe4   :  { %5531 = vst [vmem:[#allocation59_spill] sm:$0xff] %v4309_v21 }
  0xe5   :  { %5530 = vst [vmem:[#allocation58_spill] sm:$0xff] %v4307_v6  ;;  %v230_v6 = vpop.f32.mrf.mxu0 }
  0xe6   :  { %5535 = vst [vmem:[#allocation63_spill] sm:$0xff] %v4321_v50  ;;  %v231_v21 = vadd.f32 %v230_v6, %v4321_v50 }
  0xea   :  { %v4311_v39 = vpop.f32.mrf.mxu2 }
  0xeb   :  { %5532 = vst [vmem:[#allocation60_spill] sm:$0xff] %v4311_v39  ;;  %v274_v60 = vpop.f32.mrf.mxu1 }
  0xec   :  { %v4314_v30 = vadd.f32 %v274_v60, %v4287_v14  ;;  %v4316_v55 = vpop.f32.mrf.mxu3  ;;  %v3137_v14 = vld [vmem:[#allocation10 + $0xb0] sm:$0xf] }
  0xee   :  { %5533 = vst [vmem:[#allocation61_spill] sm:$0xff] %v4314_v30 }
  0xf2   :  { %v739_v45 = vpop.f32.mrf.mxu2 }
  0xf3   :  { %v776_v33 = vadd.f32 %v739_v45, %v260_v42  ;;  %v4319_v8 = vpop.f32.mrf.mxu1 }
  0xf4   :  { %5534 = vst [vmem:[#allocation62_spill] sm:$0xff] %v4319_v8  ;;  %v574_v18 = vpop.f32.mrf.mxu3 }
  0xf5   :  { %v3236_v49 = vmul.f32 -1.442695, %v776_v33 }
  0xf7   :  { %3580 = vpow2.f32 %v3236_v49 }
  0xfa   :  { %v741_v39 = vpop.f32.mrf.mxu2 }
  0xfb   :  { %v726_v36 = vpop.f32.mrf.mxu1 }
  0xfc   :  { %v756_v60 = vadd.f32 %v726_v36, %v231_v21  ;;  %v3533_v36 = vld [vmem:[#allocation10 + $0xb8] sm:$0xf0] }
  0xfd   :  { %v3581_v30 = vpop.eup %3580 }
  0xfe   :  { %v3235_v7 = vmul.f32 -1.442695, %v756_v60  ;;  %v780_v24 = vadd.f32 1.0, %v3581_v30  ;;  %v4326_v60 = vor.u32 %v3533_v36, %v3137_v14  ;;  %v3530_v30 = vld [vmem:[#allocation10 + $0xa0] sm:$0xf0] }
 0x100   :  { %3582 = vpow2.f32 %v3235_v7  ;;  %5537 = vst [vmem:[#allocation65_spill] sm:$0xff] %v4326_v60  ;;  %v3125_v7 = vld [vmem:[#allocation10 + $0x98] sm:$0xf]  ;;  %576 = vmatpush.bf16.msrb.mxu0 %v4326_v60  ;;  %vm786_vm6 = vweird.f32 %v780_v24 }
 0x101   :  { %3584 = vrcp.f32 %v780_v24  ;;  %v4329_v50 = vor.u32 %v3530_v30, %v3125_v7  ;;  %v3101_v30 = vld [vmem:[#allocation10 + $0x68] sm:$0xf] }
 0x103   :  { %v728_v0 = vpop.f32.mrf.mxu1  ;;  %5538 = vst [vmem:[#allocation66_spill] sm:$0xff] %v4329_v50 }
 0x104   :  { %577 = vmatpush.bf16.msrb.mxu0 %v4329_v50 }
 0x106   :  { %v3583_v45 = vpop.eup %3582 }
 0x107   :  { %v760_v42 = vadd.f32 1.0, %v3583_v45  ;;  %v3585_v18 = vpop.eup %3584 }
 0x108   :  { %v782_v4 = vmul.f32 %v3585_v18, %v780_v24  ;;  %vm787_vm5 = vweird.f32 %v3585_v18  ;;  %578 = vmatpush.bf16.msrb.mxu0 %v4335_v58 }
 0x109   :  { %3586 = vrcp.f32 %v760_v42  ;;  %v772_v0 = vand.u32 2147483648, %v760_v42  ;;  %v770_v45 = vand.u32 2147483647, %v760_v42  ;;  %vm766_vm2 = vweird.f32 %v760_v42  ;;  %vm788_vm7 = vmor %vm786_vm6, %vm787_vm5 }
 0x10a   :  { %v783_v49 = vsub.f32 1.0, %v782_v4  ;;  %v3331_v4 = vld [vmem:[#allocation9 + $0xb0] sm:$0xf] }
 0x10b   :  { %v773_v36 = vor.u32 1.1754944e-38, %v772_v0  ;;  %vm771_vm4 = vcmp.eq.f32.partialorder %v770_v45, 8.507059e+37  ;;  %v790_v0 = vand.u32 2147483647, %v780_v24 }
 0x10c   :  { %v752_v33 = vpop.f32.mrf.mxu3  ;;  %v784_v27 = vmul.f32 %v3585_v18, %v783_v49 }
 0x10d   :  { %v796_v14 = vadd.f32 %v4324_v13, %v752_v33  ;;  %v792_v33 = vand.u32 2147483648, %v780_v24  ;;  %vm791_vm8 = vcmp.eq.f32.partialorder %v790_v0, 8.507059e+37  ;;  %v3065_v0 = vld [vmem:[#allocation10 + $0x20] sm:$0xf]  ;;  %v3494_v13 = vld [vmem:[#allocation9 + $0x40] sm:$0xf0] }
 0x10e   :  { %v785_v49 = vadd.f32 %v3585_v18, %v784_v27  ;;  %v3521_v27 = vld [vmem:[#allocation10 + $0x58] sm:$0xf0] }
 0x10f   :  { %v3587_v8 = vpop.eup %3586  ;;  %v793_v45 = vor.u32 1.1754944e-38, %v792_v33  ;;  %v3506_v33 = vld [vmem:[#allocation9 + $0xa0] sm:$0xf0] }
 0x110   :  { %v762_v6 = vmul.f32 %v3587_v8, %v760_v42  ;;  %vm767_vm1 = vweird.f32 %v3587_v8  ;;  %v289_v42 = vadd.f32 %v4267_v59, %v4280_v5  ;;  %v789_v38 = vsel %vm788_vm7, %v3585_v18, %v785_v49  ;;  %v3077_v49 = vld [vmem:[#allocation10 + $0x38] sm:$0xf] }
 0x111   :  { %vm768_vm3 = vmor %vm766_vm2, %vm767_vm1  ;;  %v5547_v5 = vmov 0  }
 0x112   :  { %v763_v21 = vsub.f32 1.0, %v762_v6 }
 0x114   :  { %v754_v39 = vpop.f32.mrf.mxu3  ;;  %v764_v63 = vmul.f32 %v3587_v8, %v763_v21 }
 0x115   :  { %v3509_v39 = vld [vmem:[#allocation9 + $0xb8] sm:$0xf0] }
 0x116   :  { %v765_v3 = vadd.f32 %v3587_v8, %v764_v63  ;;  %v4332_v6 = vor.u32 %v3509_v39, %v3331_v4  ;;  %v3524_v63 = vld [vmem:[#allocation10 + $0x70] sm:$0xf0]  ;;  %v794_v39 = vsel %vm791_vm8, %v793_v45, %v789_v38  ;;  %v3307_v38 = vld [vmem:[#allocation9 + $0x80] sm:$0xf] }
 0x117   :  { %v4341_v15 = vor.u32 %v3524_v63, %v3101_v30  ;;  %v3518_v30 = vld [vmem:[#allocation10 + $0x40] sm:$0xf0]  ;;  %v3319_v63 = vld [vmem:[#allocation9 + $0x98] sm:$0xf] }
 0x118   :  { %v769_v21 = vsel %vm768_vm3, %v3587_v8, %v765_v3  ;;  %989 = vmatpush.bf16.msra.mxu2 %v4332_v6  ;;  %v3089_v8 = vld [vmem:[#allocation10 + $0x50] sm:$0xf] }
 0x119   :  { %v774_v7 = vsel %vm771_vm4, %v773_v36, %v769_v21  ;;  %5540 = vst [vmem:[#allocation68_spill] sm:$0xff] %v4341_v15  ;;  %579 = vmatpush.bf16.msrb.mxu0 %v4341_v15  ;;  %v4344_v59 = vor.u32 %v3521_v27, %v3089_v8  ;;  %v802_v21 = vmul.f32 0.0, %v794_v39  ;;  %v3503_v27 = vld [vmem:[#allocation9 + $0x88] sm:$0xf0] }
 0x11a   :  { %v797_v4 = vmul.f32 %v796_v14, %v774_v7  ;;  %v800_v14 = vsub.f32 1.0, %v794_v39  ;;  %v4360_v45 = vor.u32 %v3503_v27, %v3307_v38  ;;  %v3053_v39 = vld [vmem:[#allocation10 + $0x8] sm:$0xf]  ;;  %v3283_v38 = vld [vmem:[#allocation9 + $0x50] sm:$0xf] }
 0x11b   :  { %5541 = vst [vmem:[#allocation69_spill] sm:$0xff] %v4344_v59  ;;  %v3497_v27 = vld [vmem:[#allocation9 + $0x58] sm:$0xf0] }
 0x11c   :  { %v798_v3 = vadd.f32 %v797_v4, %v289_v42  ;;  %v4352_v42 = vor.u32 %v3518_v30, %v3077_v49  ;;  %v4354_v4 = vor.u32 %v3506_v33, %v3319_v63  ;;  %v3508_v49 = vld [vmem:[#allocation9 + $0xb0] sm:$0xf0]  ;;  %v3507_v33 = vld [vmem:[#allocation9 + $0xac] sm:$0xf] }
 0x11d   :  { %580 = vmatpush.bf16.msrb.mxu0 %v4344_v59 }
 0x11e   :  { %3588 = vtanh.f32 %v798_v3  ;;  %5542 = vst [vmem:[#allocation70_spill] sm:$0xff] %v4352_v42  ;;  %990 = vmatpush.bf16.msra.mxu2 %v4354_v4  ;;  %v3515_v3 = vld [vmem:[#allocation10 + $0x28] sm:$0xf0] }
 0x11f   :  { %v4358_v8 = vor.u32 %v3515_v3, %v3065_v0  ;;  %v3325_v0 = vld [vmem:[#allocation9 + $0xb4] sm:$0xf0] }
 0x120   :  { %v4371_v3 = vor.u32 %v3507_v33, %v3325_v0  ;;  %v3271_v0 = vld [vmem:[#allocation9 + $0x38] sm:$0xf] }
 0x121   :  { %581 = vmatpush.bf16.msrb.mxu0 %v4352_v42  ;;  %5543 = vst [vmem:[#allocation71_spill] sm:$0xff] %v4358_v8 }
 0x122   :  { %991 = vmatpush.bf16.msra.mxu2 %v4360_v45  ;;  %976 = vmatpush.bf16.msrb.mxu1 %v4371_v3 }
 0x124   :  { %v3589_v36 = vpop.eup %3588 }
 0x125   :  { %v801_v24 = vmul.f32 %v3589_v36, %v800_v14  ;;  %582 = vmatpush.bf16.msrb.mxu0 %v4358_v8  ;;  %v3512_v14 = vld [vmem:[#allocation10 + $0x10] sm:$0xf0]  ;;  %v3295_v36 = vld [vmem:[#allocation9 + $0x68] sm:$0xf] }
 0x127   :  { %v4347_v7 = vadd.f32 %v802_v21, %v801_v24  ;;  %v4364_v24 = vor.u32 %v3512_v14, %v3053_v39  ;;  %v3500_v21 = vld [vmem:[#allocation9 + $0x70] sm:$0xf0]  ;;  %v4376_v39 = vor.u32 %v3497_v27, %v3283_v38  ;;  %v3311_v14 = vld [vmem:[#allocation9 + $0x90] sm:$0xf]  ;;  %v4386_v38 = vor.u32 %v3494_v13, %v3271_v0  ;;  %v3299_v27 = vld [vmem:[#allocation9 + $0x78] sm:$0xf] }
 0x128   :  { %v4366_v30 = vor.u32 %v3500_v21, %v3295_v36  ;;  %v3505_v36 = vld [vmem:[#allocation9 + $0x98] sm:$0xf0]  ;;  %v3504_v21 = vld [vmem:[#allocation9 + $0x94] sm:$0xf]  ;;  %v3287_v13 = vld [vmem:[#allocation9 + $0x60] sm:$0xf] }
 0x129   :  { %804 = vadd.xlane.f32.xlu0 %v4347_v7  ;;  %v806_v18 = vmul.f32 %v4347_v7, %v4347_v7  ;;  %5544 = vst [vmem:[#allocation72_spill] sm:$0xff] %v4364_v24  ;;  %583 = vmatpush.bf16.msrb.mxu0 %v4364_v24  ;;  %v3499_v0 = vld [vmem:[#allocation9 + $0x68] sm:$0xf0] }
 0x12a   :  { %5545 = vst [vmem:[#allocation73_spill] sm:$0xff] %v4366_v30  ;;  %992 = vmatpush.bf16.msra.mxu2 %v4366_v30  ;;  %v4397_v9 = vor.u32 %v3499_v0, %v3287_v13  ;;  %v3277_v13 = vld [vmem:[#allocation9 + $0x54] sm:$0xf0]  ;;  %v3241_v30 = vld [vmem:[#allocation9 + $0xc] sm:$0xf0] }
 0x12b   :  { %5546 = vst [vmem:[#allocation74_spill] sm:$0xff] %v4376_v39 }
 0x12c   :  { %584 = vmatmul.bf16.vlgmr.msrb.gmra.mxu0 %v5547_v5  ;;  %5548 = vst [vmem:[#allocation75_spill] sm:$0xff] %v4386_v38  ;;  %v3259_v5 = vld [vmem:[#allocation9 + $0x20] sm:$0xf] }
 0x12e   :  { %993 = vmatpush.bf16.msra.mxu2 %v4376_v39 }
 0x131   :  { %807 = vadd.xlane.f32.xlu0 %v806_v18  ;;  %v3323_v18 = vld [vmem:[#allocation9 + $0xa8] sm:$0xf] }
 0x132   :  { %v4368_v63 = vor.u32 %v3508_v49, %v3323_v18  ;;  %v4378_v18 = vor.u32 %v3505_v36, %v3311_v14  ;;  %v3313_v49 = vld [vmem:[#allocation9 + $0x9c] sm:$0xf0]  ;;  %v4388_v14 = vor.u32 %v3502_v46, %v3299_v27  ;;  %v3301_v36 = vld [vmem:[#allocation9 + $0x84] sm:$0xf0]  ;;  %994 = vmatpush.bf16.msra.mxu2 %v4386_v38  ;;  %v3289_v46 = vld [vmem:[#allocation9 + $0x6c] sm:$0xf0] }
 0x133   :  { %v4381_v33 = vor.u32 %v3504_v21, %v3313_v49  ;;  %v4390_v28 = vor.u32 %v3501_v37, %v3301_v36  ;;  %v3491_v21 = vld [vmem:[#allocation9 + $0x28] sm:$0xf0]  ;;  %v4399_v27 = vor.u32 %v3498_v19, %v3289_v46  ;;  %v3247_v37 = vld [vmem:[#allocation9 + $0x8] sm:$0xf]  ;;  %v3488_v36 = vld [vmem:[#allocation9 + $0x10] sm:$0xf0] }
 0x134   :  { %963 = vmatpush.bf16.msra.mxu0 %v4368_v63  ;;  %v4395_v49 = vor.u32 %v3491_v21, %v3259_v5  ;;  %v4404_v61 = vor.u32 %v3488_v36, %v3247_v37  ;;  %v3275_v5 = vld [vmem:[#allocation9 + $0x48] sm:$0xf]  ;;  %v3496_v21 = vld [vmem:[#allocation9 + $0x50] sm:$0xf0]  ;;  %v3495_v38 = vld [vmem:[#allocation9 + $0x4c] sm:$0xf] }
 0x135   :  { %977 = vmatpush.bf16.msrb.mxu1 %v4381_v33  ;;  %v4406_v56 = vor.u32 %v3496_v21, %v3275_v5  ;;  %v4408_v0 = vor.u32 %v3495_v38, %v3277_v13  ;;  %v3263_v19 = vld [vmem:[#allocation9 + $0x30] sm:$0xf]  ;;  %v3493_v46 = vld [vmem:[#allocation9 + $0x38] sm:$0xf0]  ;;  %v3492_v37 = vld [vmem:[#allocation9 + $0x34] sm:$0xf] }
 0x136   :  { %5549 = vst [vmem:[#allocation76_spill] sm:$0xff] %v4395_v49  ;;  %995 = vmatpush.bf16.msra.mxu2 %v4395_v49  ;;  %v4414_v36 = vor.u32 %v3493_v46, %v3263_v19  ;;  %v3265_v49 = vld [vmem:[#allocation9 + $0x3c] sm:$0xf0]  ;;  %v3251_v38 = vld [vmem:[#allocation9 + $0x18] sm:$0xf] }
 0x137   :  { %5550 = vst [vmem:[#allocation77_spill] sm:$0xff] %v4404_v61  ;;  %v4416_v39 = vor.u32 %v3492_v37, %v3265_v49  ;;  %v3490_v5 = vld [vmem:[#allocation9 + $0x20] sm:$0xf0]  ;;  %v3489_v21 = vld [vmem:[#allocation9 + $0x1c] sm:$0xf] }
 0x138   :  { %964 = vmatpush.bf16.msra.mxu0 %v4378_v18  ;;  %5551 = vst [vmem:[#allocation78_spill] sm:$0xff] %v4414_v36  ;;  %v3239_v19 = vld [vmem:[#allocation9] sm:$0xf]  ;;  %v3487_v46 = vld [vmem:[#allocation9 + $0x8] sm:$0xf0] }
 0x139   :  { %978 = vmatpush.bf16.msrb.mxu1 %v4390_v28  ;;  %5552 = vst [vmem:[#allocation79_spill] sm:$0xff] %v4416_v39  ;;  %v4426_v49 = vor.u32 %v3487_v46, %v3239_v19  ;;  %v3486_v37 = vld [vmem:[#allocation9 + $0x4] sm:$0xf] }
 0x13a   :  { %996 = vmatpush.bf16.msra.mxu2 %v4404_v61  ;;  %v4421_v61 = vor.u32 %v3490_v5, %v3251_v38 }
 0x13b   :  { %5555 = vst [vmem:[#allocation82_spill] sm:$0xff] %v4426_v49 }
 0x13c   :  { %965 = vmatpush.bf16.msra.mxu0 %v4388_v14  ;;  %5553 = vst [vmem:[#allocation80_spill] sm:$0xff] %v4421_v61 }
 0x13d   :  { %979 = vmatpush.bf16.msrb.mxu1 %v4399_v27 }
 0x13e   :  { %1091 = vmatpush.bf16.msrb.mxu2 %v4109_v25  ;;  %v3253_v25 = vld [vmem:[#allocation9 + $0x24] sm:$0xf0] }
 0x13f   :  { %v4423_v41 = vor.u32 %v3489_v21, %v3253_v25 }
 0x140   :  { %966 = vmatpush.bf16.msra.mxu0 %v4397_v9 }
 0x141   :  { %980 = vmatpush.bf16.msrb.mxu1 %v4408_v0  ;;  %5554 = vst [vmem:[#allocation81_spill] sm:$0xff] %v4423_v41 }
 0x142   :  { %1092 = vmatpush.bf16.msrb.mxu2 %v4119_v32  ;;  %v4430_v32 = vor.u32 %v3486_v37, %v3241_v30 }
 0x144   :  { %967 = vmatpush.bf16.msra.mxu0 %v4406_v56  ;;  %5556 = vst [vmem:[#allocation83_spill] sm:$0xff] %v4430_v32 }
 0x145   :  { %981 = vmatpush.bf16.msrb.mxu1 %v4416_v39 }
 0x146   :  { %1093 = vmatpush.bf16.msrb.mxu2 %v4124_v40 }
 0x148   :  { %968 = vmatpush.bf16.msra.mxu0 %v4414_v36 }
 0x149   :  { %982 = vmatpush.bf16.msrb.mxu1 %v4423_v41 }
 0x14a   :  { %1094 = vmatpush.bf16.msrb.mxu2 %v4139_v53 }
 0x14c   :  { %969 = vmatpush.bf16.msra.mxu0 %v4421_v61 }
 0x14d   :  { %983 = vmatpush.bf16.msrb.mxu1 %v4430_v32 }
 0x14e   :  { %1095 = vmatpush.bf16.msrb.mxu2 %v4155_v2 }
 0x150   :  { %970 = vmatpush.bf16.msra.mxu0 %v4426_v49 }
 0x151   :  { %1077 = vmatpush.bf16.msra.mxu1 %v4326_v60 }
 0x152   :  { %1096 = vmatpush.bf16.msrb.mxu2 %v4163_v10 }
 0x154   :  { %1064 = vmatpush.bf16.msrb.mxu0 %v4175_v22 }
 0x155   :  { %1078 = vmatpush.bf16.msra.mxu1 %v4329_v50 }
 0x156   :  { %1097 = vmatpush.bf16.msrb.mxu2 %v4196_v47 }
 0x158   :  { %1065 = vmatpush.bf16.msrb.mxu0 %v4185_v34 }
 0x159   :  { %1079 = vmatpush.bf16.msra.mxu1 %v4335_v58 }
 0x15a   :  { %1098 = vmatpush.bf16.msrb.mxu2 %v4201_v51 }
 0x15c   :  { %1066 = vmatpush.bf16.msrb.mxu0 %v4194_v44 }
 0x15d   :  { %1080 = vmatpush.bf16.msra.mxu1 %v4341_v15 }
 0x160   :  { %1067 = vmatpush.bf16.msrb.mxu0 %v4204_v52 }
 0x161   :  { %1081 = vmatpush.bf16.msra.mxu1 %v4344_v59 }
 0x164   :  { %1068 = vmatpush.bf16.msrb.mxu0 %v4208_v57 }
 0x165   :  { %1082 = vmatpush.bf16.msra.mxu1 %v4352_v42 }
 0x168   :  { %1069 = vmatpush.bf16.msrb.mxu0 %v4211_v62 }
 0x169   :  { %1083 = vmatpush.bf16.msra.mxu1 %v4358_v8 }
 0x16c   :  { %1070 = vmatpush.bf16.msrb.mxu0 %v4217_v1 }
 0x16d   :  { %1084 = vmatpush.bf16.msra.mxu1 %v4364_v24 }
 0x170   :  { %1071 = vmatpush.bf16.msrb.mxu0 %v4220_v11 }
 0x19c   :  { %v805_v13 = vpop.xlane.xlu0 %804 }
 0x19d   :  { %v809_v31 = vmul.f32 0.03125, %v805_v13 }
 0x19f   :  { %v811_v38 = vmul.f32 %v809_v31, %v809_v31 }
 0x1a4   :  { %v808_v25 = vpop.xlane.xlu0 %807 }
 0x1a5   :  { %v810_v5 = vmul.f32 0.03125, %v808_v25 }
 0x1a7   :  { %v812_v21 = vsub.f32 %v810_v5, %v811_v38  ;;  %v813_v5 = vsub.f32 %v4347_v7, %v809_v31 }
 0x1a9   :  { %v814_v30 = vadd.f32 1e-05, %v812_v21  ;;  %v4455_v21 = vld [vmem:[%s5351_s5] ss:$0 sm:$0xff] }
 0x1ab   :  { %3590 = vrsqrt.f32 %v814_v30  ;;  %vm821_vm10 = vweird.f32 %v814_v30 }
 0x1b1   :  { %v3591_v13 = vpop.eup %3590 }
 0x1b2   :  { %v816_v19 = vmul.f32 %v3591_v13, %v814_v30  ;;  %vm822_vm9 = vweird.f32 %v3591_v13 }
 0x1b3   :  { %vm823_vm11 = vmor %vm821_vm10, %vm822_vm9 }
 0x1b4   :  { %v817_v46 = vmul.f32 %v3591_v13, %v816_v19 }
 0x1b6   :  { %v818_v37 = vmul.f32 0.5, %v817_v46 }
 0x1b8   :  { %v819_v25 = vsub.f32 1.5, %v818_v37  ;;  %v4459_v37 = vld [vmem:[#allocation7] ss:$0 sm:$0xff] }
 0x1ba   :  { %v820_v38 = vmul.f32 %v3591_v13, %v819_v25 }
 0x1bc   :  { %v824_v19 = vsel %vm823_vm11, %v3591_v13, %v820_v38  ;;  %v4481_v13 = vpop.f32.mrf.mxu0 }
 0x1bd   :  { %v825_v46 = vmul.f32 %v824_v19, %v813_v5 }
 0x1bf   :  { %v829_v51 = vmul.f32 %v4455_v21, %v825_v46 }
 0x1c1   :  { %v833_v31 = vadd.f32 %v4459_v37, %v829_v51  ;;  %v4479_v51 = vpack.c.bf16 %v4347_v7, %v4347_v7 }
 0x1c3   :  { %v834_v30 = vpack.c.bf16 %v833_v31, %v833_v31 }
 0x1c4   :  { %v4490_v25 = vpop.f32.mrf.mxu0 }
 0x1c5   :  { %971 = vmatmul.bf16.vlgmr.msra.gmra.mxu0 %v834_v30  ;;  %984 = vmatmul.bf16.vlgmr.msrb.gmra.mxu1 %v834_v30  ;;  %5557 = vst [vmem:[#allocation84_spill] sm:$0xff] %v4490_v25 }
 0x1c6   :  { %997 = vmatmul.bf16.vlgmr.msra.gmra.mxu2 %v834_v30  ;;  %1117 = vmatpush.bf16.msra.mxu0 %v4222_v12  ;;  %v412_v30 = vld [vmem:[%s5355_s9] sm:$0x7] }
 0x1c7   :  { %1203 = vmatpush.bf16.msrb.mxu1 %v4368_v63  ;;  %1216 = vmatpush.bf16.msra.mxu2 %v4371_v3  ;;  %v4517_v25 = vperm.slane %v412_v30, 1 }
 0x1c9   :  { %5562 = vst [vmem:[#allocation89_spill] sm:$0xff] %v4517_v25 }
 0x1ca   :  { %1118 = vmatpush.bf16.msra.mxu0 %v4226_v16 }
 0x1cb   :  { %1204 = vmatpush.bf16.msrb.mxu1 %v4378_v18  ;;  %1217 = vmatpush.bf16.msra.mxu2 %v4381_v33 }
 0x1cc   :  { %v4499_v38 = vpop.f32.mrf.mxu0 }
 0x1cd   :  { %5558 = vst [vmem:[#allocation85_spill] sm:$0xff] %v4499_v38  ;;  %v4515_v38 = vperm.slane %v412_v30, 0 }
 0x1ce   :  { %1119 = vmatpush.bf16.msra.mxu0 %v4230_v23 }
 0x1cf   :  { %1205 = vmatpush.bf16.msrb.mxu1 %v4388_v14  ;;  %1218 = vmatpush.bf16.msra.mxu2 %v4390_v28  ;;  %5561 = vst [vmem:[#allocation88_spill] sm:$0xff] %v4515_v38 }
 0x1d2   :  { %1120 = vmatpush.bf16.msra.mxu0 %v4236_v29 }
 0x1d3   :  { %1206 = vmatpush.bf16.msrb.mxu1 %v4397_v9  ;;  %1219 = vmatpush.bf16.msra.mxu2 %v4399_v27 }
 0x1d4   :  { %v4504_v5 = vpop.f32.mrf.mxu0 }
 0x1d5   :  { %5559 = vst [vmem:[#allocation86_spill] sm:$0xff] %v4504_v5 }
 0x1d6   :  { %1099 = vmatmul.bf16.vlgmr.msrb.gmra.mxu2 %v4479_v51  ;;  %1121 = vmatpush.bf16.msra.mxu0 %v4239_v35 }
 0x1d7   :  { %1207 = vmatpush.bf16.msrb.mxu1 %v4406_v56  ;;  %1220 = vmatpush.bf16.msra.mxu2 %v4408_v0 }
 0x1da   :  { %1122 = vmatpush.bf16.msra.mxu0 %v4242_v43 }
 0x1db   :  { %1208 = vmatpush.bf16.msrb.mxu1 %v4414_v36  ;;  %1221 = vmatpush.bf16.msra.mxu2 %v4416_v39 }
 0x1dc   :  { %v4508_v19 = vpop.f32.mrf.mxu0 }
 0x1dd   :  { %5560 = vst [vmem:[#allocation87_spill] sm:$0xff] %v4508_v19 }
 0x1de   :  { %1123 = vmatpush.bf16.msra.mxu0 %v4245_v48 }
 0x1df   :  { %1209 = vmatpush.bf16.msrb.mxu1 %v4421_v61  ;;  %1222 = vmatpush.bf16.msra.mxu2 %v4423_v41 }
 0x1e2   :  { %1124 = vmatpush.bf16.msra.mxu0 %v4249_v54 }
 0x1e3   :  { %1210 = vmatpush.bf16.msrb.mxu1 %v4426_v49  ;;  %1223 = vmatpush.bf16.msra.mxu2 %v4430_v32 }
 0x1e4   :  { %v585_v46 = vpop.f32.mrf.mxu0 }
 0x1e7   :  { %1317 = vmatpush.bf16.msrb.mxu2 %v4326_v60 }
 0x1eb   :  { %1318 = vmatpush.bf16.msrb.mxu2 %v4329_v50 }
 0x1ec   :  { %v587_v31 = vpop.f32.mrf.mxu0 }
 0x1ef   :  { %1319 = vmatpush.bf16.msrb.mxu2 %v4335_v58 }
 0x1f3   :  { %1320 = vmatpush.bf16.msrb.mxu2 %v4341_v15 }
 0x1f7   :  { %1321 = vmatpush.bf16.msrb.mxu2 %v4344_v59 }
 0x1fb   :  { %1322 = vmatpush.bf16.msrb.mxu2 %v4352_v42 }
 0x1ff   :  { %1323 = vmatpush.bf16.msrb.mxu2 %v4358_v8 }
 0x203   :  { %1324 = vmatpush.bf16.msrb.mxu2 %v4364_v24 }
 0x242   :  { %v972_v5 = vpop.f32.mrf.mxu0  ;;  %v985_v59 = vpop.f32.mrf.mxu1 }
 0x243   :  { %v973_v42 = vadd.f32 %v972_v5, %v4515_v38  ;;  %v986_v19 = vadd.f32 %v985_v59, %v4517_v25 }
 0x245   :  { %v1002_v8 = vadd.f32 %v973_v42, %v4294_v26  ;;  %v1022_v24 = vadd.f32 %v986_v19, %v4316_v55 }
 0x247   :  { %v3333_v15 = vmul.f32 -1.442695, %v1002_v8  ;;  %v3334_v31 = vmul.f32 -1.442695, %v1022_v24  ;;  %v4530_v24 = vperm.slane %v412_v30, 2 }
 0x249   :  { %3592 = vpow2.f32 %v3333_v15  ;;  %v998_v58 = vpop.f32.mrf.mxu2 }
 0x24a   :  { %3594 = vpow2.f32 %v3334_v31  ;;  %v974_v50 = vpop.f32.mrf.mxu0  ;;  %v987_v60 = vpop.f32.mrf.mxu1 }
 0x24b   :  { %v4528_v50 = vld [vmem:[%s5356_s10] ss:$0 sm:$0xff] }
 0x24c   :  { %v1042_v31 = vadd.f32 %v4528_v50, %v585_v46 }
 0x24f   :  { %v3593_v32 = vpop.eup %3592 }
 0x250   :  { %v3595_v49 = vpop.eup %3594  ;;  %v1006_v54 = vadd.f32 1.0, %v3593_v32 }
 0x251   :  { %v1026_v41 = vadd.f32 1.0, %v3595_v49  ;;  %v1000_v61 = vpop.f32.mrf.mxu2 }
 0x252   :  { %3596 = vrcp.f32 %v1006_v54  ;;  %v1018_v15 = vand.u32 2147483648, %v1006_v54  ;;  %v1016_v32 = vand.u32 2147483647, %v1006_v54  ;;  %vm1012_vm13 = vweird.f32 %v1006_v54 }
 0x253   :  { %3598 = vrcp.f32 %v1026_v41  ;;  %v1038_v39 = vand.u32 2147483648, %v1026_v41  ;;  %vm1032_vm1 = vweird.f32 %v1026_v41 }
 0x254   :  { %v1019_v19 = vor.u32 1.1754944e-38, %v1018_v15  ;;  %vm1017_vm15 = vcmp.eq.f32.partialorder %v1016_v32, 8.507059e+37 }
 0x258   :  { %v3597_v5 = vpop.eup %3596 }
 0x259   :  { %v3599_v59 = vpop.eup %3598  ;;  %v1008_v25 = vmul.f32 %v3597_v5, %v1006_v54  ;;  %v4523_v26 = vpop.f32.mrf.mxu2  ;;  %vm1013_vm12 = vweird.f32 %v3597_v5  ;;  %v1039_v54 = vor.u32 1.1754944e-38, %v1038_v39  ;;  %v5566_v39 = vld [vmem:[#allocation74_spill] sm:$0xff] }
 0x25a   :  { %v1028_v55 = vmul.f32 %v3599_v59, %v1026_v41  ;;  %vm1014_vm14 = vmor %vm1012_vm13, %vm1013_vm12  ;;  %vm1033_vm0 = vweird.f32 %v3599_v59 }
 0x25b   :  { %v1009_v42 = vsub.f32 1.0, %v1008_v25  ;;  %vm1034_vm2 = vmor %vm1032_vm1, %vm1033_vm0 }
 0x25c   :  { %v1029_v8 = vsub.f32 1.0, %v1028_v55 }
 0x25d   :  { %v1010_v60 = vmul.f32 %v3597_v5, %v1009_v42  ;;  %v999_v42 = vadd.f32 %v998_v58, %v4530_v24  ;;  %v5564_v58 = vld [vmem:[#allocation73_spill] sm:$0xff] }
 0x25e   :  { %v1030_v61 = vmul.f32 %v3599_v59, %v1029_v8  ;;  %v1036_v8 = vand.u32 2147483647, %v1026_v41  ;;  %v5563_v41 = vld [vmem:[#allocation19_spill] sm:$0xff] }
 0x25f   :  { %v1011_v49 = vadd.f32 %v3597_v5, %v1010_v60 }
 0x260   :  { %v1031_v48 = vadd.f32 %v3599_v59, %v1030_v61  ;;  %vm1037_vm3 = vcmp.eq.f32.partialorder %v1036_v8, 8.507059e+37  ;;  %v5575_v8 = vld [vmem:[#allocation18_spill] sm:$0xff] }
 0x261   :  { %v1015_v25 = vsel %vm1014_vm14, %v3597_v5, %v1011_v49  ;;  %v1102_v55 = vpop.f32.mrf.mxu2 }
 0x262   :  { %v1020_v38 = vsel %vm1017_vm15, %v1019_v19, %v1015_v25  ;;  %v1035_v60 = vsel %vm1034_vm2, %v3599_v59, %v1031_v48  ;;  %v5565_v48 = vld [vmem:[#allocation23_spill] sm:$0xff]  ;;  %v5569_v59 = vld [vmem:[#allocation28_spill] sm:$0xff]  ;;  %v5572_v55 = vld [vmem:[#allocation77_spill] sm:$0xff] }
 0x263   :  { %v1043_v36 = vmul.f32 %v1042_v31, %v1020_v38  ;;  %v1040_v15 = vsel %vm1037_vm3, %v1039_v54, %v1035_v60  ;;  %v5568_v38 = vld [vmem:[#allocation75_spill] sm:$0xff]  ;;  %v5570_v31 = vld [vmem:[#allocation76_spill] sm:$0xff]  ;;  %v5577_v60 = vld [vmem:[#allocation21_spill] sm:$0xff] }
 0x264   :  { %v1046_v46 = vsub.f32 1.0, %v1040_v15  ;;  %v1048_v49 = vmul.f32 0.0, %v1040_v15  ;;  %v5571_v25 = vld [vmem:[#allocation31_spill] sm:$0xff]  ;;  %v5578_v54 = vld [vmem:[#allocation24_spill] sm:$0xff] }
 0x265   :  { %v1044_v30 = vadd.f32 %v1043_v36, %v999_v42  ;;  %v5567_v36 = vld [vmem:[#allocation26_spill] sm:$0xff]  ;;  %v5579_v15 = vld [vmem:[#allocation27_spill] sm:$0xff] }
 0x266   :  { %v5574_v42 = vld [vmem:[#allocation34_spill] sm:$0xff] }
 0x267   :  { %3600 = vtanh.f32 %v1044_v30  ;;  %v5576_v30 = vld [vmem:[#allocation20_spill] sm:$0xff] }
 0x26d   :  { %v3601_v5 = vpop.eup %3600 }
 0x26e   :  { %v1047_v32 = vmul.f32 %v3601_v5, %v1046_v46  ;;  %v5580_v46 = vld [vmem:[#allocation30_spill] sm:$0xff]  ;;  %v5581_v5 = vld [vmem:[#allocation33_spill] sm:$0xff] }
 0x270   :  { %v4534_v19 = vadd.f32 %v1048_v49, %v1047_v32  ;;  %v5582_v32 = vld [vmem:[#allocation35_spill] sm:$0xff]  ;;  %v5583_v49 = vld [vmem:[#allocation38_spill] sm:$0xff] }
 0x272   :  { %v1050_v61 = vpack.c.bf16 %v4534_v19, %v4534_v19 }
 0x274   :  { %1059 = vmatmul.bf16.vlgmr.msrb.gmra.mxu3 %v1050_v61  ;;  %1072 = vmatmul.bf16.vlgmr.msrb.gmra.mxu0 %v1050_v61 }
 0x275   :  { %1085 = vmatmul.bf16.vlgmr.msra.gmra.mxu1 %v1050_v61  ;;  %1229 = vmatpush.bf16.msrb.mxu3 %v4332_v6  ;;  %v5584_v61 = vld [vmem:[#allocation36_spill] sm:$0xff] }
 0x276   :  { %1291 = vmatpush.bf16.msrb.mxu0 %v4101_v17  ;;  %1304 = vmatpush.bf16.msra.mxu1 %v4175_v22 }
 0x279   :  { %1230 = vmatpush.bf16.msrb.mxu3 %v4354_v4 }
 0x27a   :  { %1292 = vmatpush.bf16.msrb.mxu0 %v4106_v20  ;;  %1305 = vmatpush.bf16.msra.mxu1 %v4185_v34 }
 0x27d   :  { %1231 = vmatpush.bf16.msrb.mxu3 %v4360_v45 }
 0x27e   :  { %1293 = vmatpush.bf16.msrb.mxu0 %v5563_v41  ;;  %1306 = vmatpush.bf16.msra.mxu1 %v4194_v44 }
 0x281   :  { %1232 = vmatpush.bf16.msrb.mxu3 %v5564_v58 }
 0x282   :  { %1294 = vmatpush.bf16.msrb.mxu0 %v5565_v48  ;;  %1307 = vmatpush.bf16.msra.mxu1 %v4204_v52 }
 0x284   :  { %1112 = vmatmul.bf16.vlgmr.msra.gmra.mxu3 %v4479_v51  ;;  %1125 = vmatmul.bf16.vlgmr.msra.gmra.mxu0 %v4479_v51  ;;  %v5573_v51 = vld [vmem:[#allocation17_spill] sm:$0xff] }
 0x285   :  { %1233 = vmatpush.bf16.msrb.mxu3 %v5566_v39 }
 0x286   :  { %1295 = vmatpush.bf16.msrb.mxu0 %v5567_v36  ;;  %1308 = vmatpush.bf16.msra.mxu1 %v4208_v57 }
 0x289   :  { %1234 = vmatpush.bf16.msrb.mxu3 %v5568_v38 }
 0x28a   :  { %1296 = vmatpush.bf16.msrb.mxu0 %v5569_v59  ;;  %1309 = vmatpush.bf16.msra.mxu1 %v4211_v62 }
 0x28d   :  { %1235 = vmatpush.bf16.msrb.mxu3 %v5570_v31 }
 0x28e   :  { %1297 = vmatpush.bf16.msrb.mxu0 %v5571_v25  ;;  %1310 = vmatpush.bf16.msra.mxu1 %v4217_v1  ;;  %v5588_v1 = vld [vmem:[#allocation47_spill] sm:$0xff] }
 0x291   :  { %1236 = vmatpush.bf16.msrb.mxu3 %v5572_v55 }
 0x292   :  { %1298 = vmatpush.bf16.msrb.mxu0 %v5574_v42  ;;  %1311 = vmatpush.bf16.msra.mxu1 %v4220_v11  ;;  %v5586_v42 = vld [vmem:[#allocation64_spill] sm:$0xff] }
 0x295   :  { %1331 = vmatpush.bf16.msra.mxu3 %v5573_v51 }
 0x296   :  { %1344 = vmatpush.bf16.msra.mxu0 %v5575_v8 }
 0x299   :  { %1332 = vmatpush.bf16.msra.mxu3 %v5576_v30 }
 0x29a   :  { %1345 = vmatpush.bf16.msra.mxu0 %v5577_v60 }
 0x29d   :  { %1333 = vmatpush.bf16.msra.mxu3 %v4124_v40 }
 0x29e   :  { %1346 = vmatpush.bf16.msra.mxu0 %v5578_v54  ;;  %v5585_v54 = vld [vmem:[#allocation63_spill] sm:$0xff] }
 0x2a1   :  { %1334 = vmatpush.bf16.msra.mxu3 %v4139_v53  ;;  %v233_v53 = vadd.f32 %v4481_v13, %v5585_v54 }
 0x2a2   :  { %1347 = vmatpush.bf16.msra.mxu0 %v5579_v15 }
 0x2a3   :  { %v1130_v15 = vadd.f32 %v4523_v26, %v233_v53 }
 0x2a5   :  { %1335 = vmatpush.bf16.msra.mxu3 %v4155_v2  ;;  %v3335_v2 = vmul.f32 -1.442695, %v1130_v15 }
 0x2a6   :  { %1348 = vmatpush.bf16.msra.mxu0 %v5580_v46 }
 0x2a7   :  { %3602 = vpow2.f32 %v3335_v2 }
 0x2a9   :  { %1336 = vmatpush.bf16.msra.mxu3 %v4163_v10 }
 0x2aa   :  { %1349 = vmatpush.bf16.msra.mxu0 %v5581_v5 }
 0x2ad   :  { %1337 = vmatpush.bf16.msra.mxu3 %v4196_v47  ;;  %v3603_v46 = vpop.eup %3602 }
 0x2ae   :  { %1350 = vmatpush.bf16.msra.mxu0 %v5582_v32  ;;  %v1134_v40 = vadd.f32 1.0, %v3603_v46 }
 0x2b0   :  { %3604 = vrcp.f32 %v1134_v40  ;;  %v1146_v53 = vand.u32 2147483648, %v1134_v40  ;;  %vm1140_vm5 = vweird.f32 %v1134_v40  ;;  %v1144_v2 = vand.u32 2147483647, %v1134_v40 }
 0x2b1   :  { %1338 = vmatpush.bf16.msra.mxu3 %v5583_v49 }
 0x2b2   :  { %1351 = vmatpush.bf16.msra.mxu0 %v5584_v61  ;;  %v1147_v11 = vor.u32 1.1754944e-38, %v1146_v53  ;;  %vm1145_vm7 = vcmp.eq.f32.partialorder %v1144_v2, 8.507059e+37 }
 0x2b6   :  { %v3605_v10 = vpop.eup %3604 }
 0x2b7   :  { %v1136_v5 = vmul.f32 %v3605_v10, %v1134_v40  ;;  %vm1141_vm4 = vweird.f32 %v3605_v10 }
 0x2b8   :  { %vm1142_vm6 = vmor %vm1140_vm5, %vm1141_vm4 }
 0x2b9   :  { %v1137_v32 = vsub.f32 1.0, %v1136_v5  ;;  %v5587_v5 = vld [vmem:[#allocation48_spill] sm:$0xff] }
 0x2ba   :  { %v291_v25 = vadd.f32 %v5588_v1, %v5587_v5 }
 0x2bb   :  { %v1138_v61 = vmul.f32 %v3605_v10, %v1137_v32 }
 0x2bd   :  { %v1139_v13 = vadd.f32 %v3605_v10, %v1138_v61 }
 0x2bf   :  { %v1143_v15 = vsel %vm1142_vm6, %v3605_v10, %v1139_v13 }
 0x2c0   :  { %v1148_v55 = vsel %vm1145_vm7, %v1147_v11, %v1143_v15 }
 0x2f1   :  { %v4583_v60 = vpop.f32.mrf.mxu0 }
 0x2f2   :  { %v4585_v47 = vpop.f32.mrf.mxu1 }
 0x2f7   :  { %v4587_v49 = vpop.f32.mrf.mxu3 }
 0x2f9   :  { %v1075_v30 = vpop.f32.mrf.mxu0 }
 0x2fa   :  { %v1088_v8 = vpop.f32.mrf.mxu1  ;;  %v5589_v30 = vld [vmem:[#allocation51_spill] sm:$0xff] }
 0x2fb   :  { %v5590_v8 = vld [vmem:[#allocation50_spill] sm:$0xff] }
 0x2fc   :  { %v262_v61 = vadd.f32 %v5590_v8, %v5589_v30 }
 0x2ff   :  { %v1062_v26 = vpop.f32.mrf.mxu3 }
 0x301   :  { %v1126_v46 = vpop.f32.mrf.mxu0 }
 0x302   :  { %v1170_v51 = vadd.f32 %v5586_v42, %v1126_v46 }
 0x304   :  { %v1171_v32 = vmul.f32 %v1170_v51, %v1148_v55 }
 0x306   :  { %v1172_v31 = vadd.f32 %v1171_v32, %v291_v25 }
 0x307   :  { %v1113_v62 = vpop.f32.mrf.mxu3 }
 0x308   :  { %v1150_v59 = vadd.f32 %v1113_v62, %v262_v61 }
 0x309   :  { %v1128_v40 = vpop.f32.mrf.mxu0 }
 0x30a   :  { %v3336_v26 = vmul.f32 -1.442695, %v1150_v59 }
 0x30c   :  { %3606 = vpow2.f32 %v3336_v26 }
 0x30f   :  { %v1115_v10 = vpop.f32.mrf.mxu3 }
 0x312   :  { %v3607_v13 = vpop.eup %3606 }
 0x313   :  { %v1154_v53 = vadd.f32 1.0, %v3607_v13 }
 0x315   :  { %3608 = vrcp.f32 %v1154_v53  ;;  %v1166_v15 = vand.u32 2147483648, %v1154_v53  ;;  %v1164_v1 = vand.u32 2147483647, %v1154_v53  ;;  %vm1160_vm9 = vweird.f32 %v1154_v53 }
 0x316   :  { %3610 = vtanh.f32 %v1172_v31 }
 0x317   :  { %v1167_v25 = vor.u32 1.1754944e-38, %v1166_v15  ;;  %vm1165_vm11 = vcmp.eq.f32.partialorder %v1164_v1, 8.507059e+37 }
 0x31b   :  { %v3609_v2 = vpop.eup %3608 }
 0x31c   :  { %v1156_v42 = vmul.f32 %v3609_v2, %v1154_v53  ;;  %vm1161_vm8 = vweird.f32 %v3609_v2  ;;  %v3611_v32 = vpop.eup %3610 }
 0x31d   :  { %vm1162_vm10 = vmor %vm1160_vm9, %vm1161_vm8 }
 0x31e   :  { %v1157_v11 = vsub.f32 1.0, %v1156_v42 }
 0x320   :  { %v1158_v46 = vmul.f32 %v3609_v2, %v1157_v11 }
 0x322   :  { %v1159_v55 = vadd.f32 %v3609_v2, %v1158_v46 }
 0x324   :  { %v1163_v62 = vsel %vm1162_vm10, %v3609_v2, %v1159_v55 }
 0x325   :  { %v1168_v59 = vsel %vm1165_vm11, %v1167_v25, %v1163_v62 }
 0x326   :  { %v1174_v51 = vsub.f32 1.0, %v1168_v59  ;;  %v1176_v61 = vmul.f32 %v1168_v59, %v4347_v7 }
 0x328   :  { %v1175_v8 = vmul.f32 %v3611_v32, %v1174_v51 }
 0x32a   :  { %v4595_v40 = vadd.f32 %v1176_v61, %v1175_v8 }
 0x32c   :  { %1178 = vadd.xlane.f32.xlu1 %v4595_v40  ;;  %v1180_v26 = vmul.f32 %v4595_v40, %v4595_v40 }
 0x334   :  { %1181 = vadd.xlane.f32.xlu1 %v1180_v26  ;;  %v4617_v26 = vpack.c.bf16 %v4595_v40, %v4595_v40 }
 0x39f   :  { %v1179_v31 = vpop.xlane.xlu1 %1178 }
 0x3a0   :  { %v1183_v10 = vmul.f32 0.03125, %v1179_v31  ;;  %v5591_v31 = vld [vmem:[#allocation78_spill] sm:$0xff] }
 0x3a2   :  { %v1185_v53 = vmul.f32 %v1183_v10, %v1183_v10  ;;  %v1187_v62 = vsub.f32 %v4595_v40, %v1183_v10  ;;  %v5592_v10 = vld [vmem:[#allocation79_spill] sm:$0xff] }
 0x3a7   :  { %v1182_v13 = vpop.xlane.xlu1 %1181 }
 0x3a8   :  { %v1184_v42 = vmul.f32 0.03125, %v1182_v13  ;;  %v5593_v13 = vld [vmem:[#allocation43_spill] sm:$0xff] }
 0x3aa   :  { %v1186_v2 = vsub.f32 %v1184_v42, %v1185_v53  ;;  %v5594_v53 = vld [vmem:[#allocation80_spill] sm:$0xff]  ;;  %v5595_v42 = vld [vmem:[#allocation81_spill] sm:$0xff] }
 0x3ac   :  { %v1188_v11 = vadd.f32 1e-05, %v1186_v2  ;;  %v5596_v2 = vld [vmem:[#allocation44_spill] sm:$0xff] }
 0x3ae   :  { %3612 = vrsqrt.f32 %v1188_v11  ;;  %vm1195_vm13 = vweird.f32 %v1188_v11 }
 0x3b4   :  { %v3613_v15 = vpop.eup %3612 }
 0x3b5   :  { %v1190_v46 = vmul.f32 %v3613_v15, %v1188_v11  ;;  %vm1196_vm12 = vweird.f32 %v3613_v15  ;;  %v5597_v11 = vld [vmem:[#allocation82_spill] sm:$0xff] }
 0x3b6   :  { %vm1197_vm14 = vmor %vm1195_vm13, %vm1196_vm12 }
 0x3b7   :  { %v1191_v1 = vmul.f32 %v3613_v15, %v1190_v46  ;;  %v5599_v46 = vld [vmem:[#allocation65_spill] sm:$0xff] }
 0x3b9   :  { %v1192_v7 = vmul.f32 0.5, %v1191_v1  ;;  %v5600_v1 = vld [vmem:[#allocation66_spill] sm:$0xff] }
 0x3bb   :  { %v1193_v55 = vsub.f32 1.5, %v1192_v7  ;;  %v5601_v7 = vld [vmem:[#allocation67_spill] sm:$0xff] }
 0x3bd   :  { %v1194_v25 = vmul.f32 %v3613_v15, %v1193_v55  ;;  %v5602_v55 = vld [vmem:[#allocation68_spill] sm:$0xff] }
 0x3bf   :  { %v1198_v59 = vsel %vm1197_vm14, %v3613_v15, %v1194_v25  ;;  %v5598_v15 = vld [vmem:[#allocation83_spill] sm:$0xff]  ;;  %v5603_v25 = vld [vmem:[#allocation69_spill] sm:$0xff] }
 0x3c0   :  { %v1199_v51 = vmul.f32 %v1198_v59, %v1187_v62  ;;  %v5604_v62 = vld [vmem:[#allocation70_spill] sm:$0xff]  ;;  %v5605_v59 = vld [vmem:[#allocation71_spill] sm:$0xff] }
 0x3c2   :  { %v1200_v32 = vmul.f32 %v4455_v21, %v1199_v51  ;;  %v5606_v51 = vld [vmem:[#allocation72_spill] sm:$0xff] }
 0x3c4   :  { %v1201_v8 = vadd.f32 %v4459_v37, %v1200_v32 }
 0x3c6   :  { %v1202_v61 = vpack.c.bf16 %v1201_v8, %v1201_v8  ;;  %v5607_v8 = vld [vmem:[#allocation88_spill] sm:$0xff] }
 0x3c8   :  { %1211 = vmatmul.bf16.vlgmr.msrb.gmra.mxu1 %v1202_v61  ;;  %1224 = vmatmul.bf16.vlgmr.msra.gmra.mxu2 %v1202_v61 }
 0x3c9   :  { %1237 = vmatmul.bf16.vlgmr.msrb.gmra.mxu3 %v1202_v61  ;;  %1357 = vmatpush.bf16.msrb.mxu1 %v4222_v12 }
 0x3ca   :  { %1443 = vmatpush.bf16.msra.mxu2 %v4368_v63  ;;  %1456 = vmatpush.bf16.msrb.mxu3 %v4371_v3 }
 0x3cd   :  { %1358 = vmatpush.bf16.msrb.mxu1 %v4226_v16 }
 0x3ce   :  { %1444 = vmatpush.bf16.msra.mxu2 %v4378_v18  ;;  %1457 = vmatpush.bf16.msrb.mxu3 %v4381_v33 }
 0x3d1   :  { %1359 = vmatpush.bf16.msrb.mxu1 %v4230_v23 }
 0x3d2   :  { %1445 = vmatpush.bf16.msra.mxu2 %v4388_v14  ;;  %1458 = vmatpush.bf16.msrb.mxu3 %v4390_v28 }
 0x3d5   :  { %1360 = vmatpush.bf16.msrb.mxu1 %v4236_v29 }
 0x3d6   :  { %1446 = vmatpush.bf16.msra.mxu2 %v4397_v9  ;;  %1459 = vmatpush.bf16.msrb.mxu3 %v4399_v27 }
 0x3d9   :  { %1339 = vmatmul.bf16.vlgmr.msra.gmra.mxu3 %v4617_v26  ;;  %1361 = vmatpush.bf16.msrb.mxu1 %v4239_v35 }
 0x3da   :  { %1447 = vmatpush.bf16.msra.mxu2 %v4406_v56  ;;  %1460 = vmatpush.bf16.msrb.mxu3 %v4408_v0 }
 0x3dd   :  { %1362 = vmatpush.bf16.msrb.mxu1 %v4242_v43 }
 0x3de   :  { %1448 = vmatpush.bf16.msra.mxu2 %v5591_v31  ;;  %1461 = vmatpush.bf16.msrb.mxu3 %v5592_v10 }
 0x3e1   :  { %1363 = vmatpush.bf16.msrb.mxu1 %v5593_v13 }
 0x3e2   :  { %1449 = vmatpush.bf16.msra.mxu2 %v5594_v53  ;;  %1462 = vmatpush.bf16.msrb.mxu3 %v5595_v42 }
 0x3e5   :  { %1364 = vmatpush.bf16.msrb.mxu1 %v5596_v2 }
 0x3e6   :  { %1450 = vmatpush.bf16.msra.mxu2 %v5597_v11  ;;  %1463 = vmatpush.bf16.msrb.mxu3 %v5598_v15 }
 0x3ea   :  { %1557 = vmatpush.bf16.msra.mxu3 %v5599_v46 }
 0x3ee   :  { %1558 = vmatpush.bf16.msra.mxu3 %v5600_v1  ;;  %v5608_v1 = vld [vmem:[#allocation89_spill] sm:$0xff] }
 0x3f2   :  { %1559 = vmatpush.bf16.msra.mxu3 %v5601_v7 }
 0x3f6   :  { %1560 = vmatpush.bf16.msra.mxu3 %v5602_v55 }
 0x3fa   :  { %1561 = vmatpush.bf16.msra.mxu3 %v5603_v25 }
 0x3fe   :  { %1562 = vmatpush.bf16.msra.mxu3 %v5604_v62 }
 0x402   :  { %1563 = vmatpush.bf16.msra.mxu3 %v5605_v59 }
 0x406   :  { %1564 = vmatpush.bf16.msra.mxu3 %v5606_v51 }
 0x445   :  { %v1212_v32 = vpop.f32.mrf.mxu1 }
 0x446   :  { %v1213_v61 = vadd.f32 %v1212_v32, %v5607_v8 }
 0x448   :  { %v1242_v5 = vadd.f32 %v1213_v61, %v4587_v49  ;;  %v5609_v49 = vld [vmem:[#allocation84_spill] sm:$0xff] }
 0x44a   :  { %v3337_v30 = vmul.f32 -1.442695, %v1242_v5  ;;  %v236_v5 = vadd.f32 %v5609_v49, %v5585_v54 }
 0x44b   :  { %v1225_v46 = vpop.f32.mrf.mxu2 }
 0x44c   :  { %3614 = vpow2.f32 %v3337_v30  ;;  %v1226_v7 = vadd.f32 %v1225_v46, %v5608_v1  ;;  %v1238_v15 = vpop.f32.mrf.mxu3 }
 0x44d   :  { %v1214_v55 = vpop.f32.mrf.mxu1 }
 0x44e   :  { %v1262_v25 = vadd.f32 %v1226_v7, %v4583_v60 }
 0x450   :  { %v3338_v11 = vmul.f32 -1.442695, %v1262_v25 }
 0x452   :  { %v3615_v62 = vpop.eup %3614  ;;  %3616 = vpow2.f32 %v3338_v11 }
 0x453   :  { %v1246_v59 = vadd.f32 1.0, %v3615_v62  ;;  %v1227_v2 = vpop.f32.mrf.mxu2 }
 0x454   :  { %v1240_v51 = vpop.f32.mrf.mxu3 }
 0x455   :  { %3618 = vrcp.f32 %v1246_v59  ;;  %v1258_v60 = vand.u32 2147483648, %v1246_v59  ;;  %v1256_v11 = vand.u32 2147483647, %v1246_v59  ;;  %vm1252_vm0 = vweird.f32 %v1246_v59 }
 0x456   :  { %v1282_v51 = vadd.f32 %v4528_v50, %v4585_v47 }
 0x457   :  { %vm1257_vm2 = vcmp.eq.f32.partialorder %v1256_v11, 8.507059e+37 }
 0x458   :  { %v3617_v42 = vpop.eup %3616 }
 0x459   :  { %v1266_v32 = vadd.f32 1.0, %v3617_v42  ;;  %v1259_v42 = vor.u32 1.1754944e-38, %v1258_v60 }
 0x45b   :  { %v3619_v8 = vpop.eup %3618  ;;  %3620 = vrcp.f32 %v1266_v32  ;;  %v1276_v13 = vand.u32 2147483647, %v1266_v32  ;;  %vm1272_vm4 = vweird.f32 %v1266_v32 }
 0x45c   :  { %v1248_v30 = vmul.f32 %v3619_v8, %v1246_v59  ;;  %v1340_v46 = vpop.f32.mrf.mxu3  ;;  %vm1253_vm15 = vweird.f32 %v3619_v8 }
 0x45d   :  { %v4646_v61 = vadd.f32 %v1340_v46, %v236_v5  ;;  %vm1254_vm1 = vmor %vm1252_vm0, %vm1253_vm15  ;;  %v1239_v5 = vadd.f32 %v1238_v15, %v4530_v24  ;;  %vm1277_vm6 = vcmp.eq.f32.partialorder %v1276_v13, 8.507059e+37  ;;  %v5612_v13 = vld [vmem:[#allocation76_spill] sm:$0xff] }
 0x45e   :  { %v1249_v55 = vsub.f32 1.0, %v1248_v30 }
 0x460   :  { %v1250_v7 = vmul.f32 %v3619_v8, %v1249_v55  ;;  %v1278_v55 = vand.u32 2147483648, %v1266_v32 }
 0x461   :  { %v3621_v25 = vpop.eup %3620 }
 0x462   :  { %v1268_v2 = vmul.f32 %v3621_v25, %v1266_v32  ;;  %v1251_v62 = vadd.f32 %v3619_v8, %v1250_v7  ;;  %vm1273_vm3 = vweird.f32 %v3621_v25  ;;  %v1279_v10 = vor.u32 1.1754944e-38, %v1278_v55  ;;  %v5614_v32 = vld [vmem:[#allocation41_spill] sm:$0xff] }
 0x463   :  { %vm1274_vm5 = vmor %vm1272_vm4, %vm1273_vm3  ;;  %v5624_v55 = vld [vmem:[#allocation25_spill] sm:$0xff] }
 0x464   :  { %v1269_v49 = vsub.f32 1.0, %v1268_v2  ;;  %v1255_v54 = vsel %vm1254_vm1, %v3619_v8, %v1251_v62  ;;  %v1342_v1 = vpop.f32.mrf.mxu3  ;;  %v5617_v62 = vld [vmem:[#allocation34_spill] sm:$0xff] }
 0x465   :  { %v1260_v30 = vsel %vm1257_vm2, %v1259_v42, %v1255_v54  ;;  %v5618_v42 = vld [vmem:[#allocation42_spill] sm:$0xff] }
 0x466   :  { %v1270_v46 = vmul.f32 %v3621_v25, %v1269_v49  ;;  %v1283_v53 = vmul.f32 %v1282_v51, %v1260_v30  ;;  %v5619_v51 = vld [vmem:[#allocation18_spill] sm:$0xff]  ;;  %v5620_v49 = vld [vmem:[#allocation20_spill] sm:$0xff] }
 0x467   :  { %v5622_v30 = vld [vmem:[#allocation22_spill] sm:$0xff] }
 0x468   :  { %v1271_v7 = vadd.f32 %v3621_v25, %v1270_v46  ;;  %v1284_v59 = vadd.f32 %v1283_v53, %v1239_v5  ;;  %v5613_v53 = vld [vmem:[#allocation31_spill] sm:$0xff]  ;;  %v5621_v5 = vld [vmem:[#allocation21_spill] sm:$0xff]  ;;  %v5623_v46 = vld [vmem:[#allocation24_spill] sm:$0xff] }
 0x46a   :  { %v1275_v60 = vsel %vm1274_vm5, %v3621_v25, %v1271_v7  ;;  %3622 = vtanh.f32 %v1284_v59  ;;  %v5615_v25 = vld [vmem:[#allocation77_spill] sm:$0xff]  ;;  %v5625_v7 = vld [vmem:[#allocation27_spill] sm:$0xff] }
 0x46b   :  { %v1280_v47 = vsel %vm1277_vm6, %v1279_v10, %v1275_v60  ;;  %v5611_v10 = vld [vmem:[#allocation40_spill] sm:$0xff]  ;;  %v5626_v59 = vld [vmem:[#allocation29_spill] sm:$0xff]  ;;  %v5627_v60 = vld [vmem:[#allocation30_spill] sm:$0xff] }
 0x46c   :  { %v1286_v8 = vsub.f32 1.0, %v1280_v47  ;;  %v1288_v15 = vmul.f32 %v1280_v47, %v4534_v19  ;;  %v5610_v19 = vld [vmem:[#allocation28_spill] sm:$0xff] }
 0x46d   :  { %v5628_v47 = vld [vmem:[#allocation32_spill] sm:$0xff] }
 0x470   :  { %v3623_v11 = vpop.eup %3622 }
 0x471   :  { %v1287_v1 = vmul.f32 %v3623_v11, %v1286_v8  ;;  %v5629_v8 = vld [vmem:[#allocation33_spill] sm:$0xff] }
 0x472   :  { %v5630_v11 = vld [vmem:[#allocation37_spill] sm:$0xff] }
 0x473   :  { %v4652_v54 = vadd.f32 %v1288_v15, %v1287_v1  ;;  %v5631_v1 = vld [vmem:[#allocation35_spill] sm:$0xff]  ;;  %v5632_v15 = vld [vmem:[#allocation38_spill] sm:$0xff] }
 0x475   :  { %v1290_v2 = vpack.c.bf16 %v4652_v54, %v4652_v54 }
 0x477   :  { %1299 = vmatmul.bf16.vlgmr.msrb.gmra.mxu0 %v1290_v2  ;;  %1312 = vmatmul.bf16.vlgmr.msra.gmra.mxu1 %v1290_v2 }
 0x478   :  { %1325 = vmatmul.bf16.vlgmr.msrb.gmra.mxu2 %v1290_v2  ;;  %1469 = vmatpush.bf16.msrb.mxu0 %v4332_v6  ;;  %v5633_v2 = vld [vmem:[#allocation36_spill] sm:$0xff] }
 0x479   :  { %1531 = vmatpush.bf16.msra.mxu1 %v4101_v17  ;;  %1544 = vmatpush.bf16.msrb.mxu2 %v4175_v22 }
 0x47c   :  { %1470 = vmatpush.bf16.msrb.mxu0 %v4354_v4 }
 0x47d   :  { %1532 = vmatpush.bf16.msra.mxu1 %v4106_v20  ;;  %1545 = vmatpush.bf16.msrb.mxu2 %v4185_v34 }
 0x480   :  { %1471 = vmatpush.bf16.msrb.mxu0 %v4360_v45 }
 0x481   :  { %1533 = vmatpush.bf16.msra.mxu1 %v5563_v41  ;;  %1546 = vmatpush.bf16.msrb.mxu2 %v4194_v44 }
 0x484   :  { %1472 = vmatpush.bf16.msrb.mxu0 %v5564_v58 }
 0x485   :  { %1534 = vmatpush.bf16.msra.mxu1 %v5565_v48  ;;  %1547 = vmatpush.bf16.msrb.mxu2 %v4204_v52 }
 0x487   :  { %1352 = vmatmul.bf16.vlgmr.msra.gmra.mxu0 %v4617_v26  ;;  %1365 = vmatmul.bf16.vlgmr.msrb.gmra.mxu1 %v4617_v26  ;;  %v5616_v26 = vld [vmem:[#allocation17_spill] sm:$0xff] }
 0x488   :  { %1473 = vmatpush.bf16.msrb.mxu0 %v5566_v39 }
 0x489   :  { %1535 = vmatpush.bf16.msra.mxu1 %v5567_v36  ;;  %1548 = vmatpush.bf16.msrb.mxu2 %v4208_v57 }
 0x48c   :  { %1474 = vmatpush.bf16.msrb.mxu0 %v5568_v38 }
 0x48d   :  { %1536 = vmatpush.bf16.msra.mxu1 %v5610_v19  ;;  %1549 = vmatpush.bf16.msrb.mxu2 %v5611_v10 }
 0x490   :  { %1475 = vmatpush.bf16.msrb.mxu0 %v5612_v13 }
 0x491   :  { %1537 = vmatpush.bf16.msra.mxu1 %v5613_v53  ;;  %1550 = vmatpush.bf16.msrb.mxu2 %v5614_v32  ;;  %v5635_v32 = vld [vmem:[#allocation49_spill] sm:$0xff] }
 0x494   :  { %1476 = vmatpush.bf16.msrb.mxu0 %v5615_v25 }
 0x495   :  { %1538 = vmatpush.bf16.msra.mxu1 %v5617_v62  ;;  %1551 = vmatpush.bf16.msrb.mxu2 %v5618_v42 }
 0x498   :  { %1571 = vmatpush.bf16.msra.mxu0 %v5616_v26  ;;  %v5634_v26 = vld [vmem:[#allocation53_spill] sm:$0xff] }
 0x499   :  { %1584 = vmatpush.bf16.msrb.mxu1 %v5619_v51 }
 0x49c   :  { %1572 = vmatpush.bf16.msra.mxu0 %v5620_v49 }
 0x49d   :  { %1585 = vmatpush.bf16.msrb.mxu1 %v5621_v5 }
 0x4a0   :  { %1573 = vmatpush.bf16.msra.mxu0 %v5622_v30 }
 0x4a1   :  { %1586 = vmatpush.bf16.msrb.mxu1 %v5623_v46 }
 0x4a4   :  { %1574 = vmatpush.bf16.msra.mxu0 %v5624_v55  ;;  %v3339_v55 = vmul.f32 -1.442695, %v4646_v61 }
 0x4a5   :  { %1587 = vmatpush.bf16.msrb.mxu1 %v5625_v7 }
 0x4a6   :  { %3624 = vpow2.f32 %v3339_v55 }
 0x4a8   :  { %1575 = vmatpush.bf16.msra.mxu0 %v5626_v59 }
 0x4a9   :  { %1588 = vmatpush.bf16.msrb.mxu1 %v5627_v60 }
 0x4ac   :  { %1576 = vmatpush.bf16.msra.mxu0 %v5628_v47  ;;  %v3625_v7 = vpop.eup %3624 }
 0x4ad   :  { %1589 = vmatpush.bf16.msrb.mxu1 %v5629_v8  ;;  %v1374_v46 = vadd.f32 1.0, %v3625_v7 }
 0x4af   :  { %3626 = vrcp.f32 %v1374_v46  ;;  %vm1380_vm8 = vweird.f32 %v1374_v46  ;;  %v1384_v61 = vand.u32 2147483647, %v1374_v46 }
 0x4b0   :  { %1577 = vmatpush.bf16.msra.mxu0 %v5630_v11 }
 0x4b1   :  { %1590 = vmatpush.bf16.msrb.mxu1 %v5631_v1  ;;  %vm1385_vm10 = vcmp.eq.f32.partialorder %v1384_v61, 8.507059e+37 }
 0x4b4   :  { %1578 = vmatpush.bf16.msra.mxu0 %v5632_v15 }
 0x4b5   :  { %1591 = vmatpush.bf16.msrb.mxu1 %v5633_v2  ;;  %v3627_v59 = vpop.eup %3626  ;;  %v1386_v2 = vand.u32 2147483648, %v1374_v46 }
 0x4b6   :  { %v1376_v60 = vmul.f32 %v3627_v59, %v1374_v46  ;;  %vm1381_vm7 = vweird.f32 %v3627_v59 }
 0x4b7   :  { %vm1382_vm9 = vmor %vm1380_vm8, %vm1381_vm7  ;;  %v1387_v62 = vor.u32 1.1754944e-38, %v1386_v2 }
 0x4b8   :  { %v1377_v8 = vsub.f32 1.0, %v1376_v60  ;;  %v4706_v60 = vld [vmem:[#allocation6] ss:$0 sm:$0xff] }
 0x4ba   :  { %v1378_v1 = vmul.f32 %v3627_v59, %v1377_v8 }
 0x4bc   :  { %v1379_v49 = vadd.f32 %v3627_v59, %v1378_v1 }
 0x4be   :  { %v1383_v7 = vsel %vm1382_vm9, %v3627_v59, %v1379_v49 }
 0x4f4   :  { %v4699_v30 = vpop.f32.mrf.mxu0  ;;  %v4701_v47 = vpop.f32.mrf.mxu1 }
 0x4fb   :  { %v4703_v11 = vpop.f32.mrf.mxu2 }
 0x4fc   :  { %v1302_v5 = vpop.f32.mrf.mxu0  ;;  %v1315_v15 = vpop.f32.mrf.mxu1 }
 0x4fd   :  { %v1388_v5 = vsel %vm1385_vm10, %v1387_v62, %v1383_v7 }
 0x503   :  { %v1328_v55 = vpop.f32.mrf.mxu2 }
 0x504   :  { %v1353_v51 = vpop.f32.mrf.mxu0  ;;  %v1366_v42 = vpop.f32.mrf.mxu1 }
 0x505   :  { %v1390_v25 = vadd.f32 %v1353_v51, %v5634_v26  ;;  %v1410_v8 = vadd.f32 %v4706_v60, %v1366_v42 }
 0x507   :  { %v3340_v15 = vmul.f32 -1.442695, %v1390_v25  ;;  %v1411_v1 = vmul.f32 %v1410_v8, %v1388_v5 }
 0x509   :  { %3628 = vpow2.f32 %v3340_v15  ;;  %v1412_v53 = vadd.f32 %v1411_v1, %v5635_v32 }
 0x50c   :  { %v1355_v46 = vpop.f32.mrf.mxu0  ;;  %v1368_v13 = vpop.f32.mrf.mxu1 }
 0x50f   :  { %v3629_v55 = vpop.eup %3628 }
 0x510   :  { %v1394_v49 = vadd.f32 1.0, %v3629_v55 }
 0x512   :  { %3630 = vrcp.f32 %v1394_v49  ;;  %v1406_v26 = vand.u32 2147483648, %v1394_v49  ;;  %v1404_v61 = vand.u32 2147483647, %v1394_v49  ;;  %vm1400_vm12 = vweird.f32 %v1394_v49 }
 0x513   :  { %3632 = vtanh.f32 %v1412_v53 }
 0x514   :  { %v1407_v25 = vor.u32 1.1754944e-38, %v1406_v26  ;;  %vm1405_vm14 = vcmp.eq.f32.partialorder %v1404_v61, 8.507059e+37 }
 0x518   :  { %v3631_v59 = vpop.eup %3630 }
 0x519   :  { %v1396_v2 = vmul.f32 %v3631_v59, %v1394_v49  ;;  %vm1401_vm11 = vweird.f32 %v3631_v59  ;;  %v3633_v13 = vpop.eup %3632 }
 0x51a   :  { %vm1402_vm13 = vmor %vm1400_vm12, %vm1401_vm11 }
 0x51b   :  { %v1397_v10 = vsub.f32 1.0, %v1396_v2 }
 0x51d   :  { %v1398_v51 = vmul.f32 %v3631_v59, %v1397_v10 }
 0x51f   :  { %v1399_v42 = vadd.f32 %v3631_v59, %v1398_v51 }
 0x521   :  { %v1403_v62 = vsel %vm1402_vm13, %v3631_v59, %v1399_v42 }
 0x522   :  { %v1408_v32 = vsel %vm1405_vm14, %v1407_v25, %v1403_v62 }
 0x523   :  { %v1414_v7 = vsub.f32 1.0, %v1408_v32  ;;  %v1416_v5 = vmul.f32 %v1408_v32, %v4595_v40 }
 0x525   :  { %v1415_v8 = vmul.f32 %v3633_v13, %v1414_v7 }
 0x527   :  { %v4711_v15 = vadd.f32 %v1416_v5, %v1415_v8 }
 0x529   :  { %1418 = vadd.xlane.f32.xlu2 %v4711_v15  ;;  %v1420_v10 = vmul.f32 %v4711_v15, %v4711_v15 }
 0x531   :  { %1421 = vadd.xlane.f32.xlu2 %v1420_v10  ;;  %v5637_v10 = vld [vmem:[#allocation43_spill] sm:$0xff] }
 0x59c   :  { %v1419_v53 = vpop.xlane.xlu2 %1418 }
 0x59d   :  { %v1423_v1 = vmul.f32 0.03125, %v1419_v53  ;;  %v5638_v53 = vld [vmem:[#allocation80_spill] sm:$0xff] }
 0x59f   :  { %v1425_v55 = vmul.f32 %v1423_v1, %v1423_v1  ;;  %v1427_v62 = vsub.f32 %v4711_v15, %v1423_v1  ;;  %v5639_v1 = vld [vmem:[#allocation81_spill] sm:$0xff] }
 0x5a4   :  { %v1422_v46 = vpop.xlane.xlu2 %1421 }
 0x5a5   :  { %v1424_v49 = vmul.f32 0.03125, %v1422_v46  ;;  %v5640_v46 = vld [vmem:[#allocation44_spill] sm:$0xff] }
 0x5a7   :  { %v1426_v59 = vsub.f32 %v1424_v49, %v1425_v55  ;;  %v5641_v55 = vld [vmem:[#allocation82_spill] sm:$0xff]  ;;  %v5642_v49 = vld [vmem:[#allocation83_spill] sm:$0xff] }
 0x5a9   :  { %v1428_v2 = vadd.f32 1e-05, %v1426_v59  ;;  %v5643_v59 = vld [vmem:[#allocation65_spill] sm:$0xff] }
 0x5ab   :  { %3634 = vrsqrt.f32 %v1428_v2  ;;  %vm1435_vm0 = vweird.f32 %v1428_v2 }
 0x5b1   :  { %v3635_v26 = vpop.eup %3634 }
 0x5b2   :  { %v1430_v51 = vmul.f32 %v3635_v26, %v1428_v2  ;;  %vm1436_vm15 = vweird.f32 %v3635_v26  ;;  %v5644_v2 = vld [vmem:[#allocation66_spill] sm:$0xff] }
 0x5b3   :  { %vm1437_vm1 = vmor %vm1435_vm0, %vm1436_vm15 }
 0x5b4   :  { %v1431_v61 = vmul.f32 %v3635_v26, %v1430_v51  ;;  %v5646_v51 = vld [vmem:[#allocation68_spill] sm:$0xff] }
 0x5b6   :  { %v1432_v40 = vmul.f32 0.5, %v1431_v61  ;;  %v5647_v61 = vld [vmem:[#allocation69_spill] sm:$0xff] }
 0x5b8   :  { %v1433_v42 = vsub.f32 1.5, %v1432_v40  ;;  %v5648_v40 = vld [vmem:[#allocation70_spill] sm:$0xff] }
 0x5ba   :  { %v1434_v25 = vmul.f32 %v3635_v26, %v1433_v42  ;;  %v5649_v42 = vld [vmem:[#allocation71_spill] sm:$0xff] }
 0x5bc   :  { %v1438_v32 = vsel %vm1437_vm1, %v3635_v26, %v1434_v25  ;;  %v5645_v26 = vld [vmem:[#allocation67_spill] sm:$0xff]  ;;  %v5650_v25 = vld [vmem:[#allocation72_spill] sm:$0xff] }
 0x5bd   :  { %v1439_v7 = vmul.f32 %v1438_v32, %v1427_v62 }
 0x5bf   :  { %v1440_v13 = vmul.f32 %v4455_v21, %v1439_v7  ;;  %v4733_v21 = vpack.c.bf16 %v4711_v15, %v4711_v15 }
 0x5c1   :  { %v1441_v8 = vadd.f32 %v4459_v37, %v1440_v13  ;;  %v5636_v37 = vld [vmem:[#allocation79_spill] sm:$0xff]  ;;  %v5651_v13 = vld [vmem:[#allocation88_spill] sm:$0xff] }
 0x5c3   :  { %v1442_v5 = vpack.c.bf16 %v1441_v8, %v1441_v8 }
 0x5c5   :  { %1451 = vmatmul.bf16.vlgmr.msra.gmra.mxu2 %v1442_v5  ;;  %1464 = vmatmul.bf16.vlgmr.msrb.gmra.mxu3 %v1442_v5 }
 0x5c6   :  { %1477 = vmatmul.bf16.vlgmr.msrb.gmra.mxu0 %v1442_v5  ;;  %1597 = vmatpush.bf16.msra.mxu2 %v4222_v12  ;;  %v5652_v5 = vld [vmem:[#allocation89_spill] sm:$0xff] }
 0x5c7   :  { %1683 = vmatpush.bf16.msrb.mxu3 %v4368_v63  ;;  %1696 = vmatpush.bf16.msrb.mxu0 %v4371_v3 }
 0x5ca   :  { %1598 = vmatpush.bf16.msra.mxu2 %v4226_v16 }
 0x5cb   :  { %1684 = vmatpush.bf16.msrb.mxu3 %v4378_v18  ;;  %1697 = vmatpush.bf16.msrb.mxu0 %v4381_v33 }
 0x5ce   :  { %1599 = vmatpush.bf16.msra.mxu2 %v4230_v23 }
 0x5cf   :  { %1685 = vmatpush.bf16.msrb.mxu3 %v4388_v14  ;;  %1698 = vmatpush.bf16.msrb.mxu0 %v4390_v28 }
 0x5d2   :  { %1600 = vmatpush.bf16.msra.mxu2 %v4236_v29 }
 0x5d3   :  { %1686 = vmatpush.bf16.msrb.mxu3 %v4397_v9  ;;  %1699 = vmatpush.bf16.msrb.mxu0 %v4399_v27 }
 0x5d6   :  { %1579 = vmatmul.bf16.vlgmr.msra.gmra.mxu0 %v4733_v21  ;;  %1601 = vmatpush.bf16.msra.mxu2 %v4239_v35 }
 0x5d7   :  { %1687 = vmatpush.bf16.msrb.mxu3 %v4406_v56  ;;  %1700 = vmatpush.bf16.msrb.mxu0 %v4408_v0 }
 0x5da   :  { %1602 = vmatpush.bf16.msra.mxu2 %v4242_v43 }
 0x5db   :  { %1688 = vmatpush.bf16.msrb.mxu3 %v5591_v31  ;;  %1701 = vmatpush.bf16.msrb.mxu0 %v5636_v37 }
 0x5de   :  { %1603 = vmatpush.bf16.msra.mxu2 %v5637_v10 }
 0x5df   :  { %1689 = vmatpush.bf16.msrb.mxu3 %v5638_v53  ;;  %1702 = vmatpush.bf16.msrb.mxu0 %v5639_v1 }
 0x5e2   :  { %1604 = vmatpush.bf16.msra.mxu2 %v5640_v46 }
 0x5e3   :  { %1690 = vmatpush.bf16.msrb.mxu3 %v5641_v55  ;;  %1703 = vmatpush.bf16.msrb.mxu0 %v5642_v49 }
 0x5e7   :  { %1797 = vmatpush.bf16.msra.mxu0 %v5643_v59 }
 0x5eb   :  { %1798 = vmatpush.bf16.msra.mxu0 %v5644_v2 }
 0x5ef   :  { %1799 = vmatpush.bf16.msra.mxu0 %v5645_v26 }
 0x5f3   :  { %1800 = vmatpush.bf16.msra.mxu0 %v5646_v51 }
 0x5f7   :  { %1801 = vmatpush.bf16.msra.mxu0 %v5647_v61 }
 0x5fb   :  { %1802 = vmatpush.bf16.msra.mxu0 %v5648_v40 }
 0x5ff   :  { %1803 = vmatpush.bf16.msra.mxu0 %v5649_v42 }
 0x603   :  { %1804 = vmatpush.bf16.msra.mxu0 %v5650_v25 }
 0x643   :  { %v1478_v62 = vpop.f32.mrf.mxu0 }
 0x648   :  { %v1452_v32 = vpop.f32.mrf.mxu2  ;;  %v1465_v7 = vpop.f32.mrf.mxu3 }
 0x649   :  { %v1453_v8 = vadd.f32 %v1452_v32, %v5651_v13  ;;  %v1466_v59 = vadd.f32 %v1465_v7, %v5652_v5 }
 0x64b   :  { %v1482_v2 = vadd.f32 %v1453_v8, %v4699_v30  ;;  %v1502_v26 = vadd.f32 %v1466_v59, %v4701_v47  ;;  %v1480_v51 = vpop.f32.mrf.mxu0 }
 0x64d   :  { %v3341_v49 = vmul.f32 -1.442695, %v1482_v2  ;;  %v3342_v61 = vmul.f32 -1.442695, %v1502_v26 }
 0x64f   :  { %3636 = vpow2.f32 %v3341_v49 }
 0x650   :  { %3638 = vpow2.f32 %v3342_v61  ;;  %v1454_v40 = vpop.f32.mrf.mxu2  ;;  %v1467_v42 = vpop.f32.mrf.mxu3 }
 0x653   :  { %v4760_v55 = vpop.f32.mrf.mxu0 }
 0x655   :  { %v3637_v25 = vpop.eup %3636 }
 0x656   :  { %v3639_v46 = vpop.eup %3638  ;;  %v1486_v1 = vadd.f32 1.0, %v3637_v25 }
 0x657   :  { %v1506_v53 = vadd.f32 1.0, %v3639_v46  ;;  %v1522_v46 = vadd.f32 %v4528_v50, %v4703_v11 }
 0x658   :  { %3640 = vrcp.f32 %v1486_v1  ;;  %v1498_v2 = vand.u32 2147483648, %v1486_v1  ;;  %v1496_v51 = vand.u32 2147483647, %v1486_v1  ;;  %vm1492_vm3 = vweird.f32 %v1486_v1 }
 0x659   :  { %3642 = vrcp.f32 %v1506_v53  ;;  %v1518_v5 = vand.u32 2147483648, %v1506_v53  ;;  %vm1512_vm7 = vweird.f32 %v1506_v53 }
 0x65a   :  { %v1499_v42 = vor.u32 1.1754944e-38, %v1498_v2  ;;  %vm1497_vm5 = vcmp.eq.f32.partialorder %v1496_v51, 8.507059e+37 }
 0x65b   :  { %v1582_v32 = vpop.f32.mrf.mxu0 }
 0x65e   :  { %v3641_v7 = vpop.eup %3640 }
 0x65f   :  { %v3643_v30 = vpop.eup %3642  ;;  %v1488_v8 = vmul.f32 %v3641_v7, %v1486_v1  ;;  %vm1493_vm2 = vweird.f32 %v3641_v7  ;;  %v1519_v1 = vor.u32 1.1754944e-38, %v1518_v5  ;;  %v5657_v5 = vld [vmem:[#allocation77_spill] sm:$0xff] }
 0x660   :  { %v1508_v47 = vmul.f32 %v3643_v30, %v1506_v53  ;;  %vm1494_vm4 = vmor %vm1492_vm3, %vm1493_vm2  ;;  %vm1513_vm6 = vweird.f32 %v3643_v30 }
 0x661   :  { %v1489_v59 = vsub.f32 1.0, %v1488_v8  ;;  %v1479_v8 = vadd.f32 %v1478_v62, %v4530_v24  ;;  %vm1514_vm8 = vmor %vm1512_vm7, %vm1513_vm6 }
 0x662   :  { %v1509_v26 = vsub.f32 1.0, %v1508_v47 }
 0x663   :  { %v1490_v49 = vmul.f32 %v3641_v7, %v1489_v59  ;;  %v1516_v59 = vand.u32 2147483647, %v1506_v53  ;;  %v5655_v53 = vld [vmem:[#allocation31_spill] sm:$0xff] }
 0x664   :  { %v1510_v61 = vmul.f32 %v3643_v30, %v1509_v26 }
 0x665   :  { %v1491_v40 = vadd.f32 %v3641_v7, %v1490_v49  ;;  %vm1517_vm9 = vcmp.eq.f32.partialorder %v1516_v59, 8.507059e+37  ;;  %v5668_v59 = vld [vmem:[#allocation29_spill] sm:$0xff] }
 0x666   :  { %v1511_v13 = vadd.f32 %v3643_v30, %v1510_v61  ;;  %v5660_v61 = vld [vmem:[#allocation42_spill] sm:$0xff] }
 0x667   :  { %v1495_v25 = vsel %vm1494_vm4, %v3641_v7, %v1491_v40  ;;  %v5661_v40 = vld [vmem:[#allocation18_spill] sm:$0xff] }
 0x668   :  { %v1500_v32 = vsel %vm1497_vm5, %v1499_v42, %v1495_v25  ;;  %v1515_v49 = vsel %vm1514_vm8, %v3643_v30, %v1511_v13  ;;  %v5656_v13 = vld [vmem:[#allocation41_spill] sm:$0xff]  ;;  %v5659_v30 = vld [vmem:[#allocation34_spill] sm:$0xff]  ;;  %v5662_v42 = vld [vmem:[#allocation20_spill] sm:$0xff] }
 0x669   :  { %v1523_v47 = vmul.f32 %v1522_v46, %v1500_v32  ;;  %v1520_v2 = vsel %vm1517_vm9, %v1519_v1, %v1515_v49  ;;  %v5663_v46 = vld [vmem:[#allocation21_spill] sm:$0xff]  ;;  %v5664_v25 = vld [vmem:[#allocation22_spill] sm:$0xff]  ;;  %v5665_v32 = vld [vmem:[#allocation24_spill] sm:$0xff] }
 0x66a   :  { %v1526_v10 = vsub.f32 1.0, %v1520_v2  ;;  %v1528_v7 = vmul.f32 %v1520_v2, %v4652_v54  ;;  %v5653_v54 = vld [vmem:[#allocation40_spill] sm:$0xff]  ;;  %v5671_v1 = vld [vmem:[#allocation33_spill] sm:$0xff] }
 0x66b   :  { %v1524_v26 = vadd.f32 %v1523_v47, %v1479_v8  ;;  %v5666_v8 = vld [vmem:[#allocation25_spill] sm:$0xff]  ;;  %v5667_v47 = vld [vmem:[#allocation27_spill] sm:$0xff]  ;;  %v5670_v49 = vld [vmem:[#allocation32_spill] sm:$0xff] }
 0x66c   :  { %v5672_v2 = vld [vmem:[#allocation37_spill] sm:$0xff] }
 0x66d   :  { %3644 = vtanh.f32 %v1524_v26  ;;  %v5669_v26 = vld [vmem:[#allocation30_spill] sm:$0xff] }
 0x673   :  { %v3645_v50 = vpop.eup %3644 }
 0x674   :  { %v1527_v11 = vmul.f32 %v3645_v50, %v1526_v10  ;;  %v5654_v10 = vld [vmem:[#allocation76_spill] sm:$0xff]  ;;  %v5673_v50 = vld [vmem:[#allocation35_spill] sm:$0xff] }
 0x676   :  { %v4766_v51 = vadd.f32 %v1528_v7, %v1527_v11  ;;  %v5674_v11 = vld [vmem:[#allocation38_spill] sm:$0xff]  ;;  %v5675_v7 = vld [vmem:[#allocation36_spill] sm:$0xff] }
 0x678   :  { %v1530_v62 = vpack.c.bf16 %v4766_v51, %v4766_v51 }
 0x67a   :  { %1539 = vmatmul.bf16.vlgmr.msra.gmra.mxu1 %v1530_v62  ;;  %1552 = vmatmul.bf16.vlgmr.msrb.gmra.mxu2 %v1530_v62 }
 0x67b   :  { %1565 = vmatmul.bf16.vlgmr.msra.gmra.mxu3 %v1530_v62  ;;  %1709 = vmatpush.bf16.msra.mxu1 %v4332_v6  ;;  %v5676_v62 = vld [vmem:[#allocation63_spill] sm:$0xff] }
 0x67c   :  { %1771 = vmatpush.bf16.msrb.mxu2 %v4101_v17  ;;  %1784 = vmatpush.bf16.msra.mxu3 %v4175_v22 }
 0x67f   :  { %1710 = vmatpush.bf16.msra.mxu1 %v4354_v4 }
 0x680   :  { %1772 = vmatpush.bf16.msrb.mxu2 %v4106_v20  ;;  %1785 = vmatpush.bf16.msra.mxu3 %v4185_v34 }
 0x683   :  { %1711 = vmatpush.bf16.msra.mxu1 %v4360_v45 }
 0x684   :  { %1773 = vmatpush.bf16.msrb.mxu2 %v5563_v41  ;;  %1786 = vmatpush.bf16.msra.mxu3 %v4194_v44 }
 0x687   :  { %1712 = vmatpush.bf16.msra.mxu1 %v5564_v58 }
 0x688   :  { %1774 = vmatpush.bf16.msrb.mxu2 %v5565_v48  ;;  %1787 = vmatpush.bf16.msra.mxu3 %v4204_v52 }
 0x68a   :  { %1592 = vmatmul.bf16.vlgmr.msrb.gmra.mxu1 %v4733_v21  ;;  %1605 = vmatmul.bf16.vlgmr.msra.gmra.mxu2 %v4733_v21  ;;  %v5658_v21 = vld [vmem:[#allocation17_spill] sm:$0xff] }
 0x68b   :  { %1713 = vmatpush.bf16.msra.mxu1 %v5566_v39 }
 0x68c   :  { %1775 = vmatpush.bf16.msrb.mxu2 %v5567_v36  ;;  %1788 = vmatpush.bf16.msra.mxu3 %v4208_v57 }
 0x68f   :  { %1714 = vmatpush.bf16.msra.mxu1 %v5568_v38 }
 0x690   :  { %1776 = vmatpush.bf16.msrb.mxu2 %v5610_v19  ;;  %1789 = vmatpush.bf16.msra.mxu3 %v5653_v54 }
 0x693   :  { %1715 = vmatpush.bf16.msra.mxu1 %v5654_v10 }
 0x694   :  { %1777 = vmatpush.bf16.msrb.mxu2 %v5655_v53  ;;  %1790 = vmatpush.bf16.msra.mxu3 %v5656_v13 }
 0x697   :  { %1716 = vmatpush.bf16.msra.mxu1 %v5657_v5 }
 0x698   :  { %1778 = vmatpush.bf16.msrb.mxu2 %v5659_v30  ;;  %1791 = vmatpush.bf16.msra.mxu3 %v5660_v61  ;;  %v5679_v61 = vld [vmem:[#allocation55_spill] sm:$0xff] }
 0x69b   :  { %1811 = vmatpush.bf16.msrb.mxu1 %v5658_v21 }
 0x69c   :  { %1824 = vmatpush.bf16.msra.mxu2 %v5661_v40 }
 0x69f   :  { %1812 = vmatpush.bf16.msrb.mxu1 %v5662_v42 }
 0x6a0   :  { %1825 = vmatpush.bf16.msra.mxu2 %v5663_v46 }
 0x6a3   :  { %1813 = vmatpush.bf16.msrb.mxu1 %v5664_v25 }
 0x6a4   :  { %1826 = vmatpush.bf16.msra.mxu2 %v5665_v32 }
 0x6a7   :  { %1814 = vmatpush.bf16.msrb.mxu1 %v5666_v8  ;;  %v5677_v8 = vld [vmem:[#allocation85_spill] sm:$0xff] }
 0x6a8   :  { %1827 = vmatpush.bf16.msra.mxu2 %v5667_v47  ;;  %v238_v32 = vadd.f32 %v5677_v8, %v5676_v62  ;;  %v5678_v8 = vld [vmem:[#allocation51_spill] sm:$0xff] }
 0x6aa   :  { %v1610_v47 = vadd.f32 %v4760_v55, %v238_v32  ;;  %v267_v55 = vadd.f32 %v5679_v61, %v5678_v8  ;;  %v5680_v61 = vld [vmem:[#allocation48_spill] sm:$0xff] }
 0x6ab   :  { %1815 = vmatpush.bf16.msrb.mxu1 %v5668_v59 }
 0x6ac   :  { %1828 = vmatpush.bf16.msra.mxu2 %v5669_v26  ;;  %v3343_v59 = vmul.f32 -1.442695, %v1610_v47 }
 0x6ae   :  { %3646 = vpow2.f32 %v3343_v59 }
 0x6af   :  { %1816 = vmatpush.bf16.msrb.mxu1 %v5670_v49 }
 0x6b0   :  { %1829 = vmatpush.bf16.msra.mxu2 %v5671_v1 }
 0x6b3   :  { %1817 = vmatpush.bf16.msrb.mxu1 %v5672_v2 }
 0x6b4   :  { %1830 = vmatpush.bf16.msra.mxu2 %v5673_v50  ;;  %v3647_v26 = vpop.eup %3646 }
 0x6b5   :  { %v1614_v25 = vadd.f32 1.0, %v3647_v26 }
 0x6b7   :  { %1818 = vmatpush.bf16.msrb.mxu1 %v5674_v11  ;;  %3648 = vrcp.f32 %v1614_v25  ;;  %v1626_v30 = vand.u32 2147483648, %v1614_v25  ;;  %vm1620_vm11 = vweird.f32 %v1614_v25  ;;  %v1624_v5 = vand.u32 2147483647, %v1614_v25 }
 0x6b8   :  { %1831 = vmatpush.bf16.msra.mxu2 %v5675_v7 }
 0x6b9   :  { %vm1625_vm13 = vcmp.eq.f32.partialorder %v1624_v5, 8.507059e+37 }
 0x6bd   :  { %v3649_v1 = vpop.eup %3648 }
 0x6be   :  { %v1616_v2 = vmul.f32 %v3649_v1, %v1614_v25  ;;  %vm1621_vm10 = vweird.f32 %v3649_v1 }
 0x6bf   :  { %vm1622_vm12 = vmor %vm1620_vm11, %vm1621_vm10 }
 0x6c0   :  { %v1617_v7 = vsub.f32 1.0, %v1616_v2 }
 0x6c2   :  { %v1618_v42 = vmul.f32 %v3649_v1, %v1617_v7 }
 0x6c4   :  { %v1619_v26 = vadd.f32 %v3649_v1, %v1618_v42 }
 0x6c6   :  { %v1623_v13 = vsel %vm1622_vm12, %v3649_v1, %v1619_v26 }
 0x6f7   :  { %v4815_v49 = vpop.f32.mrf.mxu1 }
 0x6fd   :  { %v4817_v46 = vpop.f32.mrf.mxu2 }
 0x6fe   :  { %v4819_v50 = vpop.f32.mrf.mxu3 }
 0x6ff   :  { %v1542_v11 = vpop.f32.mrf.mxu1 }
 0x700   :  { %v1627_v11 = vor.u32 1.1754944e-38, %v1626_v30 }
 0x702   :  { %v1628_v2 = vsel %vm1625_vm13, %v1627_v11, %v1623_v13 }
 0x705   :  { %v1555_v40 = vpop.f32.mrf.mxu2 }
 0x706   :  { %v1568_v32 = vpop.f32.mrf.mxu3 }
 0x707   :  { %v1593_v47 = vpop.f32.mrf.mxu1  ;;  %v5681_v32 = vld [vmem:[#allocation52_spill] sm:$0xff] }
 0x708   :  { %v1630_v59 = vadd.f32 %v1593_v47, %v267_v55  ;;  %v296_v8 = vadd.f32 %v5681_v32, %v5680_v61 }
 0x70a   :  { %v3344_v21 = vmul.f32 -1.442695, %v1630_v59 }
 0x70c   :  { %3650 = vpow2.f32 %v3344_v21 }
 0x70d   :  { %v1606_v53 = vpop.f32.mrf.mxu2 }
 0x70e   :  { %v1650_v40 = vadd.f32 %v4706_v60, %v1606_v53 }
 0x70f   :  { %v1595_v7 = vpop.f32.mrf.mxu1 }
 0x710   :  { %v1651_v55 = vmul.f32 %v1650_v40, %v1628_v2 }
 0x712   :  { %v3651_v42 = vpop.eup %3650  ;;  %v1652_v47 = vadd.f32 %v1651_v55, %v296_v8 }
 0x713   :  { %v1634_v10 = vadd.f32 1.0, %v3651_v42 }
 0x715   :  { %3652 = vrcp.f32 %v1634_v10  ;;  %v1608_v59 = vpop.f32.mrf.mxu2  ;;  %v1646_v1 = vand.u32 2147483648, %v1634_v10  ;;  %v1644_v5 = vand.u32 2147483647, %v1634_v10  ;;  %vm1640_vm15 = vweird.f32 %v1634_v10 }
 0x716   :  { %3654 = vtanh.f32 %v1652_v47 }
 0x717   :  { %v1647_v13 = vor.u32 1.1754944e-38, %v1646_v1  ;;  %vm1645_vm1 = vcmp.eq.f32.partialorder %v1644_v5, 8.507059e+37 }
 0x71b   :  { %v3653_v25 = vpop.eup %3652 }
 0x71c   :  { %v1636_v54 = vmul.f32 %v3653_v25, %v1634_v10  ;;  %vm1641_vm14 = vweird.f32 %v3653_v25  ;;  %v3655_v8 = vpop.eup %3654 }
 0x71d   :  { %vm1642_vm0 = vmor %vm1640_vm15, %vm1641_vm14 }
 0x71e   :  { %v1637_v21 = vsub.f32 1.0, %v1636_v54 }
 0x720   :  { %v1638_v26 = vmul.f32 %v3653_v25, %v1637_v21 }
 0x722   :  { %v1639_v53 = vadd.f32 %v3653_v25, %v1638_v26 }
 0x724   :  { %v1643_v30 = vsel %vm1642_vm0, %v3653_v25, %v1639_v53 }
 0x725   :  { %v1648_v11 = vsel %vm1645_vm1, %v1647_v13, %v1643_v30 }
 0x726   :  { %v1654_v40 = vsub.f32 1.0, %v1648_v11  ;;  %v1656_v7 = vmul.f32 %v1648_v11, %v4711_v15 }
 0x728   :  { %v1655_v2 = vmul.f32 %v3655_v8, %v1654_v40  ;;  %v4836_v8 = vld [vmem:[%s5351_s5] ss:$0 sm:$0xff] }
 0x72a   :  { %v4827_v32 = vadd.f32 %v1656_v7, %v1655_v2  ;;  %v4839_v7 = vld [vmem:[#allocation7] ss:$0 sm:$0xff] }
 0x72c   :  { %1658 = vadd.xlane.f32.xlu0 %v4827_v32  ;;  %v1660_v54 = vmul.f32 %v4827_v32, %v4827_v32 }
 0x72e   :  { %1661 = vadd.xlane.f32.xlu1 %v1660_v54 }
 0x79f   :  { %v1659_v55 = vpop.xlane.xlu0 %1658 }
 0x7a0   :  { %v1663_v10 = vmul.f32 0.03125, %v1659_v55 }
 0x7a1   :  { %v1662_v42 = vpop.xlane.xlu1 %1661 }
 0x7a2   :  { %v1665_v47 = vmul.f32 %v1663_v10, %v1663_v10  ;;  %v1664_v59 = vmul.f32 0.03125, %v1662_v42  ;;  %v1667_v30 = vsub.f32 %v4827_v32, %v1663_v10  ;;  %v4856_v10 = vpack.c.bf16 %v4827_v32, %v4827_v32  ;;  %v5682_v42 = vld [vmem:[#allocation43_spill] sm:$0xff] }
 0x7a4   :  { %v1666_v25 = vsub.f32 %v1664_v59, %v1665_v47  ;;  %v5683_v47 = vld [vmem:[#allocation80_spill] sm:$0xff]  ;;  %v5684_v59 = vld [vmem:[#allocation81_spill] sm:$0xff] }
 0x7a6   :  { %v1668_v21 = vadd.f32 1e-05, %v1666_v25  ;;  %v5685_v25 = vld [vmem:[#allocation44_spill] sm:$0xff] }
 0x7a8   :  { %3656 = vrsqrt.f32 %v1668_v21  ;;  %vm1675_vm3 = vweird.f32 %v1668_v21 }
 0x7ae   :  { %v3657_v1 = vpop.eup %3656 }
 0x7af   :  { %v1670_v26 = vmul.f32 %v3657_v1, %v1668_v21  ;;  %vm1676_vm2 = vweird.f32 %v3657_v1  ;;  %v5686_v21 = vld [vmem:[#allocation82_spill] sm:$0xff] }
 0x7b0   :  { %vm1677_vm4 = vmor %vm1675_vm3, %vm1676_vm2 }
 0x7b1   :  { %v1671_v5 = vmul.f32 %v3657_v1, %v1670_v26  ;;  %v5688_v26 = vld [vmem:[#allocation65_spill] sm:$0xff] }
 0x7b3   :  { %v1672_v15 = vmul.f32 0.5, %v1671_v5  ;;  %v5689_v5 = vld [vmem:[#allocation66_spill] sm:$0xff] }
 0x7b5   :  { %v1673_v53 = vsub.f32 1.5, %v1672_v15  ;;  %v5690_v15 = vld [vmem:[#allocation67_spill] sm:$0xff] }
 0x7b7   :  { %v1674_v13 = vmul.f32 %v3657_v1, %v1673_v53  ;;  %v5691_v53 = vld [vmem:[#allocation68_spill] sm:$0xff] }
 0x7b9   :  { %v1678_v11 = vsel %vm1677_vm4, %v3657_v1, %v1674_v13  ;;  %v5687_v1 = vld [vmem:[#allocation83_spill] sm:$0xff]  ;;  %v5692_v13 = vld [vmem:[#allocation69_spill] sm:$0xff] }
 0x7ba   :  { %v1679_v40 = vmul.f32 %v1678_v11, %v1667_v30  ;;  %v5693_v30 = vld [vmem:[#allocation70_spill] sm:$0xff]  ;;  %v5694_v11 = vld [vmem:[#allocation71_spill] sm:$0xff] }
 0x7bc   :  { %v1680_v2 = vmul.f32 %v4836_v8, %v1679_v40  ;;  %v5695_v40 = vld [vmem:[#allocation72_spill] sm:$0xff] }
 0x7be   :  { %v1681_v54 = vadd.f32 %v4839_v7, %v1680_v2 }
 0x7c0   :  { %v1682_v55 = vpack.c.bf16 %v1681_v54, %v1681_v54  ;;  %v5696_v54 = vld [vmem:[#allocation89_spill] sm:$0xff] }
 0x7c2   :  { %1691 = vmatmul.bf16.vlgmr.msrb.gmra.mxu3 %v1682_v55  ;;  %1704 = vmatmul.bf16.vlgmr.msrb.gmra.mxu0 %v1682_v55 }
 0x7c3   :  { %1717 = vmatmul.bf16.vlgmr.msra.gmra.mxu1 %v1682_v55  ;;  %1837 = vmatpush.bf16.msrb.mxu3 %v4222_v12 }
 0x7c4   :  { %1923 = vmatpush.bf16.msrb.mxu0 %v4368_v63  ;;  %1936 = vmatpush.bf16.msra.mxu1 %v4371_v3 }
 0x7c7   :  { %1838 = vmatpush.bf16.msrb.mxu3 %v4226_v16 }
 0x7c8   :  { %1924 = vmatpush.bf16.msrb.mxu0 %v4378_v18  ;;  %1937 = vmatpush.bf16.msra.mxu1 %v4381_v33 }
 0x7cb   :  { %1839 = vmatpush.bf16.msrb.mxu3 %v4230_v23 }
 0x7cc   :  { %1925 = vmatpush.bf16.msrb.mxu0 %v4388_v14  ;;  %1938 = vmatpush.bf16.msra.mxu1 %v4390_v28 }
 0x7cf   :  { %1840 = vmatpush.bf16.msrb.mxu3 %v4236_v29 }
 0x7d0   :  { %1926 = vmatpush.bf16.msrb.mxu0 %v4397_v9  ;;  %1939 = vmatpush.bf16.msra.mxu1 %v4399_v27 }
 0x7d3   :  { %1819 = vmatmul.bf16.vlgmr.msrb.gmra.mxu1 %v4856_v10  ;;  %1841 = vmatpush.bf16.msrb.mxu3 %v4239_v35 }
 0x7d4   :  { %1927 = vmatpush.bf16.msrb.mxu0 %v4406_v56  ;;  %1940 = vmatpush.bf16.msra.mxu1 %v4408_v0 }
 0x7d7   :  { %1842 = vmatpush.bf16.msrb.mxu3 %v4242_v43 }
 0x7d8   :  { %1928 = vmatpush.bf16.msrb.mxu0 %v5591_v31  ;;  %1941 = vmatpush.bf16.msra.mxu1 %v5636_v37 }
 0x7db   :  { %1843 = vmatpush.bf16.msrb.mxu3 %v5682_v42 }
 0x7dc   :  { %1929 = vmatpush.bf16.msrb.mxu0 %v5683_v47  ;;  %1942 = vmatpush.bf16.msra.mxu1 %v5684_v59  ;;  %v5698_v47 = vld [vmem:[#allocation86_spill] sm:$0xff] }
 0x7df   :  { %1844 = vmatpush.bf16.msrb.mxu3 %v5685_v25 }
 0x7e0   :  { %1930 = vmatpush.bf16.msrb.mxu0 %v5686_v21  ;;  %1943 = vmatpush.bf16.msra.mxu1 %v5687_v1 }
 0x7e4   :  { %2037 = vmatpush.bf16.msrb.mxu1 %v5688_v26 }
 0x7e8   :  { %2038 = vmatpush.bf16.msrb.mxu1 %v5689_v5 }
 0x7ec   :  { %2039 = vmatpush.bf16.msrb.mxu1 %v5690_v15  ;;  %v5697_v15 = vld [vmem:[#allocation88_spill] sm:$0xff] }
 0x7f0   :  { %2040 = vmatpush.bf16.msrb.mxu1 %v5691_v53 }
 0x7f4   :  { %2041 = vmatpush.bf16.msrb.mxu1 %v5692_v13 }
 0x7f8   :  { %2042 = vmatpush.bf16.msrb.mxu1 %v5693_v30 }
 0x7fc   :  { %2043 = vmatpush.bf16.msrb.mxu1 %v5694_v11 }
 0x800   :  { %2044 = vmatpush.bf16.msrb.mxu1 %v5695_v40 }
 0x83f   :  { %v1705_v2 = vpop.f32.mrf.mxu0 }
 0x840   :  { %v1706_v55 = vadd.f32 %v1705_v2, %v5696_v54  ;;  %v1718_v61 = vpop.f32.mrf.mxu1  ;;  %v241_v2 = vadd.f32 %v5698_v47, %v5676_v62 }
 0x842   :  { %v1742_v26 = vadd.f32 %v1706_v55, %v4817_v46 }
 0x844   :  { %v3346_v1 = vmul.f32 -1.442695, %v1742_v26 }
 0x845   :  { %v1692_v5 = vpop.f32.mrf.mxu3 }
 0x846   :  { %3658 = vpow2.f32 %v3346_v1  ;;  %v1693_v21 = vadd.f32 %v1692_v5, %v5697_v15 }
 0x847   :  { %v1707_v53 = vpop.f32.mrf.mxu0 }
 0x848   :  { %v1722_v13 = vadd.f32 %v1693_v21, %v4815_v49  ;;  %v1720_v25 = vpop.f32.mrf.mxu1 }
 0x84a   :  { %v3345_v30 = vmul.f32 -1.442695, %v1722_v13 }
 0x84c   :  { %v3659_v59 = vpop.eup %3658  ;;  %3660 = vpow2.f32 %v3345_v30 }
 0x84d   :  { %v1746_v11 = vadd.f32 1.0, %v3659_v59  ;;  %v1694_v40 = vpop.f32.mrf.mxu3 }
 0x84f   :  { %3662 = vrcp.f32 %v1746_v11  ;;  %vm1752_vm10 = vweird.f32 %v1746_v11 }
 0x850   :  { %v1820_v54 = vpop.f32.mrf.mxu1 }
 0x851   :  { %v4885_v46 = vadd.f32 %v1820_v54, %v241_v2  ;;  %v4890_v2 = vld [vmem:[%s5356_s10] ss:$0 sm:$0xff] }
 0x852   :  { %v3661_v26 = vpop.eup %3660 }
 0x853   :  { %v1726_v1 = vadd.f32 1.0, %v3661_v26  ;;  %v1762_v26 = vadd.f32 %v4890_v2, %v4819_v50 }
 0x855   :  { %3664 = vrcp.f32 %v1726_v1  ;;  %v3663_v5 = vpop.eup %3662  ;;  %v1738_v30 = vand.u32 2147483648, %v1726_v1  ;;  %v1736_v40 = vand.u32 2147483647, %v1726_v1  ;;  %vm1732_vm6 = vweird.f32 %v1726_v1 }
 0x856   :  { %v1748_v55 = vmul.f32 %v3663_v5, %v1746_v11  ;;  %vm1753_vm9 = vweird.f32 %v3663_v5 }
 0x857   :  { %v1739_v54 = vor.u32 1.1754944e-38, %v1738_v30  ;;  %vm1737_vm8 = vcmp.eq.f32.partialorder %v1736_v40, 8.507059e+37  ;;  %vm1754_vm11 = vmor %vm1752_vm10, %vm1753_vm9 }
 0x858   :  { %v1822_v53 = vpop.f32.mrf.mxu1  ;;  %v1749_v21 = vsub.f32 1.0, %v1748_v55 }
 0x85a   :  { %v1750_v15 = vmul.f32 %v3663_v5, %v1749_v21  ;;  %v1719_v21 = vadd.f32 %v1718_v61, %v4530_v24 }
 0x85b   :  { %v3665_v49 = vpop.eup %3664 }
 0x85c   :  { %v1728_v25 = vmul.f32 %v3665_v49, %v1726_v1  ;;  %vm1733_vm5 = vweird.f32 %v3665_v49  ;;  %v1751_v55 = vadd.f32 %v3663_v5, %v1750_v15  ;;  %v1756_v1 = vand.u32 2147483647, %v1746_v11 }
 0x85d   :  { %vm1734_vm7 = vmor %vm1732_vm6, %vm1733_vm5 }
 0x85e   :  { %v1729_v13 = vsub.f32 1.0, %v1728_v25  ;;  %v1755_v62 = vsel %vm1754_vm11, %v3663_v5, %v1751_v55  ;;  %vm1757_vm12 = vcmp.eq.f32.partialorder %v1756_v1, 8.507059e+37  ;;  %v5706_v5 = vld [vmem:[#allocation42_spill] sm:$0xff]  ;;  %v5711_v55 = vld [vmem:[#allocation24_spill] sm:$0xff] }
 0x85f   :  { %v5716_v1 = vld [vmem:[#allocation32_spill] sm:$0xff] }
 0x860   :  { %v1730_v59 = vmul.f32 %v3665_v49, %v1729_v13  ;;  %v1758_v13 = vand.u32 2147483648, %v1746_v11  ;;  %v5705_v11 = vld [vmem:[#allocation34_spill] sm:$0xff] }
 0x862   :  { %v1731_v47 = vadd.f32 %v3665_v49, %v1730_v59  ;;  %v1759_v42 = vor.u32 1.1754944e-38, %v1758_v13  ;;  %v5713_v13 = vld [vmem:[#allocation27_spill] sm:$0xff] }
 0x864   :  { %v1735_v53 = vsel %vm1734_vm7, %v3665_v49, %v1731_v47  ;;  %v1760_v37 = vsel %vm1757_vm12, %v1759_v42, %v1755_v62  ;;  %v5702_v62 = vld [vmem:[#allocation41_spill] sm:$0xff]  ;;  %v5707_v47 = vld [vmem:[#allocation18_spill] sm:$0xff] }
 0x865   :  { %v1740_v25 = vsel %vm1737_vm8, %v1739_v54, %v1735_v53  ;;  %v1766_v31 = vsub.f32 1.0, %v1760_v37  ;;  %v1768_v15 = vmul.f32 %v1760_v37, %v4766_v51  ;;  %v5700_v37 = vld [vmem:[#allocation76_spill] sm:$0xff]  ;;  %v5701_v51 = vld [vmem:[#allocation31_spill] sm:$0xff]  ;;  %v5703_v42 = vld [vmem:[#allocation77_spill] sm:$0xff] }
 0x866   :  { %v1763_v59 = vmul.f32 %v1762_v26, %v1740_v25  ;;  %v5708_v54 = vld [vmem:[#allocation20_spill] sm:$0xff]  ;;  %v5709_v26 = vld [vmem:[#allocation21_spill] sm:$0xff]  ;;  %v5710_v53 = vld [vmem:[#allocation22_spill] sm:$0xff] }
 0x867   :  { %v5712_v25 = vld [vmem:[#allocation25_spill] sm:$0xff] }
 0x868   :  { %v1764_v30 = vadd.f32 %v1763_v59, %v1719_v21  ;;  %v5714_v21 = vld [vmem:[#allocation29_spill] sm:$0xff]  ;;  %v5715_v59 = vld [vmem:[#allocation30_spill] sm:$0xff] }
 0x86a   :  { %3666 = vtanh.f32 %v1764_v30  ;;  %v5717_v30 = vld [vmem:[#allocation33_spill] sm:$0xff] }
 0x870   :  { %v3667_v50 = vpop.eup %3666 }
 0x871   :  { %v1767_v49 = vmul.f32 %v3667_v50, %v1766_v31  ;;  %v5699_v31 = vld [vmem:[#allocation40_spill] sm:$0xff]  ;;  %v5718_v50 = vld [vmem:[#allocation37_spill] sm:$0xff] }
 0x873   :  { %v4896_v40 = vadd.f32 %v1768_v15, %v1767_v49  ;;  %v5719_v49 = vld [vmem:[#allocation35_spill] sm:$0xff]  ;;  %v5720_v15 = vld [vmem:[#allocation38_spill] sm:$0xff] }
 0x875   :  { %v1770_v61 = vpack.c.bf16 %v4896_v40, %v4896_v40 }
 0x877   :  { %1779 = vmatmul.bf16.vlgmr.msrb.gmra.mxu2 %v1770_v61  ;;  %1792 = vmatmul.bf16.vlgmr.msra.gmra.mxu3 %v1770_v61 }
 0x878   :  { %1805 = vmatmul.bf16.vlgmr.msra.gmra.mxu0 %v1770_v61  ;;  %1949 = vmatpush.bf16.msrb.mxu2 %v4332_v6  ;;  %v5721_v61 = vld [vmem:[#allocation36_spill] sm:$0xff] }
 0x879   :  { %2011 = vmatpush.bf16.msra.mxu3 %v4101_v17  ;;  %2024 = vmatpush.bf16.msra.mxu0 %v4175_v22 }
 0x87c   :  { %1950 = vmatpush.bf16.msrb.mxu2 %v4354_v4 }
 0x87d   :  { %2012 = vmatpush.bf16.msra.mxu3 %v4106_v20  ;;  %2025 = vmatpush.bf16.msra.mxu0 %v4185_v34 }
 0x880   :  { %1951 = vmatpush.bf16.msrb.mxu2 %v4360_v45 }
 0x881   :  { %2013 = vmatpush.bf16.msra.mxu3 %v5563_v41  ;;  %2026 = vmatpush.bf16.msra.mxu0 %v4194_v44 }
 0x884   :  { %1952 = vmatpush.bf16.msrb.mxu2 %v5564_v58 }
 0x885   :  { %2014 = vmatpush.bf16.msra.mxu3 %v5565_v48  ;;  %2027 = vmatpush.bf16.msra.mxu0 %v4204_v52 }
 0x887   :  { %1832 = vmatmul.bf16.vlgmr.msra.gmra.mxu2 %v4856_v10  ;;  %1845 = vmatmul.bf16.vlgmr.msrb.gmra.mxu3 %v4856_v10  ;;  %v5704_v10 = vld [vmem:[#allocation17_spill] sm:$0xff] }
 0x888   :  { %1953 = vmatpush.bf16.msrb.mxu2 %v5566_v39 }
 0x889   :  { %2015 = vmatpush.bf16.msra.mxu3 %v5567_v36  ;;  %2028 = vmatpush.bf16.msra.mxu0 %v4208_v57 }
 0x88c   :  { %1954 = vmatpush.bf16.msrb.mxu2 %v5568_v38 }
 0x88d   :  { %2016 = vmatpush.bf16.msra.mxu3 %v5610_v19  ;;  %2029 = vmatpush.bf16.msra.mxu0 %v5699_v31 }
 0x890   :  { %1955 = vmatpush.bf16.msrb.mxu2 %v5700_v37 }
 0x891   :  { %2017 = vmatpush.bf16.msra.mxu3 %v5701_v51  ;;  %2030 = vmatpush.bf16.msra.mxu0 %v5702_v62 }
 0x894   :  { %1956 = vmatpush.bf16.msrb.mxu2 %v5703_v42 }
 0x895   :  { %2018 = vmatpush.bf16.msra.mxu3 %v5705_v11  ;;  %2031 = vmatpush.bf16.msra.mxu0 %v5706_v5 }
 0x898   :  { %2051 = vmatpush.bf16.msra.mxu2 %v5704_v10  ;;  %v5722_v10 = vld [vmem:[#allocation57_spill] sm:$0xff] }
 0x899   :  { %2064 = vmatpush.bf16.msrb.mxu3 %v5707_v47 }
 0x89c   :  { %2052 = vmatpush.bf16.msra.mxu2 %v5708_v54 }
 0x89d   :  { %2065 = vmatpush.bf16.msrb.mxu3 %v5709_v26 }
 0x8a0   :  { %2053 = vmatpush.bf16.msra.mxu2 %v5710_v53 }
 0x8a1   :  { %2066 = vmatpush.bf16.msrb.mxu3 %v5711_v55 }
 0x8a4   :  { %2054 = vmatpush.bf16.msra.mxu2 %v5712_v25  ;;  %v3347_v25 = vmul.f32 -1.442695, %v4885_v46 }
 0x8a5   :  { %2067 = vmatpush.bf16.msrb.mxu3 %v5713_v13 }
 0x8a6   :  { %3668 = vpow2.f32 %v3347_v25 }
 0x8a8   :  { %2055 = vmatpush.bf16.msra.mxu2 %v5714_v21 }
 0x8a9   :  { %2068 = vmatpush.bf16.msrb.mxu3 %v5715_v59 }
 0x8ac   :  { %2056 = vmatpush.bf16.msra.mxu2 %v5716_v1  ;;  %v3669_v13 = vpop.eup %3668 }
 0x8ad   :  { %2069 = vmatpush.bf16.msrb.mxu3 %v5717_v30  ;;  %v1854_v55 = vadd.f32 1.0, %v3669_v13 }
 0x8af   :  { %3670 = vrcp.f32 %v1854_v55  ;;  %v1866_v46 = vand.u32 2147483648, %v1854_v55  ;;  %vm1860_vm14 = vweird.f32 %v1854_v55  ;;  %v1864_v25 = vand.u32 2147483647, %v1854_v55 }
 0x8b0   :  { %2057 = vmatpush.bf16.msra.mxu2 %v5718_v50 }
 0x8b1   :  { %2070 = vmatpush.bf16.msrb.mxu3 %v5719_v49  ;;  %v1867_v11 = vor.u32 1.1754944e-38, %v1866_v46  ;;  %vm1865_vm0 = vcmp.eq.f32.partialorder %v1864_v25, 8.507059e+37 }
 0x8b4   :  { %2058 = vmatpush.bf16.msra.mxu2 %v5720_v15 }
 0x8b5   :  { %2071 = vmatpush.bf16.msrb.mxu3 %v5721_v61  ;;  %v3671_v59 = vpop.eup %3670 }
 0x8b6   :  { %v1856_v1 = vmul.f32 %v3671_v59, %v1854_v55  ;;  %vm1861_vm13 = vweird.f32 %v3671_v59 }
 0x8b7   :  { %vm1862_vm15 = vmor %vm1860_vm14, %vm1861_vm13 }
 0x8b8   :  { %v1857_v49 = vsub.f32 1.0, %v1856_v1 }
 0x8ba   :  { %v1858_v26 = vmul.f32 %v3671_v59, %v1857_v49 }
 0x8bc   :  { %v1859_v61 = vadd.f32 %v3671_v59, %v1858_v26 }
 0x8be   :  { %v1863_v13 = vsel %vm1862_vm15, %v3671_v59, %v1859_v61 }
 0x8f5   :  { %v4943_v21 = vpop.f32.mrf.mxu0 }
 0x8fa   :  { %v4945_v53 = vpop.f32.mrf.mxu2  ;;  %v4947_v30 = vpop.f32.mrf.mxu3 }
 0x8fd   :  { %v1808_v50 = vpop.f32.mrf.mxu0 }
 0x8fe   :  { %v1868_v50 = vsel %vm1865_vm0, %v1867_v11, %v1863_v13 }
 0x902   :  { %v1782_v15 = vpop.f32.mrf.mxu2  ;;  %v1795_v54 = vpop.f32.mrf.mxu3 }
 0x903   :  { %v5723_v54 = vld [vmem:[#allocation54_spill] sm:$0xff] }
 0x90a   :  { %v1833_v47 = vpop.f32.mrf.mxu2  ;;  %v1846_v5 = vpop.f32.mrf.mxu3 }
 0x90b   :  { %v1870_v42 = vadd.f32 %v1833_v47, %v5722_v10  ;;  %v1890_v62 = vadd.f32 %v4706_v60, %v1846_v5 }
 0x90d   :  { %v3348_v1 = vmul.f32 -1.442695, %v1870_v42  ;;  %v1891_v49 = vmul.f32 %v1890_v62, %v1868_v50 }
 0x90f   :  { %3672 = vpow2.f32 %v3348_v1  ;;  %v1892_v26 = vadd.f32 %v1891_v49, %v5723_v54 }
 0x912   :  { %v1835_v15 = vpop.f32.mrf.mxu2  ;;  %v1848_v51 = vpop.f32.mrf.mxu3 }
 0x915   :  { %v3673_v37 = vpop.eup %3672 }
 0x916   :  { %v1874_v55 = vadd.f32 1.0, %v3673_v37 }
 0x918   :  { %3674 = vrcp.f32 %v1874_v55  ;;  %v1886_v46 = vand.u32 2147483648, %v1874_v55  ;;  %v1884_v10 = vand.u32 2147483647, %v1874_v55  ;;  %vm1880_vm2 = vweird.f32 %v1874_v55 }
 0x919   :  { %3676 = vtanh.f32 %v1892_v26 }
 0x91a   :  { %v1887_v62 = vor.u32 1.1754944e-38, %v1886_v46  ;;  %vm1885_vm4 = vcmp.eq.f32.partialorder %v1884_v10, 8.507059e+37 }
 0x91e   :  { %v3675_v59 = vpop.eup %3674 }
 0x91f   :  { %v1876_v61 = vmul.f32 %v3675_v59, %v1874_v55  ;;  %vm1881_vm1 = vweird.f32 %v3675_v59  ;;  %v3677_v51 = vpop.eup %3676 }
 0x920   :  { %vm1882_vm3 = vmor %vm1880_vm2, %vm1881_vm1 }
 0x921   :  { %v1877_v31 = vsub.f32 1.0, %v1876_v61 }
 0x923   :  { %v1878_v19 = vmul.f32 %v3675_v59, %v1877_v31 }
 0x925   :  { %v1879_v60 = vadd.f32 %v3675_v59, %v1878_v19 }
 0x927   :  { %v1883_v42 = vsel %vm1882_vm3, %v3675_v59, %v1879_v60 }
 0x928   :  { %v1888_v11 = vsel %vm1885_vm4, %v1887_v62, %v1883_v42 }
 0x929   :  { %v1894_v5 = vsub.f32 1.0, %v1888_v11  ;;  %v1896_v37 = vmul.f32 %v1888_v11, %v4827_v32 }
 0x92b   :  { %v1895_v47 = vmul.f32 %v3677_v51, %v1894_v5 }
 0x92d   :  { %v4953_v25 = vadd.f32 %v1896_v37, %v1895_v47  ;;  %v5724_v47 = vld [vmem:[#allocation78_spill] sm:$0xff]  ;;  %v5725_v37 = vld [vmem:[#allocation79_spill] sm:$0xff] }
 0x92f   :  { %1898 = vadd.xlane.f32.xlu2 %v4953_v25  ;;  %v1900_v31 = vmul.f32 %v4953_v25, %v4953_v25  ;;  %v4975_v51 = vpack.c.bf16 %v4953_v25, %v4953_v25 }
 0x931   :  { %1901 = vadd.xlane.f32.xlu0 %v1900_v31  ;;  %v5726_v31 = vld [vmem:[#allocation43_spill] sm:$0xff] }
 0x9a2   :  { %v1899_v19 = vpop.xlane.xlu2 %1898 }
 0x9a3   :  { %v1903_v13 = vmul.f32 0.03125, %v1899_v19  ;;  %v5727_v19 = vld [vmem:[#allocation80_spill] sm:$0xff] }
 0x9a4   :  { %v1902_v50 = vpop.xlane.xlu0 %1901 }
 0x9a5   :  { %v1905_v1 = vmul.f32 %v1903_v13, %v1903_v13  ;;  %v1904_v49 = vmul.f32 0.03125, %v1902_v50  ;;  %v1907_v10 = vsub.f32 %v4953_v25, %v1903_v13  ;;  %v5728_v13 = vld [vmem:[#allocation81_spill] sm:$0xff]  ;;  %v5729_v50 = vld [vmem:[#allocation44_spill] sm:$0xff] }
 0x9a7   :  { %v1906_v54 = vsub.f32 %v1904_v49, %v1905_v1  ;;  %v5730_v1 = vld [vmem:[#allocation82_spill] sm:$0xff]  ;;  %v5731_v49 = vld [vmem:[#allocation83_spill] sm:$0xff] }
 0x9a9   :  { %v1908_v26 = vadd.f32 1e-05, %v1906_v54  ;;  %v5732_v54 = vld [vmem:[#allocation65_spill] sm:$0xff] }
 0x9ab   :  { %3678 = vrsqrt.f32 %v1908_v26  ;;  %vm1915_vm6 = vweird.f32 %v1908_v26 }
 0x9b1   :  { %v3679_v15 = vpop.eup %3678 }
 0x9b2   :  { %v1910_v55 = vmul.f32 %v3679_v15, %v1908_v26  ;;  %vm1916_vm5 = vweird.f32 %v3679_v15  ;;  %v5733_v26 = vld [vmem:[#allocation66_spill] sm:$0xff] }
 0x9b3   :  { %vm1917_vm7 = vmor %vm1915_vm6, %vm1916_vm5 }
 0x9b4   :  { %v1911_v59 = vmul.f32 %v3679_v15, %v1910_v55  ;;  %v5735_v55 = vld [vmem:[#allocation68_spill] sm:$0xff] }
 0x9b6   :  { %v1912_v32 = vmul.f32 0.5, %v1911_v59  ;;  %v5736_v59 = vld [vmem:[#allocation69_spill] sm:$0xff] }
 0x9b8   :  { %v1913_v61 = vsub.f32 1.5, %v1912_v32  ;;  %v5737_v32 = vld [vmem:[#allocation70_spill] sm:$0xff] }
 0x9ba   :  { %v1914_v46 = vmul.f32 %v3679_v15, %v1913_v61  ;;  %v5738_v61 = vld [vmem:[#allocation71_spill] sm:$0xff] }
 0x9bc   :  { %v1918_v60 = vsel %vm1917_vm7, %v3679_v15, %v1914_v46  ;;  %v5734_v15 = vld [vmem:[#allocation67_spill] sm:$0xff]  ;;  %v5739_v46 = vld [vmem:[#allocation72_spill] sm:$0xff] }
 0x9bd   :  { %v1919_v62 = vmul.f32 %v1918_v60, %v1907_v10 }
 0x9bf   :  { %v1920_v42 = vmul.f32 %v4836_v8, %v1919_v62  ;;  %v5740_v62 = vld [vmem:[#allocation88_spill] sm:$0xff] }
 0x9c1   :  { %v1921_v11 = vadd.f32 %v4839_v7, %v1920_v42 }
 0x9c3   :  { %v1922_v5 = vpack.c.bf16 %v1921_v11, %v1921_v11  ;;  %v5741_v11 = vld [vmem:[#allocation89_spill] sm:$0xff] }
 0x9c5   :  { %1931 = vmatmul.bf16.vlgmr.msrb.gmra.mxu0 %v1922_v5  ;;  %1944 = vmatmul.bf16.vlgmr.msra.gmra.mxu1 %v1922_v5 }
 0x9c6   :  { %1957 = vmatmul.bf16.vlgmr.msrb.gmra.mxu2 %v1922_v5  ;;  %2077 = vmatpush.bf16.msrb.mxu0 %v4222_v12 }
 0x9c7   :  { %2163 = vmatpush.bf16.msra.mxu1 %v4368_v63  ;;  %2176 = vmatpush.bf16.msrb.mxu2 %v4371_v3 }
 0x9ca   :  { %2078 = vmatpush.bf16.msrb.mxu0 %v4226_v16 }
 0x9cb   :  { %2164 = vmatpush.bf16.msra.mxu1 %v4378_v18  ;;  %2177 = vmatpush.bf16.msrb.mxu2 %v4381_v33 }
 0x9ce   :  { %2079 = vmatpush.bf16.msrb.mxu0 %v4230_v23 }
 0x9cf   :  { %2165 = vmatpush.bf16.msra.mxu1 %v4388_v14  ;;  %2178 = vmatpush.bf16.msrb.mxu2 %v4390_v28 }
 0x9d2   :  { %2080 = vmatpush.bf16.msrb.mxu0 %v4236_v29 }
 0x9d3   :  { %2166 = vmatpush.bf16.msra.mxu1 %v4397_v9  ;;  %2179 = vmatpush.bf16.msrb.mxu2 %v4399_v27 }
 0x9d6   :  { %2059 = vmatmul.bf16.vlgmr.msra.gmra.mxu2 %v4975_v51  ;;  %2081 = vmatpush.bf16.msrb.mxu0 %v4239_v35 }
 0x9d7   :  { %2167 = vmatpush.bf16.msra.mxu1 %v4406_v56  ;;  %2180 = vmatpush.bf16.msrb.mxu2 %v4408_v0 }
 0x9da   :  { %2082 = vmatpush.bf16.msrb.mxu0 %v4242_v43 }
 0x9db   :  { %2168 = vmatpush.bf16.msra.mxu1 %v5724_v47  ;;  %2181 = vmatpush.bf16.msrb.mxu2 %v5725_v37 }
 0x9de   :  { %2083 = vmatpush.bf16.msrb.mxu0 %v5726_v31 }
 0x9df   :  { %2169 = vmatpush.bf16.msra.mxu1 %v5727_v19  ;;  %2182 = vmatpush.bf16.msrb.mxu2 %v5728_v13 }
 0x9e2   :  { %2084 = vmatpush.bf16.msrb.mxu0 %v5729_v50 }
 0x9e3   :  { %2170 = vmatpush.bf16.msra.mxu1 %v5730_v1  ;;  %2183 = vmatpush.bf16.msrb.mxu2 %v5731_v49 }
 0x9e7   :  { %2277 = vmatpush.bf16.msra.mxu2 %v5732_v54 }
 0x9eb   :  { %2278 = vmatpush.bf16.msra.mxu2 %v5733_v26 }
 0x9ef   :  { %2279 = vmatpush.bf16.msra.mxu2 %v5734_v15 }
 0x9f3   :  { %2280 = vmatpush.bf16.msra.mxu2 %v5735_v55 }
 0x9f7   :  { %2281 = vmatpush.bf16.msra.mxu2 %v5736_v59 }
 0x9fb   :  { %2282 = vmatpush.bf16.msra.mxu2 %v5737_v32 }
 0x9ff   :  { %2283 = vmatpush.bf16.msra.mxu2 %v5738_v61 }
 0xa03   :  { %2284 = vmatpush.bf16.msra.mxu2 %v5739_v46 }
 0xa42   :  { %v1932_v10 = vpop.f32.mrf.mxu0  ;;  %v1945_v60 = vpop.f32.mrf.mxu1 }
 0xa43   :  { %v1933_v42 = vadd.f32 %v1932_v10, %v5740_v62  ;;  %v1946_v5 = vadd.f32 %v1945_v60, %v5741_v11 }
 0xa45   :  { %v1962_v26 = vadd.f32 %v1933_v42, %v4945_v53  ;;  %v1982_v15 = vadd.f32 %v1946_v5, %v4947_v30 }
 0xa47   :  { %v3349_v54 = vmul.f32 -1.442695, %v1962_v26  ;;  %v3350_v55 = vmul.f32 -1.442695, %v1982_v15 }
 0xa49   :  { %3680 = vpow2.f32 %v3349_v54  ;;  %v1958_v59 = vpop.f32.mrf.mxu2 }
 0xa4a   :  { %3682 = vpow2.f32 %v3350_v55  ;;  %v1934_v32 = vpop.f32.mrf.mxu0  ;;  %v1947_v49 = vpop.f32.mrf.mxu1 }
 0xa4f   :  { %v3681_v61 = vpop.eup %3680 }
 0xa50   :  { %v3683_v1 = vpop.eup %3682  ;;  %v1966_v46 = vadd.f32 1.0, %v3681_v61 }
 0xa51   :  { %v1986_v50 = vadd.f32 1.0, %v3683_v1  ;;  %v1960_v13 = vpop.f32.mrf.mxu2 }
 0xa52   :  { %3684 = vrcp.f32 %v1966_v46  ;;  %v1978_v54 = vand.u32 2147483648, %v1966_v46  ;;  %v1976_v55 = vand.u32 2147483647, %v1966_v46  ;;  %vm1972_vm9 = vweird.f32 %v1966_v46 }
 0xa53   :  { %3686 = vrcp.f32 %v1986_v50  ;;  %v2002_v13 = vadd.f32 %v4890_v2, %v4943_v21  ;;  %vm1992_vm13 = vweird.f32 %v1986_v50  ;;  %v1996_v31 = vand.u32 2147483647, %v1986_v50 }
 0xa54   :  { %v1979_v1 = vor.u32 1.1754944e-38, %v1978_v54  ;;  %vm1977_vm11 = vcmp.eq.f32.partialorder %v1976_v55, 8.507059e+37 }
 0xa55   :  { %vm1997_vm15 = vcmp.eq.f32.partialorder %v1996_v31, 8.507059e+37  ;;  %v5743_v31 = vld [vmem:[#allocation40_spill] sm:$0xff] }
 0xa58   :  { %v3685_v10 = vpop.eup %3684 }
 0xa59   :  { %v3687_v60 = vpop.eup %3686  ;;  %v1968_v11 = vmul.f32 %v3685_v10, %v1966_v46  ;;  %v5002_v53 = vpop.f32.mrf.mxu2  ;;  %vm1973_vm8 = vweird.f32 %v3685_v10 }
 0xa5a   :  { %v1988_v30 = vmul.f32 %v3687_v60, %v1986_v50  ;;  %vm1974_vm10 = vmor %vm1972_vm9, %vm1973_vm8  ;;  %vm1993_vm12 = vweird.f32 %v3687_v60 }
 0xa5b   :  { %v1969_v26 = vsub.f32 1.0, %v1968_v11  ;;  %v1998_v11 = vand.u32 2147483648, %v1986_v50  ;;  %vm1994_vm14 = vmor %vm1992_vm13, %vm1993_vm12  ;;  %v5745_v50 = vld [vmem:[#allocation31_spill] sm:$0xff] }
 0xa5c   :  { %v1989_v15 = vsub.f32 1.0, %v1988_v30  ;;  %v1959_v30 = vadd.f32 %v1958_v59, %v4530_v24 }
 0xa5d   :  { %v1970_v42 = vmul.f32 %v3685_v10, %v1969_v26 }
 0xa5e   :  { %v1990_v49 = vmul.f32 %v3687_v60, %v1989_v15 }
 0xa5f   :  { %v1971_v32 = vadd.f32 %v3685_v10, %v1970_v42  ;;  %v1999_v42 = vor.u32 1.1754944e-38, %v1998_v11  ;;  %v5753_v11 = vld [vmem:[#allocation21_spill] sm:$0xff] }
 0xa60   :  { %v1991_v19 = vadd.f32 %v3687_v60, %v1990_v49 }
 0xa61   :  { %v1975_v61 = vsel %vm1974_vm10, %v3685_v10, %v1971_v32  ;;  %v2062_v5 = vpop.f32.mrf.mxu2 }
 0xa62   :  { %v1980_v62 = vsel %vm1977_vm11, %v1979_v1, %v1975_v61  ;;  %v1995_v46 = vsel %vm1994_vm14, %v3687_v60, %v1991_v19  ;;  %v5744_v19 = vld [vmem:[#allocation76_spill] sm:$0xff]  ;;  %v5747_v60 = vld [vmem:[#allocation77_spill] sm:$0xff]  ;;  %v5749_v1 = vld [vmem:[#allocation34_spill] sm:$0xff] }
 0xa63   :  { %v2003_v26 = vmul.f32 %v2002_v13, %v1980_v62  ;;  %v2000_v54 = vsel %vm1997_vm15, %v1999_v42, %v1995_v46  ;;  %v5746_v62 = vld [vmem:[#allocation41_spill] sm:$0xff]  ;;  %v5750_v13 = vld [vmem:[#allocation42_spill] sm:$0xff]  ;;  %v5752_v5 = vld [vmem:[#allocation20_spill] sm:$0xff] }
 0xa64   :  { %v2006_v21 = vsub.f32 1.0, %v2000_v54  ;;  %v2008_v32 = vmul.f32 %v2000_v54, %v4896_v40  ;;  %v5742_v40 = vld [vmem:[#allocation28_spill] sm:$0xff]  ;;  %v5751_v61 = vld [vmem:[#allocation18_spill] sm:$0xff]  ;;  %v5757_v46 = vld [vmem:[#allocation27_spill] sm:$0xff] }
 0xa65   :  { %v2004_v15 = vadd.f32 %v2003_v26, %v1959_v30  ;;  %v5754_v30 = vld [vmem:[#allocation22_spill] sm:$0xff]  ;;  %v5755_v26 = vld [vmem:[#allocation24_spill] sm:$0xff]  ;;  %v5758_v42 = vld [vmem:[#allocation29_spill] sm:$0xff] }
 0xa66   :  { %v5759_v54 = vld [vmem:[#allocation30_spill] sm:$0xff] }
 0xa67   :  { %3688 = vtanh.f32 %v2004_v15  ;;  %v5756_v15 = vld [vmem:[#allocation25_spill] sm:$0xff] }
 0xa6d   :  { %v3689_v10 = vpop.eup %3688 }
 0xa6e   :  { %v2007_v55 = vmul.f32 %v3689_v10, %v2006_v21  ;;  %v5760_v21 = vld [vmem:[#allocation32_spill] sm:$0xff]  ;;  %v5761_v10 = vld [vmem:[#allocation33_spill] sm:$0xff] }
 0xa70   :  { %v5008_v49 = vadd.f32 %v2008_v32, %v2007_v55  ;;  %v5762_v55 = vld [vmem:[#allocation37_spill] sm:$0xff]  ;;  %v5763_v32 = vld [vmem:[#allocation35_spill] sm:$0xff] }
 0xa72   :  { %v2010_v59 = vpack.c.bf16 %v5008_v49, %v5008_v49 }
 0xa74   :  { %2019 = vmatmul.bf16.vlgmr.msra.gmra.mxu3 %v2010_v59  ;;  %2032 = vmatmul.bf16.vlgmr.msra.gmra.mxu0 %v2010_v59 }
 0xa75   :  { %2045 = vmatmul.bf16.vlgmr.msrb.gmra.mxu1 %v2010_v59  ;;  %2189 = vmatpush.bf16.msra.mxu3 %v4332_v6  ;;  %v5764_v59 = vld [vmem:[#allocation38_spill] sm:$0xff] }
 0xa76   :  { %2251 = vmatpush.bf16.msra.mxu0 %v4101_v17  ;;  %2264 = vmatpush.bf16.msrb.mxu1 %v4175_v22 }
 0xa79   :  { %2190 = vmatpush.bf16.msra.mxu3 %v4354_v4 }
 0xa7a   :  { %2252 = vmatpush.bf16.msra.mxu0 %v4106_v20  ;;  %2265 = vmatpush.bf16.msrb.mxu1 %v4185_v34 }
 0xa7d   :  { %2191 = vmatpush.bf16.msra.mxu3 %v4360_v45 }
 0xa7e   :  { %2253 = vmatpush.bf16.msra.mxu0 %v5563_v41  ;;  %2266 = vmatpush.bf16.msrb.mxu1 %v4194_v44 }
 0xa81   :  { %2192 = vmatpush.bf16.msra.mxu3 %v5564_v58 }
 0xa82   :  { %2254 = vmatpush.bf16.msra.mxu0 %v5565_v48  ;;  %2267 = vmatpush.bf16.msrb.mxu1 %v4204_v52 }
 0xa84   :  { %2072 = vmatmul.bf16.vlgmr.msrb.gmra.mxu3 %v4975_v51  ;;  %2085 = vmatmul.bf16.vlgmr.msrb.gmra.mxu0 %v4975_v51  ;;  %v5748_v51 = vld [vmem:[#allocation17_spill] sm:$0xff] }
 0xa85   :  { %2193 = vmatpush.bf16.msra.mxu3 %v5566_v39 }
 0xa86   :  { %2255 = vmatpush.bf16.msra.mxu0 %v5567_v36  ;;  %2268 = vmatpush.bf16.msrb.mxu1 %v4208_v57 }
 0xa89   :  { %2194 = vmatpush.bf16.msra.mxu3 %v5568_v38 }
 0xa8a   :  { %2256 = vmatpush.bf16.msra.mxu0 %v5742_v40  ;;  %2269 = vmatpush.bf16.msrb.mxu1 %v5743_v31 }
 0xa8d   :  { %2195 = vmatpush.bf16.msra.mxu3 %v5744_v19  ;;  %v5772_v19 = vld [vmem:[#allocation59_spill] sm:$0xff] }
 0xa8e   :  { %2257 = vmatpush.bf16.msra.mxu0 %v5745_v50  ;;  %2270 = vmatpush.bf16.msrb.mxu1 %v5746_v62  ;;  %v5769_v50 = vld [vmem:[#allocation48_spill] sm:$0xff] }
 0xa91   :  { %2196 = vmatpush.bf16.msra.mxu3 %v5747_v60  ;;  %v5063_v60 = vld [vmem:[#allocation6] ss:$0 sm:$0xff] }
 0xa92   :  { %2258 = vmatpush.bf16.msra.mxu0 %v5749_v1  ;;  %2271 = vmatpush.bf16.msrb.mxu1 %v5750_v13  ;;  %5768 = vst [vmem:[#allocation19_spill] sm:$0xff] %v5063_v60 }
 0xa95   :  { %2291 = vmatpush.bf16.msrb.mxu3 %v5748_v51 }
 0xa96   :  { %2304 = vmatpush.bf16.msrb.mxu0 %v5751_v61 }
 0xa99   :  { %2292 = vmatpush.bf16.msrb.mxu3 %v5752_v5 }
 0xa9a   :  { %2305 = vmatpush.bf16.msrb.mxu0 %v5753_v11 }
 0xa9d   :  { %2293 = vmatpush.bf16.msrb.mxu3 %v5754_v30  ;;  %v5765_v30 = vld [vmem:[#allocation36_spill] sm:$0xff] }
 0xa9e   :  { %2306 = vmatpush.bf16.msrb.mxu0 %v5755_v26  ;;  %v5766_v26 = vld [vmem:[#allocation63_spill] sm:$0xff] }
 0xaa1   :  { %2294 = vmatpush.bf16.msrb.mxu3 %v5756_v15  ;;  %v5767_v15 = vld [vmem:[#allocation87_spill] sm:$0xff] }
 0xaa2   :  { %2307 = vmatpush.bf16.msrb.mxu0 %v5757_v46  ;;  %v243_v11 = vadd.f32 %v5767_v15, %v5766_v26 }
 0xaa4   :  { %v2090_v46 = vadd.f32 %v5002_v53, %v243_v11 }
 0xaa5   :  { %2295 = vmatpush.bf16.msrb.mxu3 %v5758_v42 }
 0xaa6   :  { %2308 = vmatpush.bf16.msrb.mxu0 %v5759_v54  ;;  %v3351_v42 = vmul.f32 -1.442695, %v2090_v46 }
 0xaa8   :  { %3690 = vpow2.f32 %v3351_v42 }
 0xaa9   :  { %2296 = vmatpush.bf16.msrb.mxu3 %v5760_v21 }
 0xaaa   :  { %2309 = vmatpush.bf16.msrb.mxu0 %v5761_v10 }
 0xaad   :  { %2297 = vmatpush.bf16.msrb.mxu3 %v5762_v55 }
 0xaae   :  { %2310 = vmatpush.bf16.msrb.mxu0 %v5763_v32  ;;  %v3691_v54 = vpop.eup %3690 }
 0xaaf   :  { %v2094_v5 = vadd.f32 1.0, %v3691_v54 }
 0xab1   :  { %2298 = vmatpush.bf16.msrb.mxu3 %v5764_v59  ;;  %3692 = vrcp.f32 %v2094_v5  ;;  %v2106_v53 = vand.u32 2147483648, %v2094_v5  ;;  %vm2100_vm1 = vweird.f32 %v2094_v5  ;;  %v2104_v11 = vand.u32 2147483647, %v2094_v5 }
 0xab2   :  { %2311 = vmatpush.bf16.msrb.mxu0 %v5765_v30 }
 0xab3   :  { %v2107_v51 = vor.u32 1.1754944e-38, %v2106_v53  ;;  %vm2105_vm3 = vcmp.eq.f32.partialorder %v2104_v11, 8.507059e+37 }
 0xab7   :  { %v3693_v21 = vpop.eup %3692 }
 0xab8   :  { %v2096_v10 = vmul.f32 %v3693_v21, %v2094_v5  ;;  %vm2101_vm0 = vweird.f32 %v3693_v21 }
 0xab9   :  { %vm2102_vm2 = vmor %vm2100_vm1, %vm2101_vm0 }
 0xaba   :  { %v2097_v32 = vsub.f32 1.0, %v2096_v10 }
 0xabc   :  { %v2098_v30 = vmul.f32 %v3693_v21, %v2097_v32  ;;  %v5770_v32 = vld [vmem:[#allocation56_spill] sm:$0xff] }
 0xabe   :  { %v2099_v15 = vadd.f32 %v3693_v21, %v2098_v30  ;;  %v5771_v30 = vld [vmem:[#allocation51_spill] sm:$0xff] }
 0xabf   :  { %v272_v31 = vadd.f32 %v5772_v19, %v5771_v30 }
 0xac0   :  { %v2103_v42 = vsel %vm2102_vm2, %v3693_v21, %v2099_v15 }
 0xac1   :  { %v2108_v62 = vsel %vm2105_vm3, %v2107_v51, %v2103_v42 }
 0xaf1   :  { %v5057_v61 = vpop.f32.mrf.mxu0 }
 0xaf2   :  { %v5059_v55 = vpop.f32.mrf.mxu1 }
 0xaf7   :  { %v5061_v59 = vpop.f32.mrf.mxu3 }
 0xaf9   :  { %v2035_v13 = vpop.f32.mrf.mxu0 }
 0xafa   :  { %v2048_v1 = vpop.f32.mrf.mxu1  ;;  %v301_v13 = vadd.f32 %v5770_v32, %v5769_v50 }
 0xaff   :  { %v2022_v46 = vpop.f32.mrf.mxu3 }
 0xb01   :  { %v2086_v54 = vpop.f32.mrf.mxu0 }
 0xb02   :  { %v2130_v10 = vadd.f32 %v5063_v60, %v2086_v54 }
 0xb04   :  { %v2131_v1 = vmul.f32 %v2130_v10, %v2108_v62 }
 0xb06   :  { %v2132_v40 = vadd.f32 %v2131_v1, %v301_v13 }
 0xb07   :  { %v2073_v5 = vpop.f32.mrf.mxu3 }
 0xb08   :  { %v2110_v46 = vadd.f32 %v2073_v5, %v272_v31 }
 0xb09   :  { %v2088_v38 = vpop.f32.mrf.mxu0 }
 0xb0a   :  { %v3352_v21 = vmul.f32 -1.442695, %v2110_v46 }
 0xb0c   :  { %3694 = vpow2.f32 %v3352_v21 }
 0xb0f   :  { %v2075_v15 = vpop.f32.mrf.mxu3 }
 0xb12   :  { %v3695_v53 = vpop.eup %3694 }
 0xb13   :  { %v2114_v11 = vadd.f32 1.0, %v3695_v53 }
 0xb15   :  { %3696 = vrcp.f32 %v2114_v11  ;;  %v2126_v42 = vand.u32 2147483648, %v2114_v11  ;;  %v2124_v62 = vand.u32 2147483647, %v2114_v11  ;;  %vm2120_vm5 = vweird.f32 %v2114_v11 }
 0xb16   :  { %3698 = vtanh.f32 %v2132_v40 }
 0xb17   :  { %v2127_v19 = vor.u32 1.1754944e-38, %v2126_v42  ;;  %vm2125_vm7 = vcmp.eq.f32.partialorder %v2124_v62, 8.507059e+37 }
 0xb1b   :  { %v3697_v57 = vpop.eup %3696 }
 0xb1c   :  { %v2116_v54 = vmul.f32 %v3697_v57, %v2114_v11  ;;  %vm2121_vm4 = vweird.f32 %v3697_v57  ;;  %v3699_v13 = vpop.eup %3698 }
 0xb1d   :  { %vm2122_vm6 = vmor %vm2120_vm5, %vm2121_vm4 }
 0xb1e   :  { %v2117_v51 = vsub.f32 1.0, %v2116_v54 }
 0xb20   :  { %v2118_v60 = vmul.f32 %v3697_v57, %v2117_v51 }
 0xb22   :  { %v2119_v10 = vadd.f32 %v3697_v57, %v2118_v60 }
 0xb24   :  { %v2123_v38 = vsel %vm2122_vm6, %v3697_v57, %v2119_v10 }
 0xb25   :  { %v2128_v31 = vsel %vm2125_vm7, %v2127_v19, %v2123_v38 }
 0xb26   :  { %v2134_v32 = vsub.f32 1.0, %v2128_v31  ;;  %v2136_v5 = vmul.f32 %v2128_v31, %v4953_v25 }
 0xb28   :  { %v2135_v1 = vmul.f32 %v3699_v13, %v2134_v32 }
 0xb2a   :  { %v5071_v46 = vadd.f32 %v2136_v5, %v2135_v1 }
 0xb2c   :  { %2138 = vadd.xlane.f32.xlu1 %v5071_v46  ;;  %v2140_v21 = vmul.f32 %v5071_v46, %v5071_v46 }
 0xb2e   :  { %2141 = vadd.xlane.f32.xlu2 %v2140_v21  ;;  %v5774_v21 = vld [vmem:[#allocation80_spill] sm:$0xff] }
 0xb9f   :  { %v2139_v40 = vpop.xlane.xlu1 %2138 }
 0xba0   :  { %v2143_v60 = vmul.f32 0.03125, %v2139_v40  ;;  %v5775_v40 = vld [vmem:[#allocation81_spill] sm:$0xff] }
 0xba1   :  { %v2142_v15 = vpop.xlane.xlu2 %2141 }
 0xba2   :  { %v2145_v53 = vmul.f32 %v2143_v60, %v2143_v60  ;;  %v2144_v11 = vmul.f32 0.03125, %v2142_v15  ;;  %v2147_v38 = vsub.f32 %v5071_v46, %v2143_v60  ;;  %v5776_v60 = vld [vmem:[#allocation44_spill] sm:$0xff]  ;;  %v5777_v15 = vld [vmem:[#allocation82_spill] sm:$0xff] }
 0xba4   :  { %v2146_v57 = vsub.f32 %v2144_v11, %v2145_v53  ;;  %v5778_v53 = vld [vmem:[#allocation83_spill] sm:$0xff]  ;;  %v5779_v11 = vld [vmem:[#allocation65_spill] sm:$0xff] }
 0xba6   :  { %v2148_v54 = vadd.f32 1e-05, %v2146_v57  ;;  %v5780_v57 = vld [vmem:[#allocation66_spill] sm:$0xff] }
 0xba8   :  { %3700 = vrsqrt.f32 %v2148_v54  ;;  %vm2155_vm9 = vweird.f32 %v2148_v54 }
 0xbae   :  { %v3701_v51 = vpop.eup %3700 }
 0xbaf   :  { %v2150_v42 = vmul.f32 %v3701_v51, %v2148_v54  ;;  %vm2156_vm8 = vweird.f32 %v3701_v51  ;;  %v5781_v54 = vld [vmem:[#allocation67_spill] sm:$0xff] }
 0xbb0   :  { %vm2157_vm10 = vmor %vm2155_vm9, %vm2156_vm8 }
 0xbb1   :  { %v2151_v62 = vmul.f32 %v3701_v51, %v2150_v42  ;;  %v5783_v42 = vld [vmem:[#allocation69_spill] sm:$0xff] }
 0xbb3   :  { %v2152_v25 = vmul.f32 0.5, %v2151_v62  ;;  %v5784_v62 = vld [vmem:[#allocation70_spill] sm:$0xff] }
 0xbb5   :  { %v2153_v10 = vsub.f32 1.5, %v2152_v25  ;;  %v5785_v25 = vld [vmem:[#allocation71_spill] sm:$0xff] }
 0xbb7   :  { %v2154_v19 = vmul.f32 %v3701_v51, %v2153_v10  ;;  %v5786_v10 = vld [vmem:[#allocation72_spill] sm:$0xff] }
 0xbb9   :  { %v2158_v31 = vsel %vm2157_vm10, %v3701_v51, %v2154_v19  ;;  %v5782_v51 = vld [vmem:[#allocation68_spill] sm:$0xff] }
 0xbba   :  { %v2159_v32 = vmul.f32 %v2158_v31, %v2147_v38  ;;  %v5787_v38 = vld [vmem:[#allocation88_spill] sm:$0xff] }
 0xbbc   :  { %v2160_v13 = vmul.f32 %v4836_v8, %v2159_v32  ;;  %v5093_v8 = vpack.c.bf16 %v5071_v46, %v5071_v46 }
 0xbbe   :  { %v2161_v1 = vadd.f32 %v4839_v7, %v2160_v13  ;;  %v5773_v7 = vld [vmem:[#allocation43_spill] sm:$0xff] }
 0xbc0   :  { %v2162_v5 = vpack.c.bf16 %v2161_v1, %v2161_v1 }
 0xbc2   :  { %2171 = vmatmul.bf16.vlgmr.msra.gmra.mxu1 %v2162_v5  ;;  %2184 = vmatmul.bf16.vlgmr.msrb.gmra.mxu2 %v2162_v5 }
 0xbc3   :  { %2197 = vmatmul.bf16.vlgmr.msra.gmra.mxu3 %v2162_v5  ;;  %2317 = vmatpush.bf16.msra.mxu1 %v4222_v12  ;;  %v5788_v5 = vld [vmem:[#allocation89_spill] sm:$0xff] }
 0xbc4   :  { %2403 = vmatpush.bf16.msrb.mxu2 %v4368_v63  ;;  %2416 = vmatpush.bf16.msra.mxu3 %v4371_v3 }
 0xbc7   :  { %2318 = vmatpush.bf16.msra.mxu1 %v4226_v16 }
 0xbc8   :  { %2404 = vmatpush.bf16.msrb.mxu2 %v4378_v18  ;;  %2417 = vmatpush.bf16.msra.mxu3 %v4381_v33 }
 0xbcb   :  { %2319 = vmatpush.bf16.msra.mxu1 %v4230_v23 }
 0xbcc   :  { %2405 = vmatpush.bf16.msrb.mxu2 %v4388_v14  ;;  %2418 = vmatpush.bf16.msra.mxu3 %v4390_v28 }
 0xbcf   :  { %2320 = vmatpush.bf16.msra.mxu1 %v4236_v29 }
 0xbd0   :  { %2406 = vmatpush.bf16.msrb.mxu2 %v4397_v9  ;;  %2419 = vmatpush.bf16.msra.mxu3 %v4399_v27 }
 0xbd3   :  { %2299 = vmatmul.bf16.vlgmr.msrb.gmra.mxu3 %v5093_v8  ;;  %2321 = vmatpush.bf16.msra.mxu1 %v4239_v35 }
 0xbd4   :  { %2407 = vmatpush.bf16.msrb.mxu2 %v4406_v56  ;;  %2420 = vmatpush.bf16.msra.mxu3 %v4408_v0 }
 0xbd7   :  { %2322 = vmatpush.bf16.msra.mxu1 %v4242_v43 }
 0xbd8   :  { %2408 = vmatpush.bf16.msrb.mxu2 %v5724_v47  ;;  %2421 = vmatpush.bf16.msra.mxu3 %v5725_v37 }
 0xbdb   :  { %2323 = vmatpush.bf16.msra.mxu1 %v5773_v7 }
 0xbdc   :  { %2409 = vmatpush.bf16.msrb.mxu2 %v5774_v21  ;;  %2422 = vmatpush.bf16.msra.mxu3 %v5775_v40 }
 0xbdf   :  { %2324 = vmatpush.bf16.msra.mxu1 %v5776_v60 }
 0xbe0   :  { %2410 = vmatpush.bf16.msrb.mxu2 %v5777_v15  ;;  %2423 = vmatpush.bf16.msra.mxu3 %v5778_v53 }
 0xbe4   :  { %2517 = vmatpush.bf16.msrb.mxu3 %v5779_v11 }
 0xbe8   :  { %2518 = vmatpush.bf16.msrb.mxu3 %v5780_v57 }
 0xbec   :  { %2519 = vmatpush.bf16.msrb.mxu3 %v5781_v54 }
 0xbf0   :  { %2520 = vmatpush.bf16.msrb.mxu3 %v5782_v51 }
 0xbf4   :  { %2521 = vmatpush.bf16.msrb.mxu3 %v5783_v42 }
 0xbf8   :  { %2522 = vmatpush.bf16.msrb.mxu3 %v5784_v62 }
 0xbfc   :  { %2523 = vmatpush.bf16.msrb.mxu3 %v5785_v25 }
 0xc00   :  { %2524 = vmatpush.bf16.msrb.mxu3 %v5786_v10 }
 0xc3f   :  { %v2172_v19 = vpop.f32.mrf.mxu1 }
 0xc40   :  { %v2173_v31 = vadd.f32 %v2172_v19, %v5787_v38 }
 0xc42   :  { %v2202_v32 = vadd.f32 %v2173_v31, %v5061_v59  ;;  %v5789_v59 = vld [vmem:[#allocation45_spill] sm:$0xff] }
 0xc43   :  { %v246_v31 = vadd.f32 %v5789_v59, %v5766_v26 }
 0xc44   :  { %v3353_v13 = vmul.f32 -1.442695, %v2202_v32 }
 0xc45   :  { %v2185_v1 = vpop.f32.mrf.mxu2 }
 0xc46   :  { %3702 = vpow2.f32 %v3353_v13  ;;  %v2186_v11 = vadd.f32 %v2185_v1, %v5788_v5  ;;  %v2198_v57 = vpop.f32.mrf.mxu3 }
 0xc47   :  { %v2174_v54 = vpop.f32.mrf.mxu1 }
 0xc48   :  { %v2222_v51 = vadd.f32 %v2186_v11, %v5057_v61 }
 0xc4a   :  { %v3354_v42 = vmul.f32 -1.442695, %v2222_v51 }
 0xc4c   :  { %v3703_v62 = vpop.eup %3702  ;;  %3704 = vpow2.f32 %v3354_v42 }
 0xc4d   :  { %v2206_v25 = vadd.f32 1.0, %v3703_v62  ;;  %v2187_v50 = vpop.f32.mrf.mxu2 }
 0xc4e   :  { %v2200_v10 = vpop.f32.mrf.mxu3 }
 0xc4f   :  { %3706 = vrcp.f32 %v2206_v25  ;;  %v2218_v61 = vand.u32 2147483648, %v2206_v25  ;;  %v2216_v51 = vand.u32 2147483647, %v2206_v25  ;;  %vm2212_vm12 = vweird.f32 %v2206_v25 }
 0xc50   :  { %v2242_v10 = vadd.f32 %v4890_v2, %v5059_v55 }
 0xc51   :  { %vm2217_vm14 = vcmp.eq.f32.partialorder %v2216_v51, 8.507059e+37 }
 0xc52   :  { %v3705_v30 = vpop.eup %3704 }
 0xc53   :  { %v2226_v19 = vadd.f32 1.0, %v3705_v30  ;;  %v2219_v30 = vor.u32 1.1754944e-38, %v2218_v61 }
 0xc55   :  { %v3707_v38 = vpop.eup %3706  ;;  %3708 = vrcp.f32 %v2226_v19  ;;  %v2236_v15 = vand.u32 2147483647, %v2226_v19  ;;  %vm2232_vm0 = vweird.f32 %v2226_v19 }
 0xc56   :  { %v2208_v32 = vmul.f32 %v3707_v38, %v2206_v25  ;;  %v2300_v13 = vpop.f32.mrf.mxu3  ;;  %vm2213_vm11 = vweird.f32 %v3707_v38 }
 0xc57   :  { %v5122_v1 = vadd.f32 %v2300_v13, %v246_v31  ;;  %vm2214_vm13 = vmor %vm2212_vm12, %vm2213_vm11  ;;  %v2199_v31 = vadd.f32 %v2198_v57, %v4530_v24  ;;  %vm2237_vm2 = vcmp.eq.f32.partialorder %v2236_v15, 8.507059e+37  ;;  %v5802_v15 = vld [vmem:[#allocation20_spill] sm:$0xff] }
 0xc58   :  { %v2209_v54 = vsub.f32 1.0, %v2208_v32 }
 0xc5a   :  { %v2210_v11 = vmul.f32 %v3707_v38, %v2209_v54  ;;  %v2238_v54 = vand.u32 2147483648, %v2226_v19 }
 0xc5b   :  { %v3709_v42 = vpop.eup %3708 }
 0xc5c   :  { %v2228_v50 = vmul.f32 %v3709_v42, %v2226_v19  ;;  %v2211_v62 = vadd.f32 %v3707_v38, %v2210_v11  ;;  %vm2233_vm15 = vweird.f32 %v3709_v42  ;;  %v2239_v60 = vor.u32 1.1754944e-38, %v2238_v54  ;;  %v5804_v19 = vld [vmem:[#allocation22_spill] sm:$0xff] }
 0xc5d   :  { %vm2234_vm1 = vmor %vm2232_vm0, %vm2233_vm15  ;;  %v5814_v54 = vld [vmem:[#allocation38_spill] sm:$0xff] }
 0xc5e   :  { %v2229_v59 = vsub.f32 1.0, %v2228_v50  ;;  %v2215_v26 = vsel %vm2214_vm13, %v3707_v38, %v2211_v62  ;;  %v2302_v5 = vpop.f32.mrf.mxu3  ;;  %v5806_v50 = vld [vmem:[#allocation25_spill] sm:$0xff]  ;;  %v5807_v62 = vld [vmem:[#allocation27_spill] sm:$0xff] }
 0xc5f   :  { %v2220_v32 = vsel %vm2217_vm14, %v2219_v30, %v2215_v26  ;;  %v5808_v30 = vld [vmem:[#allocation29_spill] sm:$0xff] }
 0xc60   :  { %v2230_v13 = vmul.f32 %v3709_v42, %v2229_v59  ;;  %v2243_v53 = vmul.f32 %v2242_v10, %v2220_v32  ;;  %v5809_v10 = vld [vmem:[#allocation30_spill] sm:$0xff]  ;;  %v5810_v59 = vld [vmem:[#allocation32_spill] sm:$0xff]  ;;  %v5812_v32 = vld [vmem:[#allocation37_spill] sm:$0xff] }
 0xc62   :  { %v2231_v11 = vadd.f32 %v3709_v42, %v2230_v13  ;;  %v2244_v25 = vadd.f32 %v2243_v53, %v2199_v31  ;;  %v5803_v53 = vld [vmem:[#allocation21_spill] sm:$0xff]  ;;  %v5813_v13 = vld [vmem:[#allocation35_spill] sm:$0xff] }
 0xc63   :  { %v5811_v31 = vld [vmem:[#allocation33_spill] sm:$0xff] }
 0xc64   :  { %v2235_v61 = vsel %vm2234_vm1, %v3709_v42, %v2231_v11  ;;  %3710 = vtanh.f32 %v2244_v25  ;;  %v5805_v42 = vld [vmem:[#allocation24_spill] sm:$0xff]  ;;  %v3355_v25 = vmul.f32 -1.442695, %v5122_v1 }
 0xc65   :  { %v2240_v2 = vsel %vm2237_vm2, %v2239_v60, %v2235_v61  ;;  %v5801_v60 = vld [vmem:[#allocation18_spill] sm:$0xff]  ;;  %v5815_v11 = vld [vmem:[#allocation36_spill] sm:$0xff] }
 0xc66   :  { %v2246_v55 = vsub.f32 1.0, %v2240_v2  ;;  %v2248_v57 = vmul.f32 %v2240_v2, %v5008_v49  ;;  %v5798_v49 = vld [vmem:[#allocation17_spill] sm:$0xff]  ;;  %3712 = vpow2.f32 %v3355_v25 }
 0xc6a   :  { %v3711_v38 = vpop.eup %3710 }
 0xc6b   :  { %v2247_v5 = vmul.f32 %v3711_v38, %v2246_v55 }
 0xc6c   :  { %v3713_v61 = vpop.eup %3712 }
 0xc6d   :  { %v5128_v26 = vadd.f32 %v2248_v57, %v2247_v5  ;;  %v2334_v2 = vadd.f32 1.0, %v3713_v61 }
 0xc6f   :  { %v2250_v51 = vpack.c.bf16 %v5128_v26, %v5128_v26  ;;  %3714 = vrcp.f32 %v2334_v2  ;;  %vm2340_vm4 = vweird.f32 %v2334_v2  ;;  %v2344_v1 = vand.u32 2147483647, %v2334_v2 }
 0xc71   :  { %2259 = vmatmul.bf16.vlgmr.msra.gmra.mxu0 %v2250_v51  ;;  %2272 = vmatmul.bf16.vlgmr.msrb.gmra.mxu1 %v2250_v51  ;;  %vm2345_vm6 = vcmp.eq.f32.partialorder %v2344_v1, 8.507059e+37 }
 0xc72   :  { %2285 = vmatmul.bf16.vlgmr.msra.gmra.mxu2 %v2250_v51  ;;  %2429 = vmatpush.bf16.msra.mxu0 %v4332_v6 }
 0xc73   :  { %2491 = vmatpush.bf16.msrb.mxu1 %v4101_v17  ;;  %2504 = vmatpush.bf16.msra.mxu2 %v4175_v22  ;;  %v5790_v17 = vld [vmem:[#allocation39_spill] sm:$0xff]  ;;  %v5792_v22 = vld [vmem:[#allocation28_spill] sm:$0xff] }
 0xc75   :  { %v3715_v55 = vpop.eup %3714 }
 0xc76   :  { %2430 = vmatpush.bf16.msra.mxu0 %v4354_v4  ;;  %v2336_v38 = vmul.f32 %v3715_v55, %v2334_v2  ;;  %vm2341_vm3 = vweird.f32 %v3715_v55 }
 0xc77   :  { %2492 = vmatpush.bf16.msrb.mxu1 %v4106_v20  ;;  %2505 = vmatpush.bf16.msra.mxu2 %v4185_v34  ;;  %v5791_v20 = vld [vmem:[#allocation75_spill] sm:$0xff]  ;;  %v5793_v34 = vld [vmem:[#allocation40_spill] sm:$0xff]  ;;  %vm2342_vm5 = vmor %vm2340_vm4, %vm2341_vm3 }
 0xc78   :  { %v2337_v51 = vsub.f32 1.0, %v2336_v38 }
 0xc7a   :  { %2431 = vmatpush.bf16.msra.mxu0 %v4360_v45 }
 0xc7b   :  { %2493 = vmatpush.bf16.msrb.mxu1 %v5563_v41  ;;  %2506 = vmatpush.bf16.msra.mxu2 %v4194_v44  ;;  %v5794_v44 = vld [vmem:[#allocation76_spill] sm:$0xff]  ;;  %v5795_v41 = vld [vmem:[#allocation31_spill] sm:$0xff] }
 0xc7e   :  { %2432 = vmatpush.bf16.msra.mxu0 %v5564_v58 }
 0xc7f   :  { %2494 = vmatpush.bf16.msrb.mxu1 %v5565_v48  ;;  %2507 = vmatpush.bf16.msra.mxu2 %v4204_v52  ;;  %v5796_v52 = vld [vmem:[#allocation41_spill] sm:$0xff] }
 0xc80   :  { %v5797_v48 = vld [vmem:[#allocation77_spill] sm:$0xff] }
 0xc81   :  { %2312 = vmatmul.bf16.vlgmr.msrb.gmra.mxu0 %v5093_v8  ;;  %2325 = vmatmul.bf16.vlgmr.msra.gmra.mxu1 %v5093_v8  ;;  %v5799_v8 = vld [vmem:[#allocation34_spill] sm:$0xff] }
 0xc82   :  { %2433 = vmatpush.bf16.msra.mxu0 %v5566_v39 }
 0xc83   :  { %2495 = vmatpush.bf16.msrb.mxu1 %v5567_v36  ;;  %2508 = vmatpush.bf16.msra.mxu2 %v5790_v17  ;;  %v5800_v36 = vld [vmem:[#allocation42_spill] sm:$0xff] }
 0xc86   :  { %2434 = vmatpush.bf16.msra.mxu0 %v5791_v20 }
 0xc87   :  { %2496 = vmatpush.bf16.msrb.mxu1 %v5792_v22  ;;  %2509 = vmatpush.bf16.msra.mxu2 %v5793_v34  ;;  %v2338_v22 = vmul.f32 %v3715_v55, %v2337_v51 }
 0xc8a   :  { %2435 = vmatpush.bf16.msra.mxu0 %v5794_v44 }
 0xc8b   :  { %2497 = vmatpush.bf16.msrb.mxu1 %v5795_v41  ;;  %2510 = vmatpush.bf16.msra.mxu2 %v5796_v52  ;;  %v2339_v52 = vadd.f32 %v3715_v55, %v2338_v22 }
 0xc8e   :  { %2436 = vmatpush.bf16.msra.mxu0 %v5797_v48 }
 0xc8f   :  { %2498 = vmatpush.bf16.msrb.mxu1 %v5799_v8  ;;  %2511 = vmatpush.bf16.msra.mxu2 %v5800_v36  ;;  %v2343_v36 = vsel %vm2342_vm5, %v3715_v55, %v2339_v52 }
 0xc92   :  { %2531 = vmatpush.bf16.msrb.mxu0 %v5798_v49  ;;  %v2346_v49 = vand.u32 2147483648, %v2334_v2 }
 0xc93   :  { %2544 = vmatpush.bf16.msra.mxu1 %v5801_v60 }
 0xc96   :  { %2532 = vmatpush.bf16.msrb.mxu0 %v5802_v15 }
 0xc97   :  { %2545 = vmatpush.bf16.msra.mxu1 %v5803_v53  ;;  %v2347_v53 = vor.u32 1.1754944e-38, %v2346_v49 }
 0xc9a   :  { %2533 = vmatpush.bf16.msrb.mxu0 %v5804_v19  ;;  %v5816_v19 = vld [vmem:[#allocation61_spill] sm:$0xff] }
 0xc9b   :  { %2546 = vmatpush.bf16.msra.mxu1 %v5805_v42 }
 0xc9e   :  { %2534 = vmatpush.bf16.msrb.mxu0 %v5806_v50  ;;  %v5817_v50 = vld [vmem:[#allocation19_spill] sm:$0xff] }
 0xc9f   :  { %2547 = vmatpush.bf16.msra.mxu1 %v5807_v62 }
 0xca2   :  { %2535 = vmatpush.bf16.msrb.mxu0 %v5808_v30  ;;  %v2348_v30 = vsel %vm2345_vm6, %v2347_v53, %v2343_v36 }
 0xca3   :  { %2548 = vmatpush.bf16.msra.mxu1 %v5809_v10 }
 0xca6   :  { %2536 = vmatpush.bf16.msrb.mxu0 %v5810_v59 }
 0xca7   :  { %2549 = vmatpush.bf16.msra.mxu1 %v5811_v31  ;;  %v5818_v31 = vld [vmem:[#allocation58_spill] sm:$0xff] }
 0xcaa   :  { %2537 = vmatpush.bf16.msrb.mxu0 %v5812_v32 }
 0xcab   :  { %2550 = vmatpush.bf16.msra.mxu1 %v5813_v13 }
 0xcae   :  { %2538 = vmatpush.bf16.msrb.mxu0 %v5814_v54 }
 0xcaf   :  { %2551 = vmatpush.bf16.msra.mxu1 %v5815_v11 }
 0xcee   :  { %v5175_v5 = vpop.f32.mrf.mxu0  ;;  %v5177_v57 = vpop.f32.mrf.mxu1 }
 0xcf5   :  { %v5179_v17 = vpop.f32.mrf.mxu2 }
 0xcf6   :  { %v2262_v34 = vpop.f32.mrf.mxu0  ;;  %v2275_v41 = vpop.f32.mrf.mxu1 }
 0xcfd   :  { %v2288_v8 = vpop.f32.mrf.mxu2 }
 0xcfe   :  { %v2313_v60 = vpop.f32.mrf.mxu0  ;;  %v2326_v15 = vpop.f32.mrf.mxu1 }
 0xcff   :  { %v2350_v42 = vadd.f32 %v2313_v60, %v5816_v19  ;;  %v2370_v62 = vadd.f32 %v5817_v50, %v2326_v15 }
 0xd01   :  { %v3356_v10 = vmul.f32 -1.442695, %v2350_v42  ;;  %v2371_v59 = vmul.f32 %v2370_v62, %v2348_v30 }
 0xd03   :  { %3716 = vpow2.f32 %v3356_v10  ;;  %v2372_v32 = vadd.f32 %v2371_v59, %v5818_v31 }
 0xd06   :  { %v2315_v13 = vpop.f32.mrf.mxu0  ;;  %v2328_v54 = vpop.f32.mrf.mxu1 }
 0xd09   :  { %v3717_v11 = vpop.eup %3716 }
 0xd0a   :  { %v2354_v25 = vadd.f32 1.0, %v3717_v11 }
 0xd0c   :  { %3718 = vrcp.f32 %v2354_v25  ;;  %v2366_v38 = vand.u32 2147483648, %v2354_v25  ;;  %v2364_v22 = vand.u32 2147483647, %v2354_v25  ;;  %vm2360_vm8 = vweird.f32 %v2354_v25 }
 0xd0d   :  { %3720 = vtanh.f32 %v2372_v32 }
 0xd0e   :  { %v2367_v41 = vor.u32 1.1754944e-38, %v2366_v38  ;;  %vm2365_vm10 = vcmp.eq.f32.partialorder %v2364_v22, 8.507059e+37  ;;  %v5194_v38 = vld [vmem:[%s5351_s5] ss:$0 sm:$0xff]  ;;  %v5197_v22 = vld [vmem:[#allocation7] ss:$0 sm:$0xff] }
 0xd12   :  { %v3719_v61 = vpop.eup %3718 }
 0xd13   :  { %v2356_v2 = vmul.f32 %v3719_v61, %v2354_v25  ;;  %vm2361_vm7 = vweird.f32 %v3719_v61  ;;  %v3721_v8 = vpop.eup %3720 }
 0xd14   :  { %vm2362_vm9 = vmor %vm2360_vm8, %vm2361_vm7 }
 0xd15   :  { %v2357_v55 = vsub.f32 1.0, %v2356_v2 }
 0xd17   :  { %v2358_v51 = vmul.f32 %v3719_v61, %v2357_v55 }
 0xd19   :  { %v2359_v34 = vadd.f32 %v3719_v61, %v2358_v51 }
 0xd1b   :  { %v2363_v52 = vsel %vm2362_vm9, %v3719_v61, %v2359_v34 }
 0xd1c   :  { %v2368_v49 = vsel %vm2365_vm10, %v2367_v41, %v2363_v52 }
 0xd1d   :  { %v2374_v1 = vsub.f32 1.0, %v2368_v49  ;;  %v2376_v60 = vmul.f32 %v2368_v49, %v5071_v46 }
 0xd1f   :  { %v2375_v36 = vmul.f32 %v3721_v8, %v2374_v1 }
 0xd21   :  { %v5185_v15 = vadd.f32 %v2376_v60, %v2375_v36 }
 0xd23   :  { %2378 = vadd.xlane.f32.xlu0 %v5185_v15  ;;  %v2380_v53 = vmul.f32 %v5185_v15, %v5185_v15 }
 0xd25   :  { %2381 = vadd.xlane.f32.xlu1 %v2380_v53 }
 0xd96   :  { %v2379_v19 = vpop.xlane.xlu0 %2378 }
 0xd97   :  { %v2383_v42 = vmul.f32 0.03125, %v2379_v19 }
 0xd98   :  { %v2382_v62 = vpop.xlane.xlu1 %2381 }
 0xd99   :  { %v2385_v30 = vmul.f32 %v2383_v42, %v2383_v42  ;;  %v2384_v10 = vmul.f32 0.03125, %v2382_v62  ;;  %v2387_v61 = vsub.f32 %v5185_v15, %v2383_v42 }
 0xd9b   :  { %v2386_v59 = vsub.f32 %v2384_v10, %v2385_v30 }
 0xd9d   :  { %v2388_v31 = vadd.f32 1e-05, %v2386_v59 }
 0xd9f   :  { %3722 = vrsqrt.f32 %v2388_v31  ;;  %vm2395_vm12 = vweird.f32 %v2388_v31 }
 0xda5   :  { %v3723_v32 = vpop.eup %3722 }
 0xda6   :  { %v2390_v13 = vmul.f32 %v3723_v32, %v2388_v31  ;;  %vm2396_vm11 = vweird.f32 %v3723_v32  ;;  %v5236_v31 = vld [vmem:[%s5356_s10] ss:$0 sm:$0xff] }
 0xda7   :  { %vm2397_vm13 = vmor %vm2395_vm12, %vm2396_vm11 }
 0xda8   :  { %v2391_v54 = vmul.f32 %v3723_v32, %v2390_v13 }
 0xdaa   :  { %v2392_v46 = vmul.f32 0.5, %v2391_v54 }
 0xdac   :  { %v2393_v11 = vsub.f32 1.5, %v2392_v46 }
 0xdae   :  { %v2394_v25 = vmul.f32 %v3723_v32, %v2393_v11 }
 0xdb0   :  { %v2398_v2 = vsel %vm2397_vm13, %v3723_v32, %v2394_v25  ;;  %v2482_v32 = vadd.f32 %v5236_v31, %v5179_v17 }
 0xdb1   :  { %v2399_v55 = vmul.f32 %v2398_v2, %v2387_v61 }
 0xdb3   :  { %v2400_v51 = vmul.f32 %v5194_v38, %v2399_v55 }
 0xdb5   :  { %v2401_v34 = vadd.f32 %v5197_v22, %v2400_v51 }
 0xdb7   :  { %v2402_v41 = vpack.c.bf16 %v2401_v34, %v2401_v34 }
 0xdb9   :  { %2411 = vmatmul.bf16.vlgmr.msrb.gmra.mxu2 %v2402_v41  ;;  %2424 = vmatmul.bf16.vlgmr.msra.gmra.mxu3 %v2402_v41 }
 0xdba   :  { %2437 = vmatmul.bf16.vlgmr.msra.gmra.mxu0 %v2402_v41  ;;  %2557 = vmatpush.bf16.msrb.mxu2 %v4222_v12  ;;  %v5214_v12 = vpack.c.bf16 %v5185_v15, %v5185_v15 }
 0xdbb   :  { %2643 = vmatpush.bf16.msra.mxu3 %v4368_v63  ;;  %2656 = vmatpush.bf16.msra.mxu0 %v4371_v3  ;;  %v5823_v63 = vld [vmem:[#allocation89_spill] sm:$0xff] }
 0xdbe   :  { %2558 = vmatpush.bf16.msrb.mxu2 %v4226_v16  ;;  %v5821_v16 = vld [vmem:[#allocation83_spill] sm:$0xff] }
 0xdbf   :  { %2644 = vmatpush.bf16.msra.mxu3 %v4378_v18  ;;  %2657 = vmatpush.bf16.msra.mxu0 %v4381_v33 }
 0xdc2   :  { %2559 = vmatpush.bf16.msrb.mxu2 %v4230_v23 }
 0xdc3   :  { %2645 = vmatpush.bf16.msra.mxu3 %v4388_v14  ;;  %2658 = vmatpush.bf16.msra.mxu0 %v4390_v28  ;;  %v5819_v28 = vld [vmem:[#allocation44_spill] sm:$0xff] }
 0xdc6   :  { %2560 = vmatpush.bf16.msrb.mxu2 %v4236_v29 }
 0xdc7   :  { %2646 = vmatpush.bf16.msra.mxu3 %v4397_v9  ;;  %2659 = vmatpush.bf16.msra.mxu0 %v4399_v27  ;;  %v5820_v9 = vld [vmem:[#allocation82_spill] sm:$0xff] }
 0xdca   :  { %2539 = vmatmul.bf16.vlgmr.msrb.gmra.mxu0 %v5214_v12  ;;  %2561 = vmatpush.bf16.msrb.mxu2 %v4239_v35  ;;  %v5822_v35 = vld [vmem:[#allocation88_spill] sm:$0xff] }
 0xdcb   :  { %2647 = vmatpush.bf16.msra.mxu3 %v4406_v56  ;;  %2660 = vmatpush.bf16.msra.mxu0 %v4408_v0 }
 0xdce   :  { %2562 = vmatpush.bf16.msrb.mxu2 %v4242_v43 }
 0xdcf   :  { %2648 = vmatpush.bf16.msra.mxu3 %v5724_v47  ;;  %2661 = vmatpush.bf16.msra.mxu0 %v5725_v37 }
 0xdd2   :  { %2563 = vmatpush.bf16.msrb.mxu2 %v5773_v7 }
 0xdd3   :  { %2649 = vmatpush.bf16.msra.mxu3 %v5774_v21  ;;  %2662 = vmatpush.bf16.msra.mxu0 %v5775_v40 }
 0xdd6   :  { %2564 = vmatpush.bf16.msrb.mxu2 %v5819_v28 }
 0xdd7   :  { %2650 = vmatpush.bf16.msra.mxu3 %v5820_v9  ;;  %2663 = vmatpush.bf16.msra.mxu0 %v5821_v16 }
 0xe37   :  { %v2438_v56 = vpop.f32.mrf.mxu0 }
 0xe38   :  { %v2439_v11 = vadd.f32 %v2438_v56, %v4530_v24 }
 0xe3c   :  { %v2412_v23 = vpop.f32.mrf.mxu2  ;;  %v2425_v29 = vpop.f32.mrf.mxu3 }
 0xe3d   :  { %v2413_v43 = vadd.f32 %v2412_v23, %v5822_v35  ;;  %v2426_v3 = vadd.f32 %v2425_v29, %v5823_v63 }
 0xe3f   :  { %v2442_v18 = vadd.f32 %v2413_v43, %v5175_v5  ;;  %v2462_v33 = vadd.f32 %v2426_v3, %v5177_v57  ;;  %v2440_v14 = vpop.f32.mrf.mxu0 }
 0xe41   :  { %v3357_v27 = vmul.f32 -1.442695, %v2442_v18  ;;  %v3358_v0 = vmul.f32 -1.442695, %v2462_v33 }
 0xe43   :  { %3724 = vpow2.f32 %v3357_v27  ;;  %v5826_v27 = vld [vmem:[#allocation51_spill] sm:$0xff] }
 0xe44   :  { %3726 = vpow2.f32 %v3358_v0  ;;  %v2414_v47 = vpop.f32.mrf.mxu2  ;;  %v2427_v37 = vpop.f32.mrf.mxu3  ;;  %v5827_v0 = vld [vmem:[#allocation62_spill] sm:$0xff] }
 0xe45   :  { %v277_v47 = vadd.f32 %v5827_v0, %v5826_v27 }
 0xe47   :  { %v2540_v7 = vpop.f32.mrf.mxu0 }
 0xe49   :  { %v3725_v21 = vpop.eup %3724 }
 0xe4a   :  { %v3727_v40 = vpop.eup %3726  ;;  %v2446_v52 = vadd.f32 1.0, %v3725_v21 }
 0xe4b   :  { %v2466_v49 = vadd.f32 1.0, %v3727_v40 }
 0xe4c   :  { %3728 = vrcp.f32 %v2446_v52  ;;  %v2458_v53 = vand.u32 2147483648, %v2446_v52  ;;  %v2456_v62 = vand.u32 2147483647, %v2446_v52  ;;  %vm2452_vm15 = vweird.f32 %v2446_v52 }
 0xe4d   :  { %3730 = vrcp.f32 %v2466_v49  ;;  %v2478_v61 = vand.u32 2147483648, %v2466_v49  ;;  %vm2472_vm3 = vweird.f32 %v2466_v49  ;;  %v2476_v2 = vand.u32 2147483647, %v2466_v49 }
 0xe4e   :  { %v2459_v59 = vor.u32 1.1754944e-38, %v2458_v53  ;;  %vm2457_vm1 = vcmp.eq.f32.partialorder %v2456_v62, 8.507059e+37 }
 0xe4f   :  { %v2542_v1 = vpop.f32.mrf.mxu0  ;;  %v2479_v34 = vor.u32 1.1754944e-38, %v2478_v61  ;;  %vm2477_vm5 = vcmp.eq.f32.partialorder %v2476_v2, 8.507059e+37 }
 0xe52   :  { %v3729_v8 = vpop.eup %3728 }
 0xe53   :  { %v3731_v36 = vpop.eup %3730  ;;  %v2448_v5 = vmul.f32 %v3729_v8, %v2446_v52  ;;  %vm2453_vm14 = vweird.f32 %v3729_v8 }
 0xe54   :  { %v2468_v60 = vmul.f32 %v3731_v36, %v2466_v49  ;;  %vm2454_vm0 = vmor %vm2452_vm15, %vm2453_vm14  ;;  %vm2473_vm2 = vweird.f32 %v3731_v36 }
 0xe55   :  { %v2449_v57 = vsub.f32 1.0, %v2448_v5  ;;  %vm2474_vm4 = vmor %vm2472_vm3, %vm2473_vm2 }
 0xe56   :  { %v2469_v19 = vsub.f32 1.0, %v2468_v60 }
 0xe57   :  { %v2450_v42 = vmul.f32 %v3729_v8, %v2449_v57 }
 0xe58   :  { %v2470_v30 = vmul.f32 %v3731_v36, %v2469_v19  ;;  %v5828_v19 = vld [vmem:[#allocation48_spill] sm:$0xff] }
 0xe59   :  { %v2451_v10 = vadd.f32 %v3729_v8, %v2450_v42  ;;  %v5829_v42 = vld [vmem:[#allocation60_spill] sm:$0xff] }
 0xe5a   :  { %v2471_v46 = vadd.f32 %v3731_v36, %v2470_v30  ;;  %v306_v62 = vadd.f32 %v5829_v42, %v5828_v19 }
 0xe5b   :  { %v2455_v13 = vsel %vm2454_vm0, %v3729_v8, %v2451_v10 }
 0xe5c   :  { %v2460_v54 = vsel %vm2457_vm1, %v2459_v59, %v2455_v13  ;;  %v2475_v51 = vsel %vm2474_vm4, %v3731_v36, %v2471_v46 }
 0xe5d   :  { %v2483_v25 = vmul.f32 %v2482_v32, %v2460_v54  ;;  %v2480_v41 = vsel %vm2477_vm5, %v2479_v34, %v2475_v51 }
 0xe5e   :  { %v2486_v28 = vsub.f32 1.0, %v2480_v41  ;;  %v2488_v16 = vmul.f32 %v2480_v41, %v5128_v26  ;;  %v5824_v26 = vld [vmem:[#allocation63_spill] sm:$0xff] }
 0xe5f   :  { %v2484_v55 = vadd.f32 %v2483_v25, %v2439_v11 }
 0xe61   :  { %3732 = vtanh.f32 %v2484_v55 }
 0xe67   :  { %v3733_v17 = vpop.eup %3732 }
 0xe68   :  { %v2487_v9 = vmul.f32 %v3733_v17, %v2486_v28 }
 0xe6a   :  { %v5242_v23 = vadd.f32 %v2488_v16, %v2487_v9 }
 0xe6c   :  { %v2490_v56 = vpack.c.bf16 %v5242_v23, %v5242_v23 }
 0xe6e   :  { %2499 = vmatmul.bf16.vlgmr.msrb.gmra.mxu1 %v2490_v56  ;;  %2512 = vmatmul.bf16.vlgmr.msra.gmra.mxu2 %v2490_v56 }
 0xe6f   :  { %2525 = vmatmul.bf16.vlgmr.msrb.gmra.mxu3 %v2490_v56  ;;  %2669 = vmatpush.bf16.msrb.mxu1 %v4332_v6  ;;  %v5825_v6 = vld [vmem:[#allocation46_spill] sm:$0xff] }
 0xe70   :  { %v248_v29 = vadd.f32 %v5825_v6, %v5824_v26 }
 0xe73   :  { %2670 = vmatpush.bf16.msrb.mxu1 %v4354_v4  ;;  %v2570_v4 = vadd.f32 %v2540_v7, %v248_v29 }
 0xe75   :  { %v3359_v43 = vmul.f32 -1.442695, %v2570_v4 }
 0xe77   :  { %2671 = vmatpush.bf16.msrb.mxu1 %v4360_v45  ;;  %3734 = vpow2.f32 %v3359_v43 }
 0xe7b   :  { %2672 = vmatpush.bf16.msrb.mxu1 %v5564_v58 }
 0xe7d   :  { %v3735_v45 = vpop.eup %3734 }
 0xe7e   :  { %2552 = vmatmul.bf16.vlgmr.msra.gmra.mxu1 %v5214_v12  ;;  %2565 = vmatmul.bf16.vlgmr.msrb.gmra.mxu2 %v5214_v12  ;;  %v2574_v58 = vadd.f32 1.0, %v3735_v45 }
 0xe7f   :  { %2673 = vmatpush.bf16.msrb.mxu1 %v5566_v39 }
 0xe80   :  { %3736 = vrcp.f32 %v2574_v58  ;;  %v2586_v52 = vand.u32 2147483648, %v2574_v58  ;;  %vm2580_vm7 = vweird.f32 %v2574_v58  ;;  %v2584_v1 = vand.u32 2147483647, %v2574_v58 }
 0xe82   :  { %v2587_v5 = vor.u32 1.1754944e-38, %v2586_v52  ;;  %vm2585_vm9 = vcmp.eq.f32.partialorder %v2584_v1, 8.507059e+37 }
 0xe83   :  { %2674 = vmatpush.bf16.msrb.mxu1 %v5791_v20 }
 0xe86   :  { %v3737_v12 = vpop.eup %3736 }
 0xe87   :  { %2675 = vmatpush.bf16.msrb.mxu1 %v5794_v44  ;;  %v2576_v18 = vmul.f32 %v3737_v12, %v2574_v58  ;;  %vm2581_vm6 = vweird.f32 %v3737_v12 }
 0xe88   :  { %vm2582_vm8 = vmor %vm2580_vm7, %vm2581_vm6 }
 0xe89   :  { %v2577_v33 = vsub.f32 1.0, %v2576_v18 }
 0xe8b   :  { %2676 = vmatpush.bf16.msrb.mxu1 %v5797_v48  ;;  %v2578_v48 = vmul.f32 %v3737_v12, %v2577_v33 }
 0xe8d   :  { %v2579_v40 = vadd.f32 %v3737_v12, %v2578_v48 }
 0xe8f   :  { %v2583_v8 = vsel %vm2582_vm8, %v3737_v12, %v2579_v40 }
 0xe90   :  { %v2588_v57 = vsel %vm2585_vm9, %v2587_v5, %v2583_v8 }
 0xeeb   :  { %v5258_v3 = vpop.f32.mrf.mxu1 }
 0xef1   :  { %v5260_v39 = vpop.f32.mrf.mxu2 }
 0xef2   :  { %v5262_v20 = vpop.f32.mrf.mxu3 }
 0xef3   :  { %v2502_v44 = vpop.f32.mrf.mxu1 }
 0xef9   :  { %v2515_v14 = vpop.f32.mrf.mxu2 }
 0xefa   :  { %v2528_v37 = vpop.f32.mrf.mxu3 }
 0xefb   :  { %v2553_v7 = vpop.f32.mrf.mxu1 }
 0xefc   :  { %v2590_v21 = vadd.f32 %v2553_v7, %v277_v47 }
 0xefe   :  { %v3360_v49 = vmul.f32 -1.442695, %v2590_v21 }
 0xf00   :  { %3738 = vpow2.f32 %v3360_v49 }
 0xf01   :  { %v2566_v36 = vpop.f32.mrf.mxu2 }
 0xf02   :  { %v2610_v60 = vadd.f32 %v5817_v50, %v2566_v36 }
 0xf03   :  { %v2555_v53 = vpop.f32.mrf.mxu1 }
 0xf04   :  { %v2611_v30 = vmul.f32 %v2610_v60, %v2588_v57 }
 0xf06   :  { %v3739_v10 = vpop.eup %3738  ;;  %v2612_v59 = vadd.f32 %v2611_v30, %v306_v62 }
 0xf07   :  { %v2594_v32 = vadd.f32 1.0, %v3739_v10 }
 0xf09   :  { %3740 = vrcp.f32 %v2594_v32  ;;  %v2568_v13 = vpop.f32.mrf.mxu2  ;;  %v2606_v25 = vand.u32 2147483648, %v2594_v32  ;;  %v2604_v2 = vand.u32 2147483647, %v2594_v32  ;;  %vm2600_vm11 = vweird.f32 %v2594_v32 }
 0xf0a   :  { %3742 = vtanh.f32 %v2612_v59 }
 0xf0b   :  { %v2607_v55 = vor.u32 1.1754944e-38, %v2606_v25  ;;  %vm2605_vm13 = vcmp.eq.f32.partialorder %v2604_v2, 8.507059e+37  ;;  %v2722_v25 = vadd.f32 %v5236_v31, %v5262_v20 }
 0xf0f   :  { %v3741_v54 = vpop.eup %3740 }
 0xf10   :  { %v2596_v46 = vmul.f32 %v3741_v54, %v2594_v32  ;;  %vm2601_vm10 = vweird.f32 %v3741_v54  ;;  %v3743_v28 = vpop.eup %3742 }
 0xf11   :  { %vm2602_vm12 = vmor %vm2600_vm11, %vm2601_vm10 }
 0xf12   :  { %v2597_v11 = vsub.f32 1.0, %v2596_v46 }
 0xf14   :  { %v2598_v61 = vmul.f32 %v3741_v54, %v2597_v11 }
 0xf16   :  { %v2599_v50 = vadd.f32 %v3741_v54, %v2598_v61 }
 0xf18   :  { %v2603_v51 = vsel %vm2602_vm12, %v3741_v54, %v2599_v50 }
 0xf19   :  { %v2608_v34 = vsel %vm2605_vm13, %v2607_v55, %v2603_v51 }
 0xf1a   :  { %v2614_v41 = vsub.f32 1.0, %v2608_v34  ;;  %v2616_v9 = vmul.f32 %v2608_v34, %v5185_v15 }
 0xf1c   :  { %v2615_v17 = vmul.f32 %v3743_v28, %v2614_v41 }
 0xf1e   :  { %v2617_v16 = vadd.f32 %v2616_v9, %v2615_v17 }
 0xf20   :  { %2618 = vadd.xlane.f32.xlu2 %v2617_v16  ;;  %v2620_v56 = vmul.f32 %v2617_v16, %v2617_v16 }
 0xf22   :  { %2621 = vadd.xlane.f32.xlu0 %v2620_v56 }
 0xf93   :  { %v2619_v26 = vpop.xlane.xlu2 %2618 }
 0xf94   :  { %v2623_v6 = vmul.f32 0.03125, %v2619_v26 }
 0xf95   :  { %v2622_v29 = vpop.xlane.xlu0 %2621 }
 0xf96   :  { %v2625_v4 = vmul.f32 %v2623_v6, %v2623_v6  ;;  %v2624_v43 = vmul.f32 0.03125, %v2622_v29  ;;  %v2627_v15 = vsub.f32 %v2617_v16, %v2623_v6 }
 0xf98   :  { %v2626_v45 = vsub.f32 %v2624_v43, %v2625_v4  ;;  %v3540_v4 = vld [vmem:[%s5359_s13 + $0x30] sm:$0xff]  ;;  %v3539_v43 = vld [vmem:[%s5359_s13 + $0x28] sm:$0xff] }
 0xf9a   :  { %v2628_v58 = vadd.f32 1e-05, %v2626_v45  ;;  %v3537_v45 = vld [vmem:[%s5359_s13 + $0x18] sm:$0xff] }
 0xf9c   :  { %3744 = vrsqrt.f32 %v2628_v58  ;;  %vm2635_vm15 = vweird.f32 %v2628_v58 }
 0xfa2   :  { %v3745_v12 = vpop.eup %3744 }
 0xfa3   :  { %v2630_v18 = vmul.f32 %v3745_v12, %v2628_v58  ;;  %vm2636_vm14 = vweird.f32 %v3745_v12  ;;  %v3536_v58 = vld [vmem:[%s5359_s13 + $0x10] sm:$0xff] }
 0xfa4   :  { %vm2637_vm0 = vmor %vm2635_vm15, %vm2636_vm14 }
 0xfa5   :  { %v2631_v44 = vmul.f32 %v3745_v12, %v2630_v18 }
 0xfa7   :  { %v2632_v33 = vmul.f32 0.5, %v2631_v44  ;;  %v3534_v44 = vld [vmem:[%s5359_s13] sm:$0xff] }
 0xfa9   :  { %v2633_v48 = vsub.f32 1.5, %v2632_v33 }
 0xfab   :  { %v2634_v14 = vmul.f32 %v3745_v12, %v2633_v48 }
 0xfad   :  { %v2638_v27 = vsel %vm2637_vm0, %v3745_v12, %v2634_v14  ;;  %v3535_v12 = vld [vmem:[%s5359_s13 + $0x8] sm:$0xff] }
 0xfae   :  { %v2639_v0 = vmul.f32 %v2638_v27, %v2627_v15  ;;  %v3549_v27 = vld [vmem:[%s5361_s15 + $0x38] sm:$0xff] }
 0xfaf   :  { %2914 = vmatpush.bf16.msrb.mxu3 %v3549_v27 }
 0xfb0   :  { %v2640_v47 = vmul.f32 %v5194_v38, %v2639_v0 }
 0xfb2   :  { %v2641_v37 = vadd.f32 %v5197_v22, %v2640_v47  ;;  %v3548_v47 = vld [vmem:[%s5361_s15 + $0x30] sm:$0xff] }
 0xfb3   :  { %2915 = vmatpush.bf16.msrb.mxu3 %v3548_v47 }
 0xfb4   :  { %v2642_v7 = vpack.c.bf16 %v2641_v37, %v2641_v37 }
 0xfb6   :  { %2651 = vmatmul.bf16.vlgmr.msra.gmra.mxu3 %v2642_v7  ;;  %2664 = vmatmul.bf16.vlgmr.msra.gmra.mxu0 %v2642_v7 }
 0xfb7   :  { %2677 = vmatmul.bf16.vlgmr.msrb.gmra.mxu1 %v2642_v7  ;;  %v3547_v7 = vld [vmem:[%s5361_s15 + $0x28] sm:$0xff] }
 0xfb8   :  { %2916 = vmatpush.bf16.msrb.mxu3 %v3547_v7 }
0x1033   :  { %v2665_v21 = vpop.f32.mrf.mxu0 }
0x1034   :  { %v2666_v40 = vadd.f32 %v2665_v21, %v5823_v63  ;;  %v2678_v52 = vpop.f32.mrf.mxu1  ;;  %v3546_v21 = vld [vmem:[%s5361_s15 + $0x20] sm:$0xff] }
0x1035   :  { %v2679_v55 = vadd.f32 %v2678_v52, %v4530_v24  ;;  %v3541_v24 = vld [vmem:[%s5359_s13 + $0x38] sm:$0xff]  ;;  %2917 = vmatpush.bf16.msrb.mxu3 %v3546_v21 }
0x1036   :  { %v2702_v49 = vadd.f32 %v2666_v40, %v5260_v39  ;;  %2831 = vmatpush.bf16.msra.mxu2 %v3541_v24 }
0x1038   :  { %v3362_v1 = vmul.f32 -1.442695, %v2702_v49  ;;  %v3545_v49 = vld [vmem:[%s5361_s15 + $0x18] sm:$0xff] }
0x1039   :  { %v2652_v8 = vpop.f32.mrf.mxu3  ;;  %2918 = vmatpush.bf16.msrb.mxu3 %v3545_v49 }
0x103a   :  { %3746 = vpow2.f32 %v3362_v1  ;;  %v2653_v36 = vadd.f32 %v2652_v8, %v5822_v35  ;;  %2832 = vmatpush.bf16.msra.mxu2 %v3540_v4 }
0x103b   :  { %v2667_v5 = vpop.f32.mrf.mxu0 }
0x103c   :  { %v2682_v38 = vadd.f32 %v2653_v36, %v5258_v3  ;;  %v2680_v60 = vpop.f32.mrf.mxu1  ;;  %v3544_v36 = vld [vmem:[%s5361_s15 + $0x10] sm:$0xff] }
0x103d   :  { %2919 = vmatpush.bf16.msrb.mxu3 %v3544_v36 }
0x103e   :  { %v3361_v22 = vmul.f32 -1.442695, %v2682_v38  ;;  %2833 = vmatpush.bf16.msra.mxu2 %v3539_v43 }
0x1040   :  { %v3747_v57 = vpop.eup %3746  ;;  %3748 = vpow2.f32 %v3361_v22  ;;  %v3575_v22 = vld [vmem:[%s5357_s11] ss:$0 sm:$0xff] }
0x1041   :  { %v2706_v53 = vadd.f32 1.0, %v3747_v57  ;;  %v2654_v19 = vpop.f32.mrf.mxu3 }
0x1042   :  { %v3576_v19 = vld [vmem:[%s5358_s12] ss:$0 sm:$0xff] }
0x1043   :  { %3750 = vrcp.f32 %v2706_v53  ;;  %v2718_v51 = vand.u32 2147483648, %v2706_v53  ;;  %vm2712_vm6 = vweird.f32 %v2706_v53  ;;  %v2716_v41 = vand.u32 2147483647, %v2706_v53 }
0x1045   :  { %v2719_v9 = vor.u32 1.1754944e-38, %v2718_v51  ;;  %vm2717_vm8 = vcmp.eq.f32.partialorder %v2716_v41, 8.507059e+37  ;;  %v3578_v51 = vld [vmem:[%s5362_s16] ss:$0 sm:$0xff] }
0x1046   :  { %v3749_v42 = vpop.eup %3748 }
0x1047   :  { %v2686_v63 = vadd.f32 1.0, %v3749_v42 }
0x1049   :  { %3752 = vrcp.f32 %v2686_v63  ;;  %v3751_v62 = vpop.eup %3750  ;;  %v2698_v35 = vand.u32 2147483648, %v2686_v63  ;;  %v2696_v3 = vand.u32 2147483647, %v2686_v63  ;;  %vm2692_vm2 = vweird.f32 %v2686_v63 }
0x104a   :  { %v2708_v39 = vmul.f32 %v3751_v62, %v2706_v53  ;;  %vm2713_vm5 = vweird.f32 %v3751_v62 }
0x104b   :  { %v2699_v11 = vor.u32 1.1754944e-38, %v2698_v35  ;;  %vm2697_vm4 = vcmp.eq.f32.partialorder %v2696_v3, 8.507059e+37  ;;  %vm2714_vm7 = vmor %vm2712_vm6, %vm2713_vm5  ;;  %v3554_v35 = vld [vmem:[#allocation12 + $0x20] sm:$0xff]  ;;  %v3552_v3 = vld [vmem:[#allocation12 + $0x10] sm:$0xff] }
0x104c   :  { %v2709_v59 = vsub.f32 1.0, %v2708_v39  ;;  %v3543_v39 = vld [vmem:[%s5361_s15 + $0x8] sm:$0xff] }
0x104d   :  { %2920 = vmatpush.bf16.msrb.mxu3 %v3543_v39 }
0x104e   :  { %v2710_v54 = vmul.f32 %v3751_v62, %v2709_v59  ;;  %v3556_v59 = vld [vmem:[#allocation12 + $0x30] sm:$0xff] }
0x104f   :  { %v3753_v30 = vpop.eup %3752 }
0x1050   :  { %v2688_v10 = vmul.f32 %v3753_v30, %v2686_v63  ;;  %vm2693_vm1 = vweird.f32 %v3753_v30  ;;  %v2711_v50 = vadd.f32 %v3751_v62, %v2710_v54  ;;  %v3577_v54 = vld [vmem:[%s5360_s14] ss:$0 sm:$0xff] }
0x1051   :  { %vm2694_vm3 = vmor %vm2692_vm2, %vm2693_vm1 }
0x1052   :  { %v2689_v32 = vsub.f32 1.0, %v2688_v10  ;;  %v2715_v17 = vsel %vm2714_vm7, %v3751_v62, %v2711_v50  ;;  %v3557_v10 = vld [vmem:[#allocation12 + $0x38] sm:$0xff]  ;;  %v3551_v50 = vld [vmem:[#allocation12 + $0x8] sm:$0xff] }
0x1053   :  { %v2720_v16 = vsel %vm2717_vm8, %v2719_v9, %v2715_v17  ;;  %2997 = vmatpush.bf16.msrb.mxu0 %v3557_v10 }
0x1054   :  { %v2690_v13 = vmul.f32 %v3753_v30, %v2689_v32  ;;  %v2726_v56 = vsub.f32 1.0, %v2720_v16  ;;  %v2728_v26 = vmul.f32 %v2720_v16, %v5242_v23  ;;  %v3538_v23 = vld [vmem:[%s5359_s13 + $0x20] sm:$0xff] }
0x1055   :  { %2834 = vmatpush.bf16.msra.mxu2 %v3538_v23  ;;  %v3555_v32 = vld [vmem:[#allocation12 + $0x28] sm:$0xff]  ;;  %v3579_v16 = vld [vmem:[%s5364_s18] ss:$0 sm:$0xff] }
0x1056   :  { %v2691_v46 = vadd.f32 %v3753_v30, %v2690_v13  ;;  %v3553_v13 = vld [vmem:[#allocation12 + $0x18] sm:$0xff] }
0x1057   :  { %2998 = vmatpush.bf16.msrb.mxu0 %v3556_v59 }
0x1058   :  { %v2695_v61 = vsel %vm2694_vm3, %v3753_v30, %v2691_v46  ;;  %v3542_v30 = vld [vmem:[%s5361_s15] sm:$0xff] }
0x1059   :  { %v2700_v2 = vsel %vm2697_vm4, %v2699_v11, %v2695_v61  ;;  %2835 = vmatpush.bf16.msra.mxu2 %v3537_v45  ;;  %2921 = vmatpush.bf16.msrb.mxu3 %v3542_v30 }
0x105a   :  { %v2723_v34 = vmul.f32 %v2722_v25, %v2700_v2 }
0x105b   :  { %2999 = vmatpush.bf16.msrb.mxu0 %v3555_v32 }
0x105c   :  { %v2724_v28 = vadd.f32 %v2723_v34, %v2679_v55  ;;  %v3550_v55 = vld [vmem:[#allocation12] sm:$0xff] }
0x105d   :  { %2836 = vmatpush.bf16.msra.mxu2 %v3536_v58 }
0x105e   :  { %3754 = vtanh.f32 %v2724_v28 }
0x105f   :  { %3000 = vmatpush.bf16.msrb.mxu0 %v3554_v35 }
0x1061   :  { %2837 = vmatpush.bf16.msra.mxu2 %v3535_v12 }
0x1063   :  { %3001 = vmatpush.bf16.msrb.mxu0 %v3553_v13 }
0x1064   :  { %v3755_v31 = vpop.eup %3754 }
0x1065   :  { %v2727_v20 = vmul.f32 %v3755_v31, %v2726_v56  ;;  %2838 = vmatpush.bf16.msra.mxu2 %v3534_v44 }
0x1067   :  { %v2729_v6 = vadd.f32 %v2728_v26, %v2727_v20  ;;  %3002 = vmatpush.bf16.msrb.mxu0 %v3552_v3 }
0x1069   :  { %2732 = vadd.xlane.f32.xlu1 %v2729_v6  ;;  %v2734_v29 = vmul.f32 %v2729_v6, %v2729_v6 }
0x106b   :  { %2735 = vadd.xlane.f32.xlu2 %v2734_v29  ;;  %3003 = vmatpush.bf16.msrb.mxu0 %v3551_v50 }
0x106f   :  { %3004 = vmatpush.bf16.msrb.mxu0 %v3550_v55 }
0x10dc   :  { %v2733_v18 = vpop.xlane.xlu1 %2732 }
0x10dd   :  { %v2737_v33 = vmul.f32 0.03125, %v2733_v18 }
0x10de   :  { %v2736_v48 = vpop.xlane.xlu2 %2735 }
0x10df   :  { %v2739_v14 = vmul.f32 %v2737_v33, %v2737_v33  ;;  %v2738_v15 = vmul.f32 0.03125, %v2736_v48  ;;  %v2741_v60 = vsub.f32 %v2729_v6, %v2737_v33 }
0x10e1   :  { %v2740_v0 = vsub.f32 %v2738_v15, %v2739_v14 }
0x10e3   :  { %v2742_v37 = vadd.f32 1e-05, %v2740_v0 }
0x10e5   :  { %3756 = vrsqrt.f32 %v2742_v37  ;;  %vm2749_vm10 = vweird.f32 %v2742_v37 }
0x10eb   :  { %v3757_v40 = vpop.eup %3756 }
0x10ec   :  { %v2744_v52 = vmul.f32 %v3757_v40, %v2742_v37  ;;  %vm2750_vm9 = vweird.f32 %v3757_v40 }
0x10ed   :  { %vm2751_vm11 = vmor %vm2749_vm10, %vm2750_vm9 }
0x10ee   :  { %v2745_v1 = vmul.f32 %v3757_v40, %v2744_v52 }
0x10f0   :  { %v2746_v8 = vmul.f32 0.5, %v2745_v1 }
0x10f2   :  { %v2747_v5 = vsub.f32 1.5, %v2746_v8 }
0x10f4   :  { %v2748_v38 = vmul.f32 %v3757_v40, %v2747_v5 }
0x10f6   :  { %v2752_v57 = vsel %vm2751_vm11, %v3757_v40, %v2748_v38 }
0x10f7   :  { %v2753_v53 = vmul.f32 %v2752_v57, %v2741_v60 }
0x10f9   :  { %v2757_v42 = vmul.f32 %v3575_v22, %v2753_v53 }
0x10fb   :  { %v2761_v63 = vadd.f32 %v3576_v19, %v2757_v42 }
0x10fd   :  { %v2762_v62 = vpack.c.bf16 %v2761_v63, %v2761_v63 }
0x10ff   :  { %2839 = vmatmul.bf16.vlgmr.msra.gmra.mxu2 %v2762_v62 }
0x1182   :  { %v2840_v46 = vpop.f32.mrf.mxu2 }
0x1183   :  { %v2841_v11 = vadd.f32 %v3577_v54, %v2840_v46 }
0x1185   :  { %v2844_v25 = vmax.f32 %v2841_v11, 0.0 }
0x1187   :  { %v2845_v61 = vpack.c.bf16 %v2844_v25, %v2844_v25 }
0x1189   :  { %2922 = vmatmul.bf16.vlgmr.msrb.gmra.mxu3 %v2845_v61 }
0x118a   :  { %v2842_v2 = vpop.f32.mrf.mxu2 }
0x120c   :  { %v2923_v34 = vpop.f32.mrf.mxu3 }
0x120d   :  { %v2924_v41 = vadd.f32 %v3578_v51, %v2923_v34 }
0x120f   :  { %v2927_v28 = vmax.f32 %v2924_v41, 0.0 }
0x1211   :  { %v2928_v17 = vpack.c.bf16 %v2927_v28, %v2927_v28 }
0x1213   :  { %3005 = vmatmul.bf16.vlgmr.msrb.gmra.mxu0 %v2928_v17 }
0x1214   :  { %v2925_v9 = vpop.f32.mrf.mxu3 }
0x1290   :  { %v3006_v56 = vpop.f32.mrf.mxu0 }
0x1291   :  { %v3007_v31 = vadd.f32 %v3579_v16, %v3006_v56 }
0x1293   :  { %3010 = vst [vmem:[%s5365_s19] sm:$0xff] %v3007_v31 }
0x1298   :  { %v3008_v20 = vpop.f32.mrf.mxu0 }
0x1299   :  { %3015 = vsyncpa [#allocation3], 1 }
0x129a   :  { %3016 = vsyncpa [#allocation5], 1 }
0x129b   :  { %3017 = vsyncpa [#allocation8], 1 }
0x129c   :  { %3018 = vsyncpa [#allocation11], 1 }

</bundles_post_ra>
